<compile_context>
chip_gen: v7x
topology: tpu7x:2x2x1
jax: 0.10.0
libtpu: 0.0.40
codegen_flags: <defaults>
</compile_context>

<pallas_src>
import functools

import jax
import jax.numpy as jnp
from jax.experimental import pallas as pl
from jax.experimental.pallas import tpu as pltpu


_VMEM = pl.BlockSpec(memory_space=pltpu.MemorySpace.VMEM)
_LANES = 128
_SUB = 8      # f32 sublane tile height; every stacked tap piece uses 8 rows


def _rup(n, m):
    return ((n + m - 1) // m) * m


# ---------------------------------------------------------------------------
# Static configuration (all shift tables are plain Python ints)
# ---------------------------------------------------------------------------
def make_config(*, cv1, cv2, k1, k2, kp, n, h, w):
    assert 3 + 1 <= _SUB and cv1 + 1 <= _SUB and cv2 <= _SUB
    oh1, ow1 = h - k1 + 1, w - k1 + 1
    h1p, w1p = (oh1 - kp) // 2 + 1, (ow1 - kp) // 2 + 1
    oh2, ow2 = h1p - k2 + 1, w1p - k2 + 1
    h2p, w2p = (oh2 - kp) // 2 + 1, (ow2 - kp) // 2 + 1
    assert min(oh1, ow1, oh2, ow2, h2p, w2p) > 0
    sp = _rup(h * w, _LANES)                       # per-image flat lane block
    # lane-shift tables in flat row-major (h, w) coordinates of the input grid
    conv1_shifts = tuple(ki * w + kj for ki in range(k1) for kj in range(k1))
    pool1_shifts = tuple(ph * w + pw for ph in range(kp) for pw in range(kp))
    r2, c2 = 2 * w, 2                              # pooled-1 grid strides
    conv2_shifts = tuple(ki * r2 + kj * c2 for ki in range(k2) for kj in range(k2))
    pool2_shifts = tuple(ph * r2 + pw * c2 for ph in range(kp) for pw in range(kp))
    r3, c3 = 2 * r2, 2 * c2                        # pooled-2 grid strides
    feat_offsets = tuple(i * r3 + j * c3 for i in range(h2p) for j in range(w2p))
    fw = _rup(max(feat_offsets) + 1, _LANES)       # fc1 window width per image
    assert fw <= sp
    return dict(cv1=cv1, cv2=cv2, k1=k1, k2=k2, kp=kp, n=n, h=h, w=w,
                h2p=h2p, w2p=w2p, flat_dim=cv2 * h2p * w2p, sp=sp, fw=fw,
                conv1_shifts=conv1_shifts, pool1_shifts=pool1_shifts,
                conv2_shifts=conv2_shifts, pool2_shifts=pool2_shifts,
                feat_offsets=feat_offsets)


# ---------------------------------------------------------------------------
# The single fused Pallas kernel
# ---------------------------------------------------------------------------
def _fused_forward_kernel(x_ref, w1_ref, w2_ref, wfc1_ref, bfc1_ref,
                          wfc2_ref, bfc2_ref, wfc3_ref, bfc3_ref,
                          wfc4_ref, bfc4_ref, o_ref, p2_scr, h_scr, *, cfg):
    f32 = jnp.float32
    width = x_ref.shape[-1]
    n, cv2, sp, fw = cfg["n"], cfg["cv2"], cfg["sp"], cfg["fw"]

    def shifted(v, d):
        # shifted[:, p] == v[:, (p + d) % width]  (jnp.roll semantics).
        # Wrap-around only lands on flat positions whose downstream weights
        # are zero, so the final result is exact.
        return v if d == 0 else pltpu.roll(v, width - d, 1)

    def conv_stage(src, w_ref, tap_shifts, pool_shifts):
        # One MXU push over the sublane-stacked tap copies (bias folded in via
        # the all-ones row carried inside `src`), ReLU, then maxpool as the
        # elementwise max of pool-offset-shifted copies.
        stack = jnp.concatenate([shifted(src, d) for d in tap_shifts], axis=0)
        act = jnp.maximum(
            jnp.dot(w_ref[...], stack, preferred_element_type=f32), 0.0)
        pooled = act
        for d in pool_shifts:
            if d:
                pooled = jnp.maximum(pooled, shifted(act, d))
        return pooled                                            # (8, width)

    p1 = conv_stage(x_ref[...], w1_ref, cfg["conv1_shifts"], cfg["pool1_shifts"])
    p2 = conv_stage(p1, w2_ref, cfg["conv2_shifts"], cfg["pool2_shifts"])
    p2_scr[...] = p2       # park pooled conv2 output so fc1 can window-load it

    # TODO(synk): nn.Dropout(0.2) training-mode masking not implemented;
    # inference-mode identity is used (matches module.eval()).

    # fc1: per (image, channel) windows against position-scattered weights;
    # lanes between valid pooled positions hit all-zero weight rows => exact.
    for b in range(n):
        acc = None
        for c in range(cv2):
            blk = p2_scr[c:c + 1, b * sp:b * sp + fw]                 # (1, FW)
            t = jnp.dot(blk, wfc1_ref[c], preferred_element_type=f32)  # (1, 256)
            acc = t if acc is None else acc + t
        h_scr[b:b + 1, :] = acc
    h = jnp.maximum(h_scr[0:n, :] + bfc1_ref[...], 0.0)               # (N, 256)

    # fc2 -> fc3 -> fc4 (ReLU each; the reference also ReLUs fc4's output
    # before LogSoftmax).
    h = jnp.maximum(jnp.dot(h, wfc2_ref[...], preferred_element_type=f32)
                    + bfc2_ref[...], 0.0)
    h = jnp.maximum(jnp.dot(h, wfc3_ref[...], preferred_element_type=f32)
                    + bfc3_ref[...], 0.0)
    z = jnp.maximum(jnp.dot(h, wfc4_ref[...], preferred_element_type=f32)
                    + bfc4_ref[...], 0.0)
    m = jnp.max(z, axis=-1, keepdims=True)                            # LogSoftmax(dim=1)
    lse = m + jnp.log(jnp.sum(jnp.exp(z - m), axis=-1, keepdims=True))
    o_ref[...] = (z - lse).astype(o_ref.dtype)


# ---------------------------------------------------------------------------
# Wrapper: minimal host glue + one pallas_call
# ---------------------------------------------------------------------------
def binary_classifier_forward(packed, x, *, cfg):
    n, h, w, sp = cfg["n"], cfg["h"], cfg["w"], cfg["sp"]
    cin = x.shape[1]
    # Host glue (the only XLA ops outside the kernel): channels-major flatten,
    # pad each image's flat block to a 128-multiple, append the all-ones row
    # that folds the conv biases into the MXU, and zero the remaining rows.
    xc = jnp.transpose(x.astype(jnp.float32), (1, 0, 2, 3)).reshape(cin, n, h * w)
    xc = jnp.pad(xc, ((0, 0), (0, 0), (0, sp - h * w)))
    rows = [xc, jnp.ones((1, n, sp), jnp.float32)]
    if _SUB - cin - 1 > 0:
        rows.append(jnp.zeros((_SUB - cin - 1, n, sp), jnp.float32))
    xflat = jnp.concatenate(rows, axis=0).reshape(_SUB, n * sp)

    kernel = functools.partial(_fused_forward_kernel, cfg=cfg)
    return pl.pallas_call(
        kernel,
        out_shape=jax.ShapeDtypeStruct((n, 2), jnp.float32),
        in_specs=[_VMEM] * 11,
        out_specs=_VMEM,
        scratch_shapes=[pltpu.VMEM((_SUB, n * sp), jnp.float32),   # pooled conv2
                        pltpu.VMEM((_SUB, 256), jnp.float32)],      # fc1 rows
    )(xflat, packed["conv1_w"], packed["conv2_w"],
      packed["fc1_w"], packed["fc1_b"], packed["fc2_w"], packed["fc2_b"],
      packed["fc3_w"], packed["fc3_b"], packed["fc4_w"], packed["fc4_b"])


# ---------------------------------------------------------------------------
# One-time host-side parameter packing (kernel-ready, aligned layouts)
# ---------------------------------------------------------------------------
def pack_params(raw, cfg):
    cv1, cv2, k1, k2 = cfg["cv1"], cfg["cv2"], cfg["k1"], cfg["k2"]
    cin = raw["conv1_w"].shape[1]
    f32 = jnp.float32

    # conv1: rows = output channels (+ ones-row generator), cols = 8*taps.
    w1 = jnp.zeros((_SUB, _SUB * k1 * k1), f32)
    taps1 = [(ki, kj) for ki in range(k1) for kj in range(k1)]
    for t, (ki, kj) in enumerate(taps1):
        w1 = w1.at[:cv1, _SUB * t:_SUB * t + cin].set(raw["conv1_w"][:, :, ki, kj])
    w1 = w1.at[:cv1, cin].set(raw["conv1_b"])   # bias via x's all-ones row (tap 0)
    w1 = w1.at[cv1, cin].set(1.0)               # regenerate the ones row for conv2

    w2 = jnp.zeros((_SUB, _SUB * k2 * k2), f32)
    taps2 = [(ki, kj) for ki in range(k2) for kj in range(k2)]
    for t, (ki, kj) in enumerate(taps2):
        w2 = w2.at[:cv2, _SUB * t:_SUB * t + cv1].set(raw["conv2_w"][:, :, ki, kj])
    w2 = w2.at[:cv2, cv1].set(raw["conv2_b"])   # bias via pooled1's ones row (tap 0)

    # fc1: scatter rows to the native strided lane offsets of the pooled grid.
    offs = jnp.asarray(cfg["feat_offsets"], jnp.int32)
    wfc1 = jnp.zeros((cv2, cfg["fw"], 256), f32)
    wfc1 = wfc1.at[:, offs, :].set(
        raw["fc1_w"].reshape(cv2, cfg["h2p"] * cfg["w2p"], 256))

    pad84, pad16 = 128 - 84, 128 - 16
    return {
        "conv1_w": w1, "conv2_w": w2,
        "fc1_w": wfc1, "fc1_b": raw["fc1_b"].reshape(1, 256),
        "fc2_w": jnp.pad(raw["fc2_w"], ((0, 0), (0, pad84))),
        "fc2_b": jnp.pad(raw["fc2_b"].reshape(1, 84), ((0, 0), (0, pad84))),
        "fc3_w": jnp.pad(raw["fc3_w"], ((0, pad84), (0, pad16))),
        "fc3_b": jnp.pad(raw["fc3_b"].reshape(1, 16), ((0, 0), (0, pad16))),
        "fc4_w": jnp.pad(raw["fc4_w"], ((0, pad16), (0, 0))),
        "fc4_b": raw["fc4_b"].reshape(1, 2),
    }


# ---------------------------------------------------------------------------
# Deterministic PyTorch-default-style uniform init
# ---------------------------------------------------------------------------
def _uniform(key, shape, fan_in):
    bound = float(fan_in) ** -0.5
    return jax.random.uniform(key, shape, jnp.float32, -bound, bound)


def init_params(key, cfg):
    cv1, cv2, k1, k2 = cfg["cv1"], cfg["cv2"], cfg["k1"], cfg["k2"]
    flat_dim = cfg["flat_dim"]
    ks = jax.random.split(key, 12)
    p = {}
    fan = 3 * k1 * k1
    p["conv1_w"] = _uniform(ks[0], (cv1, 3, k1, k1), fan)
    p["conv1_b"] = _uniform(ks[1], (cv1,), fan)
    fan = cv1 * k2 * k2
    p["conv2_w"] = _uniform(ks[2], (cv2, cv1, k2, k2), fan)
    p["conv2_b"] = _uniform(ks[3], (cv2,), fan)
    # TODO(synk): the PyTorch reference re-creates fc1 with fresh random init on
    # every forward; here it is initialized once, deterministically. (in, out).
    p["fc1_w"] = _uniform(ks[4], (flat_dim, 256), flat_dim)
    p["fc1_b"] = _uniform(ks[5], (256,), flat_dim)
    p["fc2_w"] = _uniform(ks[6], (256, 84), 256)
    p["fc2_b"] = _uniform(ks[7], (84,), 256)
    p["fc3_w"] = _uniform(ks[8], (84, 16), 84)
    p["fc3_b"] = _uniform(ks[9], (16,), 84)
    p["fc4_w"] = _uniform(ks[10], (16, 2), 16)
    p["fc4_b"] = _uniform(ks[11], (2,), 16)
    return p


# ---------------------------------------------------------------------------
if __name__ == "__main__":
    cv1, cv2, k1, k2, kp1 = 4, 8, 3, 3, 2
    N, H, W = 2, 18, 18        # 18 -> conv 16 -> pool 8 -> conv 6 -> pool 3
    cfg = make_config(cv1=cv1, cv2=cv2, k1=k1, k2=k2, kp=kp1, n=N, h=H, w=W)
    assert cfg["flat_dim"] == cv2 * 3 * 3       # 72, as in the PyTorch trace

    key = jax.random.PRNGKey(0)
    k_x, k_p = jax.random.split(key)
    x = jax.random.normal(k_x, (N, 3, H, W), jnp.float32)
    raw = init_params(k_p, cfg)
    packed = jax.tree.map(jax.device_put, pack_params(raw, cfg))

    fwd = jax.jit(functools.partial(binary_classifier_forward, cfg=cfg))
    out = fwd(packed, x)
    jax.block_until_ready(out)

    assert out.shape == (N, 2)
    assert bool(jnp.all(jnp.isfinite(out)))
    # rows of exp(logsoftmax) must sum to 1
    assert bool(jnp.allclose(jnp.sum(jnp.exp(out), axis=1), 1.0, atol=1e-5))
    print("KERNEL_OK")
</pallas_src>

<mosaic_0001>
module attributes {stable_mosaic.version = 11 : i64} {
  func.func @_fused_forward_kernel(%arg0: memref<8x768xf32, #tpu.memory_space<vmem>>, %arg1: memref<8x72xf32, #tpu.memory_space<vmem>>, %arg2: memref<8x72xf32, #tpu.memory_space<vmem>>, %arg3: memref<8x256x256xf32, #tpu.memory_space<vmem>>, %arg4: memref<1x256xf32, #tpu.memory_space<vmem>>, %arg5: memref<256x128xf32, #tpu.memory_space<vmem>>, %arg6: memref<1x128xf32, #tpu.memory_space<vmem>>, %arg7: memref<128x128xf32, #tpu.memory_space<vmem>>, %arg8: memref<1x128xf32, #tpu.memory_space<vmem>>, %arg9: memref<128x2xf32, #tpu.memory_space<vmem>>, %arg10: memref<1x2xf32, #tpu.memory_space<vmem>>, %arg11: memref<2x2xf32, #tpu.memory_space<vmem>>, %arg12: memref<8x768xf32, #tpu.memory_space<vmem>>, %arg13: memref<8x256xf32, #tpu.memory_space<vmem>>) attributes {dimension_semantics = [], scalar_prefetch = 0 : i64, scratch_operands = 2 : i64, tpu.core_type = #tpu.core_type<tc>} {
    %c0 = arith.constant 0 : index
    %c0_0 = arith.constant 0 : index
    %0 = vector.load %arg0[%c0, %c0_0] : memref<8x768xf32, #tpu.memory_space<vmem>>, vector<8x768xf32>
    %c767_i32 = arith.constant 767 : i32
    %1 = tpu.dynamic_rotate %0 by %c767_i32 dim 1 : vector<8x768xf32>, i32 -> vector<8x768xf32>
    %c766_i32 = arith.constant 766 : i32
    %2 = tpu.dynamic_rotate %0 by %c766_i32 dim 1 : vector<8x768xf32>, i32 -> vector<8x768xf32>
    %c750_i32 = arith.constant 750 : i32
    %3 = tpu.dynamic_rotate %0 by %c750_i32 dim 1 : vector<8x768xf32>, i32 -> vector<8x768xf32>
    %c749_i32 = arith.constant 749 : i32
    %4 = tpu.dynamic_rotate %0 by %c749_i32 dim 1 : vector<8x768xf32>, i32 -> vector<8x768xf32>
    %c748_i32 = arith.constant 748 : i32
    %5 = tpu.dynamic_rotate %0 by %c748_i32 dim 1 : vector<8x768xf32>, i32 -> vector<8x768xf32>
    %c732_i32 = arith.constant 732 : i32
    %6 = tpu.dynamic_rotate %0 by %c732_i32 dim 1 : vector<8x768xf32>, i32 -> vector<8x768xf32>
    %c731_i32 = arith.constant 731 : i32
    %7 = tpu.dynamic_rotate %0 by %c731_i32 dim 1 : vector<8x768xf32>, i32 -> vector<8x768xf32>
    %c730_i32 = arith.constant 730 : i32
    %8 = tpu.dynamic_rotate %0 by %c730_i32 dim 1 : vector<8x768xf32>, i32 -> vector<8x768xf32>
    %9 = tpu.concatenate %0, %1, %2, %3, %4, %5, %6, %7, %8 in 0 : vector<8x768xf32>, vector<8x768xf32>, vector<8x768xf32>, vector<8x768xf32>, vector<8x768xf32>, vector<8x768xf32>, vector<8x768xf32>, vector<8x768xf32>, vector<8x768xf32> -> vector<72x768xf32>
    %c0_1 = arith.constant 0 : index
    %c0_2 = arith.constant 0 : index
    %10 = vector.load %arg1[%c0_1, %c0_2] : memref<8x72xf32, #tpu.memory_space<vmem>>, vector<8x72xf32>
    %cst = arith.constant dense<0.000000e+00> : vector<8x768xf32>
    %11 = tpu.matmul %10, %9, %cst {dimension_numbers = #tpu.dot_dimension_numbers<[1], [0], [0], [1], [0, 0, 1, 1], [], []>} : vector<8x72xf32>, vector<72x768xf32>, vector<8x768xf32> -> vector<8x768xf32>
    %cst_3 = arith.constant 0.000000e+00 : f32
    %12 = vector.broadcast %cst_3 : f32 to vector<8x768xf32>
    %13 = arith.maximumf %11, %12 : vector<8x768xf32>
    %c767_i32_4 = arith.constant 767 : i32
    %14 = tpu.dynamic_rotate %13 by %c767_i32_4 dim 1 : vector<8x768xf32>, i32 -> vector<8x768xf32>
    %15 = arith.maximumf %13, %14 : vector<8x768xf32>
    %c750_i32_5 = arith.constant 750 : i32
    %16 = tpu.dynamic_rotate %13 by %c750_i32_5 dim 1 : vector<8x768xf32>, i32 -> vector<8x768xf32>
    %17 = arith.maximumf %15, %16 : vector<8x768xf32>
    %c749_i32_6 = arith.constant 749 : i32
    %18 = tpu.dynamic_rotate %13 by %c749_i32_6 dim 1 : vector<8x768xf32>, i32 -> vector<8x768xf32>
    %19 = arith.maximumf %17, %18 : vector<8x768xf32>
    %c766_i32_7 = arith.constant 766 : i32
    %20 = tpu.dynamic_rotate %19 by %c766_i32_7 dim 1 : vector<8x768xf32>, i32 -> vector<8x768xf32>
    %c764_i32 = arith.constant 764 : i32
    %21 = tpu.dynamic_rotate %19 by %c764_i32 dim 1 : vector<8x768xf32>, i32 -> vector<8x768xf32>
    %c732_i32_8 = arith.constant 732 : i32
    %22 = tpu.dynamic_rotate %19 by %c732_i32_8 dim 1 : vector<8x768xf32>, i32 -> vector<8x768xf32>
    %c730_i32_9 = arith.constant 730 : i32
    %23 = tpu.dynamic_rotate %19 by %c730_i32_9 dim 1 : vector<8x768xf32>, i32 -> vector<8x768xf32>
    %c728_i32 = arith.constant 728 : i32
    %24 = tpu.dynamic_rotate %19 by %c728_i32 dim 1 : vector<8x768xf32>, i32 -> vector<8x768xf32>
    %c696_i32 = arith.constant 696 : i32
    %25 = tpu.dynamic_rotate %19 by %c696_i32 dim 1 : vector<8x768xf32>, i32 -> vector<8x768xf32>
    %c694_i32 = arith.constant 694 : i32
    %26 = tpu.dynamic_rotate %19 by %c694_i32 dim 1 : vector<8x768xf32>, i32 -> vector<8x768xf32>
    %c692_i32 = arith.constant 692 : i32
    %27 = tpu.dynamic_rotate %19 by %c692_i32 dim 1 : vector<8x768xf32>, i32 -> vector<8x768xf32>
    %28 = tpu.concatenate %19, %20, %21, %22, %23, %24, %25, %26, %27 in 0 : vector<8x768xf32>, vector<8x768xf32>, vector<8x768xf32>, vector<8x768xf32>, vector<8x768xf32>, vector<8x768xf32>, vector<8x768xf32>, vector<8x768xf32>, vector<8x768xf32> -> vector<72x768xf32>
    %c0_10 = arith.constant 0 : index
    %c0_11 = arith.constant 0 : index
    %29 = vector.load %arg2[%c0_10, %c0_11] : memref<8x72xf32, #tpu.memory_space<vmem>>, vector<8x72xf32>
    %cst_12 = arith.constant dense<0.000000e+00> : vector<8x768xf32>
    %30 = tpu.matmul %29, %28, %cst_12 {dimension_numbers = #tpu.dot_dimension_numbers<[1], [0], [0], [1], [0, 0, 1, 1], [], []>} : vector<8x72xf32>, vector<72x768xf32>, vector<8x768xf32> -> vector<8x768xf32>
    %cst_13 = arith.constant 0.000000e+00 : f32
    %31 = vector.broadcast %cst_13 : f32 to vector<8x768xf32>
    %32 = arith.maximumf %30, %31 : vector<8x768xf32>
    %c766_i32_14 = arith.constant 766 : i32
    %33 = tpu.dynamic_rotate %32 by %c766_i32_14 dim 1 : vector<8x768xf32>, i32 -> vector<8x768xf32>
    %34 = arith.maximumf %32, %33 : vector<8x768xf32>
    %c732_i32_15 = arith.constant 732 : i32
    %35 = tpu.dynamic_rotate %32 by %c732_i32_15 dim 1 : vector<8x768xf32>, i32 -> vector<8x768xf32>
    %36 = arith.maximumf %34, %35 : vector<8x768xf32>
    %c730_i32_16 = arith.constant 730 : i32
    %37 = tpu.dynamic_rotate %32 by %c730_i32_16 dim 1 : vector<8x768xf32>, i32 -> vector<8x768xf32>
    %38 = arith.maximumf %36, %37 : vector<8x768xf32>
    %c0_17 = arith.constant 0 : index
    %c0_18 = arith.constant 0 : index
    %39 = vector.load %arg12[%c0_17, %c0_18] : memref<8x768xf32, #tpu.memory_space<vmem>>, vector<8x768xf32>
    tpu.vector_store %arg12[%c0_17, %c0_18], %38 {strides = array<i32>} : memref<8x768xf32, #tpu.memory_space<vmem>>, vector<8x768xf32>,
    %c0_19 = arith.constant 0 : index
    %c0_20 = arith.constant 0 : index
    %40 = vector.load %arg12[%c0_19, %c0_20] : memref<8x768xf32, #tpu.memory_space<vmem>>, vector<1x256xf32>
    %c0_21 = arith.constant 0 : index
    %c0_22 = arith.constant 0 : index
    %c0_23 = arith.constant 0 : index
    %41 = vector.load %arg3[%c0_21, %c0_22, %c0_23] : memref<8x256x256xf32, #tpu.memory_space<vmem>>, vector<1x256x256xf32>
    %42 = vector.shape_cast %41 : vector<1x256x256xf32> to vector<256x256xf32>
    %cst_24 = arith.constant dense<0.000000e+00> : vector<1x256xf32>
    %43 = tpu.matmul %40, %42, %cst_24 {dimension_numbers = #tpu.dot_dimension_numbers<[1], [0], [0], [1], [0, 0, 1, 1], [], []>} : vector<1x256xf32>, vector<256x256xf32>, vector<1x256xf32> -> vector<1x256xf32>
    %c1 = arith.constant 1 : index
    %c0_25 = arith.constant 0 : index
    %44 = vector.load %arg12[%c1, %c0_25] : memref<8x768xf32, #tpu.memory_space<vmem>>, vector<1x256xf32>
    %c1_26 = arith.constant 1 : index
    %c0_27 = arith.constant 0 : index
    %c0_28 = arith.constant 0 : index
    %45 = vector.load %arg3[%c1_26, %c0_27, %c0_28] : memref<8x256x256xf32, #tpu.memory_space<vmem>>, vector<1x256x256xf32>
    %46 = vector.shape_cast %45 : vector<1x256x256xf32> to vector<256x256xf32>
    %cst_29 = arith.constant dense<0.000000e+00> : vector<1x256xf32>
    %47 = tpu.matmul %44, %46, %cst_29 {dimension_numbers = #tpu.dot_dimension_numbers<[1], [0], [0], [1], [0, 0, 1, 1], [], []>} : vector<1x256xf32>, vector<256x256xf32>, vector<1x256xf32> -> vector<1x256xf32>
    %48 = arith.addf %43, %47 : vector<1x256xf32>
    %c2 = arith.constant 2 : index
    %c0_30 = arith.constant 0 : index
    %49 = vector.load %arg12[%c2, %c0_30] : memref<8x768xf32, #tpu.memory_space<vmem>>, vector<1x256xf32>
    %c2_31 = arith.constant 2 : index
    %c0_32 = arith.constant 0 : index
    %c0_33 = arith.constant 0 : index
    %50 = vector.load %arg3[%c2_31, %c0_32, %c0_33] : memref<8x256x256xf32, #tpu.memory_space<vmem>>, vector<1x256x256xf32>
    %51 = vector.shape_cast %50 : vector<1x256x256xf32> to vector<256x256xf32>
    %cst_34 = arith.constant dense<0.000000e+00> : vector<1x256xf32>
    %52 = tpu.matmul %49, %51, %cst_34 {dimension_numbers = #tpu.dot_dimension_numbers<[1], [0], [0], [1], [0, 0, 1, 1], [], []>} : vector<1x256xf32>, vector<256x256xf32>, vector<1x256xf32> -> vector<1x256xf32>
    %53 = arith.addf %48, %52 : vector<1x256xf32>
    %c3 = arith.constant 3 : index
    %c0_35 = arith.constant 0 : index
    %54 = vector.load %arg12[%c3, %c0_35] : memref<8x768xf32, #tpu.memory_space<vmem>>, vector<1x256xf32>
    %c3_36 = arith.constant 3 : index
    %c0_37 = arith.constant 0 : index
    %c0_38 = arith.constant 0 : index
    %55 = vector.load %arg3[%c3_36, %c0_37, %c0_38] : memref<8x256x256xf32, #tpu.memory_space<vmem>>, vector<1x256x256xf32>
    %56 = vector.shape_cast %55 : vector<1x256x256xf32> to vector<256x256xf32>
    %cst_39 = arith.constant dense<0.000000e+00> : vector<1x256xf32>
    %57 = tpu.matmul %54, %56, %cst_39 {dimension_numbers = #tpu.dot_dimension_numbers<[1], [0], [0], [1], [0, 0, 1, 1], [], []>} : vector<1x256xf32>, vector<256x256xf32>, vector<1x256xf32> -> vector<1x256xf32>
    %58 = arith.addf %53, %57 : vector<1x256xf32>
    %c4 = arith.constant 4 : index
    %c0_40 = arith.constant 0 : index
    %59 = vector.load %arg12[%c4, %c0_40] : memref<8x768xf32, #tpu.memory_space<vmem>>, vector<1x256xf32>
    %c4_41 = arith.constant 4 : index
    %c0_42 = arith.constant 0 : index
    %c0_43 = arith.constant 0 : index
    %60 = vector.load %arg3[%c4_41, %c0_42, %c0_43] : memref<8x256x256xf32, #tpu.memory_space<vmem>>, vector<1x256x256xf32>
    %61 = vector.shape_cast %60 : vector<1x256x256xf32> to vector<256x256xf32>
    %cst_44 = arith.constant dense<0.000000e+00> : vector<1x256xf32>
    %62 = tpu.matmul %59, %61, %cst_44 {dimension_numbers = #tpu.dot_dimension_numbers<[1], [0], [0], [1], [0, 0, 1, 1], [], []>} : vector<1x256xf32>, vector<256x256xf32>, vector<1x256xf32> -> vector<1x256xf32>
    %63 = arith.addf %58, %62 : vector<1x256xf32>
    %c5 = arith.constant 5 : index
    %c0_45 = arith.constant 0 : index
    %64 = vector.load %arg12[%c5, %c0_45] : memref<8x768xf32, #tpu.memory_space<vmem>>, vector<1x256xf32>
    %c5_46 = arith.constant 5 : index
    %c0_47 = arith.constant 0 : index
    %c0_48 = arith.constant 0 : index
    %65 = vector.load %arg3[%c5_46, %c0_47, %c0_48] : memref<8x256x256xf32, #tpu.memory_space<vmem>>, vector<1x256x256xf32>
    %66 = vector.shape_cast %65 : vector<1x256x256xf32> to vector<256x256xf32>
    %cst_49 = arith.constant dense<0.000000e+00> : vector<1x256xf32>
    %67 = tpu.matmul %64, %66, %cst_49 {dimension_numbers = #tpu.dot_dimension_numbers<[1], [0], [0], [1], [0, 0, 1, 1], [], []>} : vector<1x256xf32>, vector<256x256xf32>, vector<1x256xf32> -> vector<1x256xf32>
    %68 = arith.addf %63, %67 : vector<1x256xf32>
    %c6 = arith.constant 6 : index
    %c0_50 = arith.constant 0 : index
    %69 = vector.load %arg12[%c6, %c0_50] : memref<8x768xf32, #tpu.memory_space<vmem>>, vector<1x256xf32>
    %c6_51 = arith.constant 6 : index
    %c0_52 = arith.constant 0 : index
    %c0_53 = arith.constant 0 : index
    %70 = vector.load %arg3[%c6_51, %c0_52, %c0_53] : memref<8x256x256xf32, #tpu.memory_space<vmem>>, vector<1x256x256xf32>
    %71 = vector.shape_cast %70 : vector<1x256x256xf32> to vector<256x256xf32>
    %cst_54 = arith.constant dense<0.000000e+00> : vector<1x256xf32>
    %72 = tpu.matmul %69, %71, %cst_54 {dimension_numbers = #tpu.dot_dimension_numbers<[1], [0], [0], [1], [0, 0, 1, 1], [], []>} : vector<1x256xf32>, vector<256x256xf32>, vector<1x256xf32> -> vector<1x256xf32>
    %73 = arith.addf %68, %72 : vector<1x256xf32>
    %c7 = arith.constant 7 : index
    %c0_55 = arith.constant 0 : index
    %74 = vector.load %arg12[%c7, %c0_55] : memref<8x768xf32, #tpu.memory_space<vmem>>, vector<1x256xf32>
    %c7_56 = arith.constant 7 : index
    %c0_57 = arith.constant 0 : index
    %c0_58 = arith.constant 0 : index
    %75 = vector.load %arg3[%c7_56, %c0_57, %c0_58] : memref<8x256x256xf32, #tpu.memory_space<vmem>>, vector<1x256x256xf32>
    %76 = vector.shape_cast %75 : vector<1x256x256xf32> to vector<256x256xf32>
    %cst_59 = arith.constant dense<0.000000e+00> : vector<1x256xf32>
    %77 = tpu.matmul %74, %76, %cst_59 {dimension_numbers = #tpu.dot_dimension_numbers<[1], [0], [0], [1], [0, 0, 1, 1], [], []>} : vector<1x256xf32>, vector<256x256xf32>, vector<1x256xf32> -> vector<1x256xf32>
    %78 = arith.addf %73, %77 : vector<1x256xf32>
    %c0_60 = arith.constant 0 : index
    %c0_61 = arith.constant 0 : index
    %79 = vector.load %arg13[%c0_60, %c0_61] : memref<8x256xf32, #tpu.memory_space<vmem>>, vector<1x256xf32>
    tpu.vector_store %arg13[%c0_60, %c0_61], %78 {strides = array<i32>} : memref<8x256xf32, #tpu.memory_space<vmem>>, vector<1x256xf32>,
    %c0_62 = arith.constant 0 : index
    %c384 = arith.constant 384 : index
    %80 = vector.load %arg12[%c0_62, %c384] : memref<8x768xf32, #tpu.memory_space<vmem>>, vector<1x256xf32>
    %c0_63 = arith.constant 0 : index
    %c0_64 = arith.constant 0 : index
    %c0_65 = arith.constant 0 : index
    %81 = vector.load %arg3[%c0_63, %c0_64, %c0_65] : memref<8x256x256xf32, #tpu.memory_space<vmem>>, vector<1x256x256xf32>
    %82 = vector.shape_cast %81 : vector<1x256x256xf32> to vector<256x256xf32>
    %cst_66 = arith.constant dense<0.000000e+00> : vector<1x256xf32>
    %83 = tpu.matmul %80, %82, %cst_66 {dimension_numbers = #tpu.dot_dimension_numbers<[1], [0], [0], [1], [0, 0, 1, 1], [], []>} : vector<1x256xf32>, vector<256x256xf32>, vector<1x256xf32> -> vector<1x256xf32>
    %c1_67 = arith.constant 1 : index
    %c384_68 = arith.constant 384 : index
    %84 = vector.load %arg12[%c1_67, %c384_68] : memref<8x768xf32, #tpu.memory_space<vmem>>, vector<1x256xf32>
    %c1_69 = arith.constant 1 : index
    %c0_70 = arith.constant 0 : index
    %c0_71 = arith.constant 0 : index
    %85 = vector.load %arg3[%c1_69, %c0_70, %c0_71] : memref<8x256x256xf32, #tpu.memory_space<vmem>>, vector<1x256x256xf32>
    %86 = vector.shape_cast %85 : vector<1x256x256xf32> to vector<256x256xf32>
    %cst_72 = arith.constant dense<0.000000e+00> : vector<1x256xf32>
    %87 = tpu.matmul %84, %86, %cst_72 {dimension_numbers = #tpu.dot_dimension_numbers<[1], [0], [0], [1], [0, 0, 1, 1], [], []>} : vector<1x256xf32>, vector<256x256xf32>, vector<1x256xf32> -> vector<1x256xf32>
    %88 = arith.addf %83, %87 : vector<1x256xf32>
    %c2_73 = arith.constant 2 : index
    %c384_74 = arith.constant 384 : index
    %89 = vector.load %arg12[%c2_73, %c384_74] : memref<8x768xf32, #tpu.memory_space<vmem>>, vector<1x256xf32>
    %c2_75 = arith.constant 2 : index
    %c0_76 = arith.constant 0 : index
    %c0_77 = arith.constant 0 : index
    %90 = vector.load %arg3[%c2_75, %c0_76, %c0_77] : memref<8x256x256xf32, #tpu.memory_space<vmem>>, vector<1x256x256xf32>
    %91 = vector.shape_cast %90 : vector<1x256x256xf32> to vector<256x256xf32>
    %cst_78 = arith.constant dense<0.000000e+00> : vector<1x256xf32>
    %92 = tpu.matmul %89, %91, %cst_78 {dimension_numbers = #tpu.dot_dimension_numbers<[1], [0], [0], [1], [0, 0, 1, 1], [], []>} : vector<1x256xf32>, vector<256x256xf32>, vector<1x256xf32> -> vector<1x256xf32>
    %93 = arith.addf %88, %92 : vector<1x256xf32>
    %c3_79 = arith.constant 3 : index
    %c384_80 = arith.constant 384 : index
    %94 = vector.load %arg12[%c3_79, %c384_80] : memref<8x768xf32, #tpu.memory_space<vmem>>, vector<1x256xf32>
    %c3_81 = arith.constant 3 : index
    %c0_82 = arith.constant 0 : index
    %c0_83 = arith.constant 0 : index
    %95 = vector.load %arg3[%c3_81, %c0_82, %c0_83] : memref<8x256x256xf32, #tpu.memory_space<vmem>>, vector<1x256x256xf32>
    %96 = vector.shape_cast %95 : vector<1x256x256xf32> to vector<256x256xf32>
    %cst_84 = arith.constant dense<0.000000e+00> : vector<1x256xf32>
    %97 = tpu.matmul %94, %96, %cst_84 {dimension_numbers = #tpu.dot_dimension_numbers<[1], [0], [0], [1], [0, 0, 1, 1], [], []>} : vector<1x256xf32>, vector<256x256xf32>, vector<1x256xf32> -> vector<1x256xf32>
    %98 = arith.addf %93, %97 : vector<1x256xf32>
    %c4_85 = arith.constant 4 : index
    %c384_86 = arith.constant 384 : index
    %99 = vector.load %arg12[%c4_85, %c384_86] : memref<8x768xf32, #tpu.memory_space<vmem>>, vector<1x256xf32>
    %c4_87 = arith.constant 4 : index
    %c0_88 = arith.constant 0 : index
    %c0_89 = arith.constant 0 : index
    %100 = vector.load %arg3[%c4_87, %c0_88, %c0_89] : memref<8x256x256xf32, #tpu.memory_space<vmem>>, vector<1x256x256xf32>
    %101 = vector.shape_cast %100 : vector<1x256x256xf32> to vector<256x256xf32>
    %cst_90 = arith.constant dense<0.000000e+00> : vector<1x256xf32>
    %102 = tpu.matmul %99, %101, %cst_90 {dimension_numbers = #tpu.dot_dimension_numbers<[1], [0], [0], [1], [0, 0, 1, 1], [], []>} : vector<1x256xf32>, vector<256x256xf32>, vector<1x256xf32> -> vector<1x256xf32>
    %103 = arith.addf %98, %102 : vector<1x256xf32>
    %c5_91 = arith.constant 5 : index
    %c384_92 = arith.constant 384 : index
    %104 = vector.load %arg12[%c5_91, %c384_92] : memref<8x768xf32, #tpu.memory_space<vmem>>, vector<1x256xf32>
    %c5_93 = arith.constant 5 : index
    %c0_94 = arith.constant 0 : index
    %c0_95 = arith.constant 0 : index
    %105 = vector.load %arg3[%c5_93, %c0_94, %c0_95] : memref<8x256x256xf32, #tpu.memory_space<vmem>>, vector<1x256x256xf32>
    %106 = vector.shape_cast %105 : vector<1x256x256xf32> to vector<256x256xf32>
    %cst_96 = arith.constant dense<0.000000e+00> : vector<1x256xf32>
    %107 = tpu.matmul %104, %106, %cst_96 {dimension_numbers = #tpu.dot_dimension_numbers<[1], [0], [0], [1], [0, 0, 1, 1], [], []>} : vector<1x256xf32>, vector<256x256xf32>, vector<1x256xf32> -> vector<1x256xf32>
    %108 = arith.addf %103, %107 : vector<1x256xf32>
    %c6_97 = arith.constant 6 : index
    %c384_98 = arith.constant 384 : index
    %109 = vector.load %arg12[%c6_97, %c384_98] : memref<8x768xf32, #tpu.memory_space<vmem>>, vector<1x256xf32>
    %c6_99 = arith.constant 6 : index
    %c0_100 = arith.constant 0 : index
    %c0_101 = arith.constant 0 : index
    %110 = vector.load %arg3[%c6_99, %c0_100, %c0_101] : memref<8x256x256xf32, #tpu.memory_space<vmem>>, vector<1x256x256xf32>
    %111 = vector.shape_cast %110 : vector<1x256x256xf32> to vector<256x256xf32>
    %cst_102 = arith.constant dense<0.000000e+00> : vector<1x256xf32>
    %112 = tpu.matmul %109, %111, %cst_102 {dimension_numbers = #tpu.dot_dimension_numbers<[1], [0], [0], [1], [0, 0, 1, 1], [], []>} : vector<1x256xf32>, vector<256x256xf32>, vector<1x256xf32> -> vector<1x256xf32>
    %113 = arith.addf %108, %112 : vector<1x256xf32>
    %c7_103 = arith.constant 7 : index
    %c384_104 = arith.constant 384 : index
    %114 = vector.load %arg12[%c7_103, %c384_104] : memref<8x768xf32, #tpu.memory_space<vmem>>, vector<1x256xf32>
    %c7_105 = arith.constant 7 : index
    %c0_106 = arith.constant 0 : index
    %c0_107 = arith.constant 0 : index
    %115 = vector.load %arg3[%c7_105, %c0_106, %c0_107] : memref<8x256x256xf32, #tpu.memory_space<vmem>>, vector<1x256x256xf32>
    %116 = vector.shape_cast %115 : vector<1x256x256xf32> to vector<256x256xf32>
    %cst_108 = arith.constant dense<0.000000e+00> : vector<1x256xf32>
    %117 = tpu.matmul %114, %116, %cst_108 {dimension_numbers = #tpu.dot_dimension_numbers<[1], [0], [0], [1], [0, 0, 1, 1], [], []>} : vector<1x256xf32>, vector<256x256xf32>, vector<1x256xf32> -> vector<1x256xf32>
    %118 = arith.addf %113, %117 : vector<1x256xf32>
    %c1_109 = arith.constant 1 : index
    %c0_110 = arith.constant 0 : index
    %119 = vector.load %arg13[%c1_109, %c0_110] : memref<8x256xf32, #tpu.memory_space<vmem>>, vector<1x256xf32>
    tpu.vector_store %arg13[%c1_109, %c0_110], %118 {strides = array<i32>} : memref<8x256xf32, #tpu.memory_space<vmem>>, vector<1x256xf32>,
    %c0_111 = arith.constant 0 : index
    %c0_112 = arith.constant 0 : index
    %120 = vector.load %arg13[%c0_111, %c0_112] : memref<8x256xf32, #tpu.memory_space<vmem>>, vector<2x256xf32>
    %c0_113 = arith.constant 0 : index
    %c0_114 = arith.constant 0 : index
    %121 = vector.load %arg4[%c0_113, %c0_114] : memref<1x256xf32, #tpu.memory_space<vmem>>, vector<1x256xf32>
    %122 = vector.broadcast %121 : vector<1x256xf32> to vector<2x256xf32>
    %123 = arith.addf %120, %122 : vector<2x256xf32>
    %cst_115 = arith.constant 0.000000e+00 : f32
    %124 = vector.broadcast %cst_115 : f32 to vector<2x256xf32>
    %125 = arith.maximumf %123, %124 : vector<2x256xf32>
    %c0_116 = arith.constant 0 : index
    %c0_117 = arith.constant 0 : index
    %126 = vector.load %arg5[%c0_116, %c0_117] : memref<256x128xf32, #tpu.memory_space<vmem>>, vector<256x128xf32>
    %cst_118 = arith.constant dense<0.000000e+00> : vector<2x128xf32>
    %127 = tpu.matmul %125, %126, %cst_118 {dimension_numbers = #tpu.dot_dimension_numbers<[1], [0], [0], [1], [0, 0, 1, 1], [], []>} : vector<2x256xf32>, vector<256x128xf32>, vector<2x128xf32> -> vector<2x128xf32>
    %c0_119 = arith.constant 0 : index
    %c0_120 = arith.constant 0 : index
    %128 = vector.load %arg6[%c0_119, %c0_120] : memref<1x128xf32, #tpu.memory_space<vmem>>, vector<1x128xf32>
    %129 = vector.broadcast %128 : vector<1x128xf32> to vector<2x128xf32>
    %130 = arith.addf %127, %129 : vector<2x128xf32>
    %cst_121 = arith.constant 0.000000e+00 : f32
    %131 = vector.broadcast %cst_121 : f32 to vector<2x128xf32>
    %132 = arith.maximumf %130, %131 : vector<2x128xf32>
    %c0_122 = arith.constant 0 : index
    %c0_123 = arith.constant 0 : index
    %133 = vector.load %arg7[%c0_122, %c0_123] : memref<128x128xf32, #tpu.memory_space<vmem>>, vector<128x128xf32>
    %cst_124 = arith.constant dense<0.000000e+00> : vector<2x128xf32>
    %134 = tpu.matmul %132, %133, %cst_124 {dimension_numbers = #tpu.dot_dimension_numbers<[1], [0], [0], [1], [0, 0, 1, 1], [], []>} : vector<2x128xf32>, vector<128x128xf32>, vector<2x128xf32> -> vector<2x128xf32>
    %c0_125 = arith.constant 0 : index
    %c0_126 = arith.constant 0 : index
    %135 = vector.load %arg8[%c0_125, %c0_126] : memref<1x128xf32, #tpu.memory_space<vmem>>, vector<1x128xf32>
    %136 = vector.broadcast %135 : vector<1x128xf32> to vector<2x128xf32>
    %137 = arith.addf %134, %136 : vector<2x128xf32>
    %cst_127 = arith.constant 0.000000e+00 : f32
    %138 = vector.broadcast %cst_127 : f32 to vector<2x128xf32>
    %139 = arith.maximumf %137, %138 : vector<2x128xf32>
    %c0_128 = arith.constant 0 : index
    %c0_129 = arith.constant 0 : index
    %140 = vector.load %arg9[%c0_128, %c0_129] : memref<128x2xf32, #tpu.memory_space<vmem>>, vector<128x2xf32>
    %cst_130 = arith.constant dense<0.000000e+00> : vector<2x2xf32>
    %141 = tpu.matmul %139, %140, %cst_130 {dimension_numbers = #tpu.dot_dimension_numbers<[1], [0], [0], [1], [0, 0, 1, 1], [], []>} : vector<2x128xf32>, vector<128x2xf32>, vector<2x2xf32> -> vector<2x2xf32>
    %c0_131 = arith.constant 0 : index
    %c0_132 = arith.constant 0 : index
    %142 = vector.load %arg10[%c0_131, %c0_132] : memref<1x2xf32, #tpu.memory_space<vmem>>, vector<1x2xf32>
    %143 = vector.broadcast %142 : vector<1x2xf32> to vector<2x2xf32>
    %144 = arith.addf %141, %143 : vector<2x2xf32>
    %cst_133 = arith.constant 0.000000e+00 : f32
    %145 = vector.broadcast %cst_133 : f32 to vector<2x2xf32>
    %146 = arith.maximumf %144, %145 : vector<2x2xf32>
    %cst_134 = arith.constant dense<0xFF800000> : vector<2xf32>
    %147 = vector.multi_reduction <maximumf>, %146, %cst_134 [1] : vector<2x2xf32> to vector<2xf32>
    %148 = vector.shape_cast %147 : vector<2xf32> to vector<2x1xf32>
    %149 = vector.broadcast %148 : vector<2x1xf32> to vector<2x2xf32>
    %150 = arith.subf %146, %149 : vector<2x2xf32>
    %151 = math.exp %150 : vector<2x2xf32>
    %cst_135 = arith.constant dense<0.000000e+00> : vector<2xf32>
    %152 = vector.multi_reduction <add>, %151, %cst_135 [1] : vector<2x2xf32> to vector<2xf32>
    %153 = vector.shape_cast %152 : vector<2xf32> to vector<2x1xf32>
    %154 = math.log %153 : vector<2x1xf32>
    %155 = arith.addf %148, %154 : vector<2x1xf32>
    %156 = vector.broadcast %155 : vector<2x1xf32> to vector<2x2xf32>
    %157 = arith.subf %146, %156 : vector<2x2xf32>
    %c0_136 = arith.constant 0 : index
    %c0_137 = arith.constant 0 : index
    %158 = vector.load %arg11[%c0_136, %c0_137] : memref<2x2xf32, #tpu.memory_space<vmem>>, vector<2x2xf32>
    tpu.vector_store %arg11[%c0_136, %c0_137], %157 {strides = array<i32>} : memref<2x2xf32, #tpu.memory_space<vmem>>, vector<2x2xf32>,
    return
  }
}

</mosaic_0001>

<bundles_post_ra>
// kernel: binary_classifier_forward.1
= control target key start
LH: loop header
LB: loop body
LE: loop exit
PB: predicated region body
PF: predicated region fallthrough
CT: control target
= control target key end

     0   :  { %16 = vsyncpa [#allocation5], 0  ;;  %s6761_s0 = inlined_call_operand.vmem [shape: f32[8,768], index: 0, kind: input, shape index: {}]   ;;  %s6762_s1 = inlined_call_operand.hbm [shape: f32[8,72], index: 1, kind: input, shape index: {}]   ;;  %s6763_s2 = inlined_call_operand.hbm [shape: f32[8,72], index: 2, kind: input, shape index: {}]   ;;  %s6764_s3 = inlined_call_operand.hbm [shape: f32[8,256,256], index: 3, kind: input, shape index: {}]   ;;  %s6765_s4 = inlined_call_operand.hbm [shape: f32[1,256], index: 4, kind: input, shape index: {}]   ;;  %s6766_s5 = inlined_call_operand.hbm [shape: f32[256,128], index: 5, kind: input, shape index: {}]   ;;  %s6767_s6 = inlined_call_operand.hbm [shape: f32[1,128], index: 6, kind: input, shape index: {}]   ;;  %s6768_s7 = inlined_call_operand.hbm [shape: f32[128,128], index: 7, kind: input, shape index: {}]   ;;  %s6769_s8 = inlined_call_operand.hbm [shape: f32[1,128], index: 8, kind: input, shape index: {}]   ;;  %s6770_s9 = inlined_call_operand.vmem [shape: f32[128,2], index: 9, kind: input, shape index: {}]   ;;  %s6771_s10 = inlined_call_operand.hbm [shape: f32[1,2], index: 10, kind: input, shape index: {}]   ;;  %s6772_s11 = inlined_call_operand.hbm [shape: f32[2,2], index: 11, kind: output, shape index: {}]  }
   0x1   :  { %17 = vsyncpa [#allocation8], 0 }
   0x2   :  { %18 = vsyncpa [#allocation11], 0 }
   0x3   :  { %19 = vsyncpa [#allocation14], 0 }
   0x4   :  { %20 = vsyncpa [#allocation17], 0 }
   0x5   :  { %21 = vsyncpa [#allocation6], 0  ;;  %s5651_s17 = smov [#allocation7]   ;;  %s5652_s19 = smov [#allocation10]  }
   0x6   :  { %s40_s18 = sshll.u32 %s5651_s17, 4  ;;  %s62_s20 = sshll.u32 %s5652_s19, 4  ;;  %s41_s18 = int_to_ptr.vmem [resolvable:$true] %s40_s18  ;;  %s63_s20 = int_to_ptr.vmem [resolvable:$true] %s62_s20 }
   0x7   :  { %s5419_s23 = scalar_lea.hbm %s6763_s2, 128 }
   0x8   :  { %p5420_p0 = scmp.ne.s32.totalorder %s6763_s2, %s5419_s23  ;;  %p5423_p1 = scmp.lt.u32.totalorder %s5419_s23, %s6763_s2 }
   0xa   :  { %p5425_p2 = pnand %p5423_p1, %p5420_p0 }
   0xc   :  { %5428 = shalt.err (!%p5425_p2)
}
   0xd   :  { %s5429_s28 = scalar_lea.vmem %s41_s18, 128  ;;  %p5434_p4 = scmp.lt.s32.totalorder %s41_s18, %s41_s18 }
   0xe   :  { %p5430_p3 = scmp.ne.s32.totalorder %s41_s18, %s5429_s28  ;;  %p5435_p5 = scmp.lt.s32.totalorder %s5429_s28, %s5429_s28 }
  0x10   :  { %p5436_p6 = por %p5435_p5, %p5434_p4 }
  0x12   :  { %p5437_p7 = pnand %p5436_p6, %p5430_p3 }
  0x14   :  { %5440 = shalt.err (!%p5437_p7)
}
  0x15   :  { %43 = dma.hbm_to_vmem [thread:$0]  %s6763_s2, 128, %s41_s18, [#allocation8]  }
  0x16   :  { %s5441_s14 = scalar_lea.hbm %s6765_s4, 32 }
  0x17   :  { %p5442_p8 = scmp.ne.s32.totalorder %s6765_s4, %s5441_s14  ;;  %p5445_p9 = scmp.lt.u32.totalorder %s5441_s14, %s6765_s4 }
  0x19   :  { %p5447_p10 = pnand %p5445_p9, %p5442_p8 }
  0x1b   :  { %5450 = shalt.err (!%p5447_p10)
}
  0x1c   :  { %s5451_s21 = scalar_lea.vmem %s63_s20, 32  ;;  %p5456_p12 = scmp.lt.s32.totalorder %s63_s20, %s63_s20 }
  0x1d   :  { %p5452_p11 = scmp.ne.s32.totalorder %s63_s20, %s5451_s21  ;;  %p5457_p13 = scmp.lt.s32.totalorder %s5451_s21, %s5451_s21 }
  0x1f   :  { %p5458_p0 = por %p5457_p13, %p5456_p12 }
  0x21   :  { %p5459_p1 = pnand %p5458_p0, %p5452_p11 }
  0x23   :  { %5462 = shalt.err (!%p5459_p1)
}
  0x24   :  { %65 = dma.hbm_to_vmem [thread:$0]  %s6765_s4, 32, %s63_s20, [#allocation11]  }
  0x25   :  { %s5653_s22 = smov [#allocation13]   ;;  %s5654_s24 = smov [#allocation16]  }
  0x26   :  { %s84_s23 = sshll.u32 %s5653_s22, 4  ;;  %s106_s25 = sshll.u32 %s5654_s24, 4  ;;  %s85_s23 = int_to_ptr.vmem [resolvable:$true] %s84_s23  ;;  %s107_s25 = int_to_ptr.vmem [resolvable:$true] %s106_s25 }
  0x27   :  { %s5463_s28 = scalar_lea.hbm %s6767_s6, 16 }
  0x28   :  { %p5464_p2 = scmp.ne.s32.totalorder %s6767_s6, %s5463_s28  ;;  %p5467_p3 = scmp.lt.u32.totalorder %s5463_s28, %s6767_s6 }
  0x2a   :  { %p5469_p4 = pnand %p5467_p3, %p5464_p2 }
  0x2c   :  { %5472 = shalt.err (!%p5469_p4)
}
  0x2d   :  { %s5473_s4 = scalar_lea.vmem %s85_s23, 16  ;;  %s5477_s20 = scalar_lea.vmem %s85_s23, 32 }
  0x2e   :  { %p5474_p5 = scmp.ne.s32.totalorder %s85_s23, %s5473_s4  ;;  %p5478_p6 = scmp.lt.s32.totalorder %s85_s23, %s85_s23 }
  0x2f   :  { %p5479_p7 = scmp.lt.s32.totalorder %s5477_s20, %s5473_s4 }
  0x31   :  { %p5480_p8 = por %p5479_p7, %p5478_p6 }
  0x33   :  { %p5481_p9 = pnand %p5480_p8, %p5474_p5 }
  0x35   :  { %5484 = shalt.err (!%p5481_p9)
}
  0x36   :  { %87 = dma.hbm_to_vmem [thread:$0]  %s6767_s6, 16, %s85_s23, [#allocation14]  }
  0x37   :  { %s5485_s19 = scalar_lea.hbm %s6769_s8, 16 }
  0x38   :  { %p5486_p10 = scmp.ne.s32.totalorder %s6769_s8, %s5485_s19  ;;  %p5489_p11 = scmp.lt.u32.totalorder %s5485_s19, %s6769_s8 }
  0x3a   :  { %p5491_p12 = pnand %p5489_p11, %p5486_p10 }
  0x3c   :  { %5494 = shalt.err (!%p5491_p12)
}
  0x3d   :  { %s5495_s24 = scalar_lea.vmem %s107_s25, 16  ;;  %s5499_s26 = scalar_lea.vmem %s107_s25, 32 }
  0x3e   :  { %p5496_p13 = scmp.ne.s32.totalorder %s107_s25, %s5495_s24  ;;  %p5500_p0 = scmp.lt.s32.totalorder %s107_s25, %s107_s25 }
  0x3f   :  { %p5501_p1 = scmp.lt.s32.totalorder %s5499_s26, %s5495_s24 }
  0x41   :  { %p5502_p2 = por %p5501_p1, %p5500_p0 }
  0x43   :  { %p5503_p3 = pnand %p5502_p2, %p5496_p13 }
  0x45   :  { %5506 = shalt.err (!%p5503_p3)
}
  0x46   :  { %109 = dma.hbm_to_vmem [thread:$0]  %s6769_s8, 16, %s107_s25, [#allocation17]  }
  0x47   :  { %s5655_s27 = smov [#allocation4]   ;;  %s5656_s29 = smov [#allocation9]  }
  0x48   :  { %s30_s28 = sshll.u32 %s5655_s27, 4  ;;  %s49_s30 = sshll.u32 %s5656_s29, 4  ;;  %s31_s28 = int_to_ptr.vmem [resolvable:$true] %s30_s28  ;;  %s5790_s30 = int_to_ptr.vmem [resolvable:$true] %s49_s30 }
  0x49   :  { %s5507_s4 = scalar_lea.hbm %s6762_s1, 128 }
  0x4a   :  { %p5508_p4 = scmp.ne.s32.totalorder %s6762_s1, %s5507_s4  ;;  %p5511_p5 = scmp.lt.u32.totalorder %s5507_s4, %s6762_s1 }
  0x4c   :  { %p5513_p6 = pnand %p5511_p5, %p5508_p4 }
  0x4e   :  { %5516 = shalt.err (!%p5513_p6)
}
  0x4f   :  { %s5517_s8 = scalar_lea.vmem %s31_s28, 128  ;;  %p5522_p8 = scmp.lt.s32.totalorder %s31_s28, %s31_s28 }
  0x50   :  { %p5518_p7 = scmp.ne.s32.totalorder %s31_s28, %s5517_s8  ;;  %p5523_p9 = scmp.lt.s32.totalorder %s5517_s8, %s5517_s8 }
  0x52   :  { %p5524_p10 = por %p5523_p9, %p5522_p8 }
  0x54   :  { %p5525_p11 = pnand %p5524_p10, %p5518_p7 }
  0x56   :  { %5528 = shalt.err (!%p5525_p11)
}
  0x57   :  { %33 = dma.hbm_to_vmem [thread:$0]  %s6762_s1, 128, %s31_s28, [#allocation5]  }
  0x58   :  { %s5529_s2 = scalar_lea.hbm %s6764_s3, 65536 }
  0x59   :  { %p5530_p12 = scmp.ne.s32.totalorder %s6764_s3, %s5529_s2  ;;  %p5533_p13 = scmp.lt.u32.totalorder %s5529_s2, %s6764_s3 }
  0x5b   :  { %p5535_p0 = pnand %p5533_p13, %p5530_p12 }
  0x5d   :  { %5538 = shalt.err (!%p5535_p0)
}
  0x5e   :  { %s5539_s6 = scalar_lea.vmem %s5790_s30, 65536  ;;  %p5544_p2 = scmp.lt.s32.totalorder %s5790_s30, %s5790_s30 }
  0x5f   :  { %p5540_p1 = scmp.ne.s32.totalorder %s5790_s30, %s5539_s6  ;;  %p5545_p3 = scmp.lt.s32.totalorder %s5539_s6, %s5539_s6 }
  0x61   :  { %p5546_p4 = por %p5545_p3, %p5544_p2 }
  0x63   :  { %p5547_p5 = pnand %p5546_p4, %p5540_p1 }
  0x65   :  { %5550 = shalt.err (!%p5547_p5)
}
  0x66   :  { %s5657_s1 = smov 256   ;;  %s5658_s23 = smov 16  }
  0x67   :  { %55 = dma.hbm_to_vmem [thread:$0]  %s6764_s3, 65536, %s5790_s30, [#allocation8], %s5657_s1, %s5657_s1, %s5658_s23  }
  0x68   :  { %s5659_s29 = smov [#allocation12]   ;;  %s5551_s20 = scalar_lea.hbm %s6766_s5, 4096 }
  0x69   :  { %s71_s12 = sshll.u32 %s5659_s29, 4  ;;  %p5552_p6 = scmp.ne.s32.totalorder %s6766_s5, %s5551_s20  ;;  %s72_s12 = int_to_ptr.vmem [resolvable:$true] %s71_s12 }
  0x6a   :  { %p5555_p7 = scmp.lt.u32.totalorder %s5551_s20, %s6766_s5 }
  0x6c   :  { %p5557_p8 = pnand %p5555_p7, %p5552_p6 }
  0x6e   :  { %5560 = shalt.err (!%p5557_p8)
}
  0x6f   :  { %s5561_s25 = scalar_lea.vmem %s72_s12, 4096  ;;  %p5566_p10 = scmp.lt.s32.totalorder %s72_s12, %s72_s12 }
  0x70   :  { %p5562_p9 = scmp.ne.s32.totalorder %s72_s12, %s5561_s25  ;;  %p5567_p11 = scmp.lt.s32.totalorder %s5561_s25, %s5561_s25 }
  0x72   :  { %p5568_p12 = por %p5567_p11, %p5566_p10 }
  0x74   :  { %p5569_p13 = pnand %p5568_p12, %p5562_p9 }
  0x76   :  { %5572 = shalt.err (!%p5569_p13)
}
  0x77   :  { %s5660_s3 = smov 128   ;;  %s5661_s30 = smov 8  }
  0x78   :  { %77 = dma.hbm_to_vmem [thread:$0]  %s6766_s5, 4096, %s72_s12, [#allocation11], %s5660_s3, %s5660_s3, %s5661_s30  }
  0x79   :  { %s5662_s21 = smov [#allocation15]   ;;  %s5663_s18 = smov [#allocation18]  }
  0x7a   :  { %s93_s2 = sshll.u32 %s5662_s21, 4  ;;  %s118_s22 = sshll.u32 %s5663_s18, 4  ;;  %s94_s2 = int_to_ptr.vmem [resolvable:$true] %s93_s2  ;;  %s119_s22 = int_to_ptr.vmem [resolvable:$true] %s118_s22 }
  0x7b   :  { %s5573_s6 = scalar_lea.hbm %s6768_s7, 2048 }
  0x7c   :  { %p5574_p0 = scmp.ne.s32.totalorder %s6768_s7, %s5573_s6  ;;  %p5577_p1 = scmp.lt.u32.totalorder %s5573_s6, %s6768_s7 }
  0x7e   :  { %p5579_p2 = pnand %p5577_p1, %p5574_p0 }
  0x80   :  { %5582 = shalt.err (!%p5579_p2)
}
  0x81   :  { %s5583_s5 = scalar_lea.vmem %s94_s2, 2048  ;;  %p5588_p4 = scmp.lt.s32.totalorder %s94_s2, %s94_s2 }
  0x82   :  { %p5584_p3 = scmp.ne.s32.totalorder %s94_s2, %s5583_s5  ;;  %p5589_p5 = scmp.lt.s32.totalorder %s5583_s5, %s5583_s5 }
  0x84   :  { %p5590_p6 = por %p5589_p5, %p5588_p4 }
  0x86   :  { %p5591_p7 = pnand %p5590_p6, %p5584_p3 }
  0x88   :  { %5594 = shalt.err (!%p5591_p7)
}
  0x89   :  { %99 = dma.hbm_to_vmem [thread:$0]  %s6768_s7, 2048, %s94_s2, [#allocation14], %s5660_s3, %s5660_s3, %s5661_s30  }
  0x8a   :  { %s5595_s20 = scalar_lea.hbm %s6771_s10, 16 }
  0x8b   :  { %p5596_p8 = scmp.ne.s32.totalorder %s6771_s10, %s5595_s20  ;;  %p5599_p9 = scmp.lt.u32.totalorder %s5595_s20, %s6771_s10 }
  0x8d   :  { %p5601_p10 = pnand %p5599_p9, %p5596_p8 }
  0x8f   :  { %5604 = shalt.err (!%p5601_p10)
}
  0x90   :  { %s5605_s25 = scalar_lea.vmem %s119_s22, 16  ;;  %s5609_s17 = scalar_lea.vmem %s119_s22, 32 }
  0x91   :  { %p5606_p11 = scmp.ne.s32.totalorder %s119_s22, %s5605_s25  ;;  %p5610_p12 = scmp.lt.s32.totalorder %s119_s22, %s119_s22 }
  0x92   :  { %p5611_p13 = scmp.lt.s32.totalorder %s5609_s17, %s5605_s25 }
  0x94   :  { %p5612_p0 = por %p5611_p13, %p5610_p12 }
  0x96   :  { %p5613_p1 = pnand %p5612_p0, %p5606_p11 }
  0x98   :  { %5616 = shalt.err (!%p5613_p1)
}
  0x99   :  { %121 = dma.hbm_to_vmem [thread:$0]  %s6771_s10, 16, %s119_s22, [#allocation17]  }
  0x9a   :  { %5639 = dma.done.wait [#allocation5], 128  }
  0x9b   :  { %5640 = vsyncadd [#allocation5], 4294967168 }
  0x9c   :  { %5641 = dma.done.wait [#allocation8], 65664  }
  0x9d   :  { %5642 = vsyncadd [#allocation8], 4294901632 }
  0x9e   :  { %5643 = dma.done.wait [#allocation11], 4128  }
  0x9f   :  { %5644 = vsyncadd [#allocation11], 4294963168 }
  0xa0   :  { %5645 = dma.done.wait [#allocation14], 2064  }
  0xa1   :  { %5646 = vsyncadd [#allocation14], 4294965232 }
  0xa2   :  { %5647 = dma.done.wait [#allocation17], 32  }
  0xa3   :  { %5648 = vsyncadd [#allocation17], 4294967264  ;;  %v5860_v0 = vld [vmem:[%s6761_s0 + $0x8] sm:$0xff]  ;;  %v5865_v1 = vld [vmem:[%s6761_s0 + $0x10] sm:$0xff]  ;;  %s5664_s26 = smov 126   ;;  %s5665_s6 = smov 127   ;;  %v167_v10 = vlaneseq }
  0xa4   :  { %v5870_v2 = vld [vmem:[%s6761_s0] sm:$0xff]  ;;  %v5265_v3 = vpack.i.bf16 %v5865_v1, %v5860_v0  ;;  %v5877_v4 = vld [vmem:[%s6761_s0 + $0x18] sm:$0xff]  ;;  %s5666_s1 = smov 110   ;;  %s5667_s23 = smov 108   ;;  %v5671_v6 = vmov 0.0   ;;  %v5927_v9 = vld [vmem:[%s6761_s0 + $0x28] sm:$0xff] }
  0xa5   :  { %v5260_v5 = vpack.i.bf16 %v5877_v4, %v5870_v2  ;;  %s5668_s27 = smov 109   ;;  %s5669_s28 = smov 91   ;;  %378 = vmatprep.mubr.f32.mxu1 %v5671_v6  ;;  %520 = vmatprep.mubr.f32.mxu0 %v5671_v6  ;;  %v5906_v7 = vld [vmem:[%s6761_s0 + $0x20] sm:$0xff]  ;;  %v5950_v11 = vand.u32 127, %v167_v10  ;;  %vm310_vm8 = vcmask 588800   ;;  %vm2277_vm14 = vcmp.lt.s32.totalorder %v167_v10, 256 }
  0xa6   :  { %5266 = vrot.lane.b32.xlu1 %v5265_v3, %s5664_s26  ;;  %5256 = vrot.lane.b32.xlu0 %v5265_v3, %s5665_s6  ;;  %s5670_s5 = smov 92   ;;  %s5672_s13 = smov 90   ;;  %v5300_v8 = vpack.i.bf16 %v5906_v7, %v5877_v4  ;;  %vm5680_vm15 = vmmov 0  }
  0xa7   :  { %vm169_vm0 = vcmp.lt.s32.totalorder %v5950_v11, 127  ;;  %vm188_vm1 = vcmp.lt.s32.totalorder %v5950_v11, 126  ;;  %vm207_vm2 = vcmp.lt.s32.totalorder %v5950_v11, 110  ;;  %vm245_vm3 = vcmp.lt.s32.totalorder %v5950_v11, 108  ;;  %s5673_s0 = smov 88   ;;  %s5674_s14 = smov 56  }
  0xa8   :  { %vm226_vm4 = vcmp.lt.s32.totalorder %v5950_v11, 109  ;;  %vm283_vm5 = vcmp.lt.s32.totalorder %v5950_v11, 91  ;;  %vm264_vm6 = vcmp.lt.s32.totalorder %v5950_v11, 92  ;;  %vm302_vm7 = vcmp.lt.s32.totalorder %v5950_v11, 90  ;;  %s5675_s15 = smov 54   ;;  %s5676_s16 = smov 52  }
  0xa9   :  { %s5677_s8 = smov 124   ;;  %vm635_vm9 = vcmp.lt.s32.totalorder %v5950_v11, 124  ;;  %vm690_vm10 = vcmp.lt.s32.totalorder %v5950_v11, 88  ;;  %vm728_vm11 = vcmp.lt.s32.totalorder %v5950_v11, 54  ;;  %vm709_vm12 = vcmp.lt.s32.totalorder %v5950_v11, 56 }
  0xaa   :  { %5271 = vrot.lane.b32.xlu1 %v5265_v3, %s5666_s1  ;;  %5261 = vrot.lane.b32.xlu0 %v5260_v5, %s5665_s6  ;;  %vm747_vm13 = vcmp.lt.s32.totalorder %v5950_v11, 52  ;;  %v1071_v11 = vld [vmem:[#allocation9 + $0x78] sm:$0xff] }
  0xae   :  { %195 = vrot.lane.b32.xlu1 %v5870_v2, %s5666_s1  ;;  %176 = vrot.lane.b32.xlu0 %v5870_v2, %s5664_s26 }
  0xb2   :  { %5281 = vrot.lane.b32.xlu1 %v5265_v3, %s5667_s23  ;;  %5276 = vrot.lane.b32.xlu0 %v5265_v3, %s5668_s27 }
  0xb6   :  { %233 = vrot.lane.b32.xlu1 %v5870_v2, %s5667_s23  ;;  %214 = vrot.lane.b32.xlu0 %v5870_v2, %s5668_s27 }
  0xba   :  { %5291 = vrot.lane.b32.xlu1 %v5265_v3, %s5669_s28  ;;  %5286 = vrot.lane.b32.xlu0 %v5265_v3, %s5670_s5 }
  0xbe   :  { %271 = vrot.lane.b32.xlu1 %v5870_v2, %s5669_s28  ;;  %252 = vrot.lane.b32.xlu0 %v5870_v2, %s5670_s5 }
  0xc2   :  { %292 = vrot.lane.b32.xlu1 %v5860_v0, %s5672_s13  ;;  %163 = vrot.lane.b32.xlu0 %v5906_v7, %s5665_s6 }
  0xc6   :  { %290 = vrot.lane.b32.xlu1 %v5870_v2, %s5672_s13  ;;  %294 = vrot.lane.b32.xlu0 %v5865_v1, %s5672_s13 }
  0xca   :  { %5301 = vrot.lane.b32.xlu1 %v5300_v8, %s5666_s1  ;;  %5296 = vrot.lane.b32.xlu0 %v5300_v8, %s5664_s26 }
  0xce   :  { %5311 = vrot.lane.b32.xlu1 %v5300_v8, %s5667_s23  ;;  %5306 = vrot.lane.b32.xlu0 %v5300_v8, %s5668_s27 }
  0xd2   :  { %5321 = vrot.lane.b32.xlu1 %v5300_v8, %s5669_s28  ;;  %5316 = vrot.lane.b32.xlu0 %v5300_v8, %s5670_s5 }
  0xd6   :  { %296 = vrot.lane.b32.xlu1 %v5877_v4, %s5672_s13  ;;  %165 = vrot.lane.b32.xlu0 %v5927_v9, %s5665_s6 }
  0xda   :  { %186 = vrot.lane.b32.xlu1 %v5927_v9, %s5664_s26  ;;  %298 = vrot.lane.b32.xlu0 %v5906_v7, %s5672_s13 }
  0xde   :  { %224 = vrot.lane.b32.xlu1 %v5927_v9, %s5668_s27  ;;  %205 = vrot.lane.b32.xlu0 %v5927_v9, %s5666_s1 }
  0xe2   :  { %262 = vrot.lane.b32.xlu1 %v5927_v9, %s5670_s5  ;;  %243 = vrot.lane.b32.xlu0 %v5927_v9, %s5667_s23 }
  0xe6   :  { %300 = vrot.lane.b32.xlu1 %v5927_v9, %s5672_s13  ;;  %281 = vrot.lane.b32.xlu0 %v5927_v9, %s5669_s28 }
 0x118   :  { %v5952_v12 = vpop.permute.xlu1 %5266  ;;  %v5954_v13 = vpop.permute.xlu0 %5256 }
 0x119   :  { %v5269_v14 = vunpack.i.h.bf16 %v5952_v12  ;;  %v5268_v15 = vunpack.i.l.bf16 %v5952_v12  ;;  %v5259_v16 = vunpack.i.h.bf16 %v5954_v13  ;;  %v5258_v17 = vunpack.i.l.bf16 %v5954_v13 }
 0x11b   :  { %v173_v18 = vsel %vm169_vm0, %v5258_v17, %v5259_v16  ;;  %v192_v25 = vsel %vm188_vm1, %v5268_v15, %v5269_v14 }
 0x11c   :  { %v5966_v19 = vpop.permute.xlu1 %5271  ;;  %v5968_v20 = vpop.permute.xlu0 %5261  ;;  %v3996_v21 = vpack.c.bf16 %v173_v18, %v5860_v0 }
 0x11d   :  { %v5274_v22 = vunpack.i.h.bf16 %v5966_v19  ;;  %v5273_v23 = vunpack.i.l.bf16 %v5966_v19  ;;  %v5263_v24 = vunpack.i.l.bf16 %v5968_v20  ;;  %v5264_v63 = vunpack.i.h.bf16 %v5968_v20 }
 0x11e   :  { %3997 = vmatprep.subr.bf16.mxu1 %v3996_v21  ;;  %v6072_v21 = vld [vmem:[#allocation4] sm:$0xff] }
 0x11f   :  { %v174_v26 = vsel %vm169_vm0, %v5263_v24, %v5258_v17  ;;  %v211_v27 = vsel %vm207_vm2, %v5273_v23, %v5274_v22  ;;  %v172_v5 = vsel %vm169_vm0, %v5259_v16, %v5264_v63 }
 0x120   :  { %v5987_v28 = vpop.permute.xlu1 %195  ;;  %v5989_v29 = vpop.permute.xlu0 %176  ;;  %v3998_v30 = vpack.c.bf16 %v174_v26, %v5870_v2  ;;  %v4000_v31 = vpack.c.bf16 %v211_v27, %v192_v25  ;;  %v4014_v16 = vpack.c.bf16 %v172_v5, %v5865_v1 }
 0x121   :  { %v212_v32 = vsel %vm207_vm2, %v5987_v28, %v5273_v23  ;;  %v193_v33 = vsel %vm188_vm1, %v5989_v29, %v5268_v15 }
 0x122   :  { %3999 = vmatpush1.bf16.msra.mxu1 %v3998_v30  ;;  %v4002_v34 = vpack.c.bf16 %v212_v32, %v193_v33 }
 0x123   :  { %4001 = vmatprep.subr.bf16.mxu1 %v4000_v31 }
 0x124   :  { %v5998_v35 = vpop.permute.xlu1 %5281  ;;  %v6000_v36 = vpop.permute.xlu0 %5276 }
 0x125   :  { %v5284_v37 = vunpack.i.h.bf16 %v5998_v35  ;;  %v5283_v38 = vunpack.i.l.bf16 %v5998_v35  ;;  %v5279_v39 = vunpack.i.h.bf16 %v6000_v36  ;;  %v5278_v40 = vunpack.i.l.bf16 %v6000_v36 }
 0x126   :  { %4003 = vmatpush1.bf16.msra.mxu1 %v4002_v34 }
 0x127   :  { %v230_v41 = vsel %vm226_vm4, %v5278_v40, %v5279_v39  ;;  %v249_v42 = vsel %vm245_vm3, %v5283_v38, %v5284_v37 }
 0x128   :  { %v6016_v43 = vpop.permute.xlu1 %233  ;;  %v6018_v44 = vpop.permute.xlu0 %214  ;;  %v4004_v45 = vpack.c.bf16 %v249_v42, %v230_v41 }
 0x129   :  { %v250_v46 = vsel %vm245_vm3, %v6016_v43, %v5283_v38  ;;  %v231_v47 = vsel %vm226_vm4, %v6018_v44, %v5278_v40 }
 0x12a   :  { %v4006_v48 = vpack.c.bf16 %v250_v46, %v231_v47  ;;  %4005 = vmatprep.subr.bf16.mxu1 %v4004_v45 }
 0x12c   :  { %v6026_v49 = vpop.permute.xlu1 %5291  ;;  %v6028_v50 = vpop.permute.xlu0 %5286  ;;  %4007 = vmatpush1.bf16.msra.mxu1 %v4006_v48 }
 0x12d   :  { %v5294_v51 = vunpack.i.h.bf16 %v6026_v49  ;;  %v5293_v52 = vunpack.i.l.bf16 %v6026_v49  ;;  %v5289_v53 = vunpack.i.h.bf16 %v6028_v50  ;;  %v5288_v54 = vunpack.i.l.bf16 %v6028_v50 }
 0x12f   :  { %v268_v55 = vsel %vm264_vm6, %v5288_v54, %v5289_v53  ;;  %v287_v56 = vsel %vm283_vm5, %v5293_v52, %v5294_v51 }
 0x130   :  { %v6044_v57 = vpop.permute.xlu1 %271  ;;  %v6046_v58 = vpop.permute.xlu0 %252  ;;  %v4008_v59 = vpack.c.bf16 %v287_v56, %v268_v55 }
 0x131   :  { %v288_v60 = vsel %vm283_vm5, %v6044_v57, %v5293_v52  ;;  %v269_v61 = vsel %vm264_vm6, %v6046_v58, %v5288_v54 }
 0x132   :  { %v4010_v62 = vpack.c.bf16 %v288_v60, %v269_v61  ;;  %4009 = vmatprep.subr.bf16.mxu1 %v4008_v59 }
 0x134   :  { %v293_v0 = vpop.permute.xlu1 %292  ;;  %v164_v2 = vpop.permute.xlu0 %163  ;;  %4011 = vmatpush1.bf16.msra.mxu1 %v4010_v62 }
 0x135   :  { %v171_v3 = vsel %vm169_vm0, %v5264_v63, %v164_v2 }
 0x136   :  { %v4012_v13 = vpack.c.bf16 %v171_v3, %v5877_v4 }
 0x138   :  { %v6062_v8 = vpop.permute.xlu1 %290  ;;  %v6064_v15 = vpop.permute.xlu0 %294 }
 0x139   :  { %v306_v17 = vsel %vm302_vm7, %v293_v0, %v6064_v15  ;;  %v307_v18 = vsel %vm302_vm7, %v6062_v8, %v293_v0 }
 0x13a   :  { %330 = vmatprep.subr.mxu1 %v306_v17 }
 0x13b   :  { %331 = vmatpush1.msra.mxu1 %v307_v18 }
 0x13c   :  { %v6076_v23 = vpop.permute.xlu1 %5301  ;;  %v6078_v25 = vpop.permute.xlu0 %5296  ;;  %3848 = vmatmul.mubr.msk.f32.vlgmr.msra.gmra.mrb[0].mxu1 %vm310_vm8, %v6072_v21  ;;  %4013 = vmatprep.subr.bf16.mxu1 %v4012_v13 }
 0x13d   :  { %v5304_v26 = vunpack.i.h.bf16 %v6076_v23  ;;  %v5303_v27 = vunpack.i.l.bf16 %v6076_v23  ;;  %v5299_v30 = vunpack.i.h.bf16 %v6078_v25  ;;  %v5298_v4 = vunpack.i.l.bf16 %v6078_v25  ;;  %4015 = vmatpush1.bf16.msra.mxu1 %v4014_v16  ;;  %449 = vmatprep.mubr.f32.mxu1 %v5671_v6 }
 0x13f   :  { %v210_v1 = vsel %vm207_vm2, %v5274_v22, %v5303_v27  ;;  %v191_v31 = vsel %vm188_vm1, %v5269_v14, %v5298_v4  ;;  %v190_v32 = vsel %vm188_vm1, %v5298_v4, %v5299_v30  ;;  %v209_v33 = vsel %vm207_vm2, %v5303_v27, %v5304_v26 }
 0x140   :  { %v4018_v34 = vpack.c.bf16 %v210_v1, %v191_v31  ;;  %v5312_v38 = vpop.permute.xlu1 %5311  ;;  %v5307_v40 = vpop.permute.xlu0 %5306  ;;  %v4016_v41 = vpack.c.bf16 %v209_v33, %v190_v32 }
 0x141   :  { %v5314_v42 = vunpack.i.h.bf16 %v5312_v38  ;;  %v5313_v19 = vunpack.i.l.bf16 %v5312_v38  ;;  %v5309_v45 = vunpack.i.h.bf16 %v5307_v40  ;;  %v5308_v46 = vunpack.i.l.bf16 %v5307_v40 }
 0x142   :  { %4017 = vmatprep.subr.bf16.mxu1 %v4016_v41 }
 0x143   :  { %v248_v12 = vsel %vm245_vm3, %v5284_v37, %v5313_v19  ;;  %v229_v14 = vsel %vm226_vm4, %v5279_v39, %v5308_v46  ;;  %4019 = vmatpush1.bf16.msra.mxu1 %v4018_v34  ;;  %v228_v22 = vsel %vm226_vm4, %v5308_v46, %v5309_v45  ;;  %v247_v47 = vsel %vm245_vm3, %v5313_v19, %v5314_v42 }
 0x144   :  { %v4022_v48 = vpack.c.bf16 %v248_v12, %v229_v14  ;;  %v5322_v52 = vpop.permute.xlu1 %5321  ;;  %v5317_v54 = vpop.permute.xlu0 %5316  ;;  %v4020_v55 = vpack.c.bf16 %v247_v47, %v228_v22 }
 0x145   :  { %v5324_v35 = vunpack.i.h.bf16 %v5322_v52  ;;  %v5323_v56 = vunpack.i.l.bf16 %v5322_v52  ;;  %v5319_v59 = vunpack.i.h.bf16 %v5317_v54  ;;  %v5318_v37 = vunpack.i.l.bf16 %v5317_v54 }
 0x146   :  { %4021 = vmatprep.subr.bf16.mxu1 %v4020_v55 }
 0x147   :  { %v286_v36 = vsel %vm283_vm5, %v5294_v51, %v5323_v56  ;;  %v267_v39 = vsel %vm264_vm6, %v5289_v53, %v5318_v37  ;;  %4023 = vmatpush1.bf16.msra.mxu1 %v4022_v48  ;;  %v266_v60 = vsel %vm264_vm6, %v5318_v37, %v5319_v59  ;;  %v285_v61 = vsel %vm283_vm5, %v5323_v56, %v5324_v35 }
 0x148   :  { %v4026_v62 = vpack.c.bf16 %v286_v36, %v267_v39  ;;  %v297_v63 = vpop.permute.xlu1 %296  ;;  %v166_v0 = vpop.permute.xlu0 %165  ;;  %v4024_v3 = vpack.c.bf16 %v285_v61, %v266_v60 }
 0x149   :  { %v170_v49 = vsel %vm169_vm0, %v164_v2, %v166_v0  ;;  %v175_v50 = vsel %vm169_vm0, %v166_v0, %v5263_v24  ;;  %v305_v20 = vsel %vm302_vm7, %v6064_v15, %v297_v63 }
 0x14a   :  { %4025 = vmatprep.subr.bf16.mxu1 %v4024_v3  ;;  %v4028_v51 = vpack.c.bf16 %v175_v50, %v5927_v9  ;;  %v4030_v53 = vpack.c.bf16 %v170_v49, %v5906_v7 }
 0x14b   :  { %4027 = vmatpush1.bf16.msra.mxu1 %v4026_v62 }
 0x14c   :  { %v187_v5 = vpop.permute.xlu1 %186  ;;  %v299_v17 = vpop.permute.xlu0 %298  ;;  %4029 = vmatprep.subr.bf16.mxu0 %v4028_v51 }
 0x14d   :  { %4031 = vmatpush1.bf16.msra.mxu0 %v4030_v53  ;;  %v304_v18 = vsel %vm302_vm7, %v297_v63, %v299_v17  ;;  %v189_v7 = vsel %vm188_vm1, %v5299_v30, %v187_v5  ;;  %v194_v9 = vsel %vm188_vm1, %v187_v5, %v5989_v29 }
 0x14e   :  { %401 = vmatprep.subr.mxu1 %v304_v18 }
 0x14f   :  { %402 = vmatpush1.msra.mxu1 %v305_v20 }
 0x150   :  { %v225_v24 = vpop.permute.xlu1 %224  ;;  %v206_v2 = vpop.permute.xlu0 %205  ;;  %3849 = vmatmul.mubr.msk.f32.vlgmr.msra.gmra.mrb[2].mxu1 %vm310_vm8, %v6072_v21 }
 0x151   :  { %v208_v13 = vsel %vm207_vm2, %v5304_v26, %v206_v2  ;;  %v213_v15 = vsel %vm207_vm2, %v206_v2, %v5987_v28  ;;  %822 = vmatprep.mubr.f32.mxu1 %v5671_v6  ;;  %v227_v30 = vsel %vm226_vm4, %v5309_v45, %v225_v24  ;;  %v232_v29 = vsel %vm226_vm4, %v225_v24, %v6018_v44 }
 0x152   :  { %v4032_v16 = vpack.c.bf16 %v213_v15, %v194_v9  ;;  %v4034_v23 = vpack.c.bf16 %v208_v13, %v189_v7 }
 0x154   :  { %v263_v25 = vpop.permute.xlu1 %262  ;;  %v244_v27 = vpop.permute.xlu0 %243  ;;  %4033 = vmatprep.subr.bf16.mxu0 %v4032_v16 }
 0x155   :  { %v246_v26 = vsel %vm245_vm3, %v5314_v42, %v244_v27  ;;  %v251_v28 = vsel %vm245_vm3, %v244_v27, %v6016_v43  ;;  %4035 = vmatpush1.bf16.msra.mxu0 %v4034_v23  ;;  %v265_v32 = vsel %vm264_vm6, %v5319_v59, %v263_v25  ;;  %v270_v33 = vsel %vm264_vm6, %v263_v25, %v6046_v58 }
 0x156   :  { %v4036_v4 = vpack.c.bf16 %v251_v28, %v232_v29  ;;  %v4038_v1 = vpack.c.bf16 %v246_v26, %v227_v30 }
 0x158   :  { %v282_v31 = vpop.permute.xlu0 %281  ;;  %4037 = vmatprep.subr.bf16.mxu0 %v4036_v4  ;;  %v301_v43 = vpop.permute.xlu1 %300 }
 0x159   :  { %v284_v44 = vsel %vm283_vm5, %v5324_v35, %v282_v31  ;;  %v289_v34 = vsel %vm283_vm5, %v282_v31, %v6044_v57  ;;  %4039 = vmatpush1.bf16.msra.mxu0 %v4038_v1  ;;  %v308_v41 = vsel %vm302_vm7, %v301_v43, %v6062_v8  ;;  %v303_v58 = vsel %vm302_vm7, %v299_v17, %v301_v43 }
 0x15a   :  { %v4040_v38 = vpack.c.bf16 %v289_v34, %v270_v33  ;;  %v4042_v40 = vpack.c.bf16 %v284_v44, %v265_v32 }
 0x15c   :  { %4041 = vmatprep.subr.bf16.mxu0 %v4040_v38 }
 0x15d   :  { %4043 = vmatpush1.bf16.msra.mxu0 %v4042_v40 }
 0x15e   :  { %472 = vmatprep.subr.mxu0 %v308_v41 }
 0x161   :  { %473 = vmatpush1.msra.mxu0 %v303_v58 }
 0x162   :  { %3850 = vmatmul.mubr.msk.f32.vlgmr.msra.gmra.mrb[0].mxu0 %vm310_vm8, %v6072_v21 }
 0x163   :  { %893 = vmatprep.mubr.f32.mxu0 %v5671_v6 }
 0x20f   :  { %v380_v57 = vpop.f32.mrb[0].mxu1 }
 0x210   :  { %v527_v42 = vmax.f32 %v380_v57, 0.0  ;;  %v382_v19 = vpop.f32.mrb[1].mxu1 }
 0x211   :  { %v6177_v45 = vmax.f32 %v382_v19, 0.0 }
 0x212   :  { %533 = vrot.lane.b32.xlu1 %v527_v42, %s5665_s6 }
 0x213   :  { %535 = vrot.lane.b32.xlu0 %v6177_v45, %s5665_s6 }
 0x216   :  { %557 = vrot.lane.b32.xlu1 %v527_v42, %s5666_s1 }
 0x217   :  { %559 = vrot.lane.b32.xlu0 %v6177_v45, %s5666_s1 }
 0x21b   :  { %583 = vrot.lane.b32.xlu0 %v6177_v45, %s5668_s27 }
 0x223   :  { %v451_v8 = vpop.f32.mrb[2].mxu1 }
 0x224   :  { %v6187_v21 = vmax.f32 %v451_v8, 0.0  ;;  %v453_v46 = vpop.f32.mrb[3].mxu1 }
 0x225   :  { %v6189_v12 = vmax.f32 %v453_v46, 0.0 }
 0x226   :  { %537 = vrot.lane.b32.xlu1 %v6187_v21, %s5665_s6 }
 0x227   :  { %539 = vrot.lane.b32.xlu0 %v6189_v12, %s5665_s6 }
 0x22a   :  { %561 = vrot.lane.b32.xlu1 %v6187_v21, %s5666_s1 }
 0x22b   :  { %563 = vrot.lane.b32.xlu0 %v6189_v12, %s5666_s1 }
 0x22e   :  { %585 = vrot.lane.b32.xlu1 %v6187_v21, %s5668_s27 }
 0x22f   :  { %587 = vrot.lane.b32.xlu0 %v6189_v12, %s5668_s27 }
 0x232   :  { %581 = vrot.lane.b32.xlu1 %v527_v42, %s5668_s27 }
 0x235   :  { %v522_v14 = vpop.f32.mrb[0].mxu0 }
 0x236   :  { %v531_v22 = vmax.f32 %v522_v14, 0.0  ;;  %v524_v47 = vpop.f32.mrb[1].mxu0 }
 0x237   :  { %v532_v48 = vmax.f32 %v524_v47, 0.0 }
 0x238   :  { %541 = vrot.lane.b32.xlu0 %v531_v22, %s5665_s6 }
 0x239   :  { %543 = vrot.lane.b32.xlu1 %v532_v48, %s5665_s6 }
 0x23c   :  { %565 = vrot.lane.b32.xlu0 %v531_v22, %s5666_s1 }
 0x23d   :  { %567 = vrot.lane.b32.xlu1 %v532_v48, %s5666_s1 }
 0x240   :  { %589 = vrot.lane.b32.xlu0 %v531_v22, %s5668_s27 }
 0x241   :  { %591 = vrot.lane.b32.xlu1 %v532_v48, %s5668_s27 }
 0x284   :  { %v534_v54 = vpop.permute.xlu1 %533 }
 0x285   :  { %v536_v52 = vpop.permute.xlu0 %535 }
 0x286   :  { %v549_v39 = vsel %vm169_vm0, %v534_v54, %v536_v52 }
 0x287   :  { %v551_v63 = vmax.f32 %v527_v42, %v549_v39 }
 0x288   :  { %v558_v35 = vpop.permute.xlu1 %557 }
 0x289   :  { %v560_v55 = vpop.permute.xlu0 %559 }
 0x28a   :  { %v573_v62 = vsel %vm207_vm2, %v558_v35, %v560_v55 }
 0x28b   :  { %v575_v0 = vmax.f32 %v551_v63, %v573_v62 }
 0x28d   :  { %v584_v56 = vpop.permute.xlu0 %583 }
 0x298   :  { %v538_v59 = vpop.permute.xlu1 %537 }
 0x299   :  { %v540_v37 = vpop.permute.xlu0 %539  ;;  %v548_v5 = vsel %vm169_vm0, %v536_v52, %v538_v59 }
 0x29a   :  { %v552_v24 = vmax.f32 %v6177_v45, %v548_v5  ;;  %v547_v13 = vsel %vm169_vm0, %v538_v59, %v540_v37 }
 0x29b   :  { %v553_v1 = vmax.f32 %v6187_v21, %v547_v13 }
 0x29c   :  { %v562_v36 = vpop.permute.xlu1 %561 }
 0x29d   :  { %v564_v60 = vpop.permute.xlu0 %563  ;;  %v572_v18 = vsel %vm207_vm2, %v560_v55, %v562_v36 }
 0x29e   :  { %v576_v25 = vmax.f32 %v552_v24, %v572_v18  ;;  %v571_v26 = vsel %vm207_vm2, %v562_v36, %v564_v60 }
 0x29f   :  { %v577_v41 = vmax.f32 %v553_v1, %v571_v26 }
 0x2a0   :  { %v586_v61 = vpop.permute.xlu1 %585 }
 0x2a1   :  { %v588_v50 = vpop.permute.xlu0 %587  ;;  %v596_v15 = vsel %vm226_vm4, %v584_v56, %v586_v61 }
 0x2a2   :  { %v6251_v31 = vmax.f32 %v576_v25, %v596_v15  ;;  %v595_v44 = vsel %vm226_vm4, %v586_v61, %v588_v50 }
 0x2a3   :  { %v6267_v8 = vmax.f32 %v577_v41, %v595_v44 }
 0x2a4   :  { %v582_v3 = vpop.permute.xlu1 %581 }
 0x2a5   :  { %v597_v49 = vsel %vm226_vm4, %v582_v3, %v584_v56 }
 0x2a6   :  { %v6216_v51 = vmax.f32 %v575_v0, %v597_v49 }
 0x2a8   :  { %678 = vrot.lane.b32.xlu1 %v6216_v51, %s5673_s0  ;;  %697 = vrot.lane.b32.xlu0 %v6216_v51, %s5674_s14 }
 0x2aa   :  { %v542_v53 = vpop.permute.xlu0 %541 }
 0x2ab   :  { %v544_v17 = vpop.permute.xlu1 %543  ;;  %v546_v20 = vsel %vm169_vm0, %v540_v37, %v542_v53 }
 0x2ac   :  { %716 = vrot.lane.b32.xlu1 %v6216_v51, %s5675_s15  ;;  %v545_v2 = vsel %vm169_vm0, %v542_v53, %v544_v17  ;;  %v550_v7 = vsel %vm169_vm0, %v544_v17, %v534_v54  ;;  %v554_v27 = vmax.f32 %v6189_v12, %v546_v20  ;;  %v5350_v12 = vpack.i.bf16 %v6267_v8, %v6251_v31 }
 0x2ad   :  { %v555_v28 = vmax.f32 %v531_v22, %v545_v2  ;;  %v556_v4 = vmax.f32 %v532_v48, %v550_v7  ;;  %vm3814_vm0 = vcmask 9216  }
 0x2ae   :  { %v566_v9 = vpop.permute.xlu0 %565 }
 0x2af   :  { %v570_v16 = vsel %vm207_vm2, %v564_v60, %v566_v9  ;;  %v568_v23 = vpop.permute.xlu1 %567 }
 0x2b0   :  { %v569_v30 = vsel %vm207_vm2, %v566_v9, %v568_v23  ;;  %v574_v29 = vsel %vm207_vm2, %v568_v23, %v558_v35  ;;  %735 = vrot.lane.b32.xlu1 %v6216_v51, %s5676_s16  ;;  %v578_v32 = vmax.f32 %v554_v27, %v570_v16 }
 0x2b1   :  { %v579_v34 = vmax.f32 %v555_v28, %v569_v30  ;;  %v580_v43 = vmax.f32 %v556_v4, %v574_v29 }
 0x2b2   :  { %v590_v33 = vpop.permute.xlu0 %589 }
 0x2b3   :  { %v594_v38 = vsel %vm226_vm4, %v588_v50, %v590_v33  ;;  %v592_v40 = vpop.permute.xlu1 %591 }
 0x2b4   :  { %v602_v58 = vmax.f32 %v578_v32, %v594_v38  ;;  %v593_v57 = vsel %vm226_vm4, %v590_v33, %v592_v40  ;;  %v598_v42 = vsel %vm226_vm4, %v592_v40, %v582_v3  ;;  %737 = vrot.lane.b32.xlu1 %v6251_v31, %s5676_s16 }
 0x2b5   :  { %v6263_v19 = vmax.f32 %v579_v34, %v593_v57  ;;  %v6265_v45 = vmax.f32 %v580_v43, %v598_v42 }
 0x2b6   :  { %v5340_v21 = vpack.i.bf16 %v602_v58, %v6216_v51 }
 0x2b7   :  { %v5325_v46 = vpack.i.bf16 %v6265_v45, %v6263_v19  ;;  %v5400_v14 = vpack.i.bf16 %v6263_v19, %v602_v58 }
 0x2b8   :  { %5341 = vrot.lane.b32.xlu1 %v5340_v21, %s5664_s26 }
 0x2b9   :  { %5326 = vrot.lane.b32.xlu0 %v5325_v46, %s5664_s26 }
 0x2bc   :  { %5351 = vrot.lane.b32.xlu1 %v5350_v12, %s5670_s5 }
 0x2bd   :  { %5331 = vrot.lane.b32.xlu0 %v5325_v46, %s5677_s8 }
 0x2c0   :  { %5361 = vrot.lane.b32.xlu1 %v5340_v21, %s5670_s5 }
 0x2c1   :  { %5336 = vrot.lane.b32.xlu0 %v5350_v12, %s5664_s26 }
 0x2c4   :  { %5371 = vrot.lane.b32.xlu1 %v5350_v12, %s5673_s0 }
 0x2c5   :  { %5346 = vrot.lane.b32.xlu0 %v5350_v12, %s5677_s8 }
 0x2c8   :  { %5386 = vrot.lane.b32.xlu1 %v5350_v12, %s5675_s15 }
 0x2c9   :  { %5356 = vrot.lane.b32.xlu0 %v5340_v21, %s5677_s8 }
 0x2cc   :  { %5391 = vrot.lane.b32.xlu1 %v5325_v46, %s5670_s5 }
 0x2cd   :  { %5366 = vrot.lane.b32.xlu0 %v5350_v12, %s5672_s13 }
 0x2d0   :  { %5401 = vrot.lane.b32.xlu1 %v5400_v14, %s5673_s0 }
 0x2d1   :  { %5376 = vrot.lane.b32.xlu0 %v5340_v21, %s5672_s13 }
 0x2d4   :  { %5406 = vrot.lane.b32.xlu1 %v5400_v14, %s5674_s14 }
 0x2d5   :  { %5381 = vrot.lane.b32.xlu0 %v5350_v12, %s5674_s14 }
 0x2d8   :  { %5411 = vrot.lane.b32.xlu1 %v5400_v14, %s5675_s15 }
 0x2d9   :  { %5396 = vrot.lane.b32.xlu0 %v5325_v46, %s5672_s13 }
 0x2dc   :  { %741 = vrot.lane.b32.xlu1 %v602_v58, %s5676_s16 }
 0x2dd   :  { %739 = vrot.lane.b32.xlu0 %v6267_v8, %s5676_s16 }
 0x2e0   :  { %745 = vrot.lane.b32.xlu1 %v6265_v45, %s5676_s16 }
 0x2e1   :  { %688 = vrot.lane.b32.xlu0 %v6265_v45, %s5673_s0 }
 0x2e5   :  { %707 = vrot.lane.b32.xlu0 %v6265_v45, %s5674_s14 }
 0x2e9   :  { %726 = vrot.lane.b32.xlu0 %v6265_v45, %s5675_s15 }
 0x2ed   :  { %743 = vrot.lane.b32.xlu0 %v6263_v19, %s5676_s16 }
 0x31a   :  { %v6303_v22 = vpop.permute.xlu1 %678  ;;  %v6311_v54 = vpop.permute.xlu0 %697 }
 0x31e   :  { %v6305_v47 = vpop.permute.xlu1 %716 }
 0x322   :  { %v6307_v48 = vpop.permute.xlu1 %735 }
 0x326   :  { %v6309_v52 = vpop.permute.xlu1 %737 }
 0x32a   :  { %v6313_v55 = vpop.permute.xlu1 %5341 }
 0x32b   :  { %v5344_v35 = vunpack.i.h.bf16 %v6313_v55  ;;  %v6316_v56 = vpop.permute.xlu0 %5326  ;;  %v5343_v63 = vunpack.i.l.bf16 %v6313_v55 }
 0x32c   :  { %v5328_v59 = vunpack.i.l.bf16 %v6316_v56 }
 0x32e   :  { %v5352_v37 = vpop.permute.xlu1 %5351  ;;  %v618_v36 = vsel %vm188_vm1, %v5344_v35, %v5328_v59 }
 0x32f   :  { %v6323_v39 = vpop.permute.xlu0 %5331  ;;  %v4060_v60 = vpack.c.bf16 %v618_v36, %v602_v58  ;;  %v5354_v49 = vunpack.i.h.bf16 %v5352_v37  ;;  %v5353_v50 = vunpack.i.l.bf16 %v5352_v37 }
 0x330   :  { %v5333_v33 = vunpack.i.l.bf16 %v6323_v39 }
 0x331   :  { %4061 = vmatprep.subr.bf16.mxu0 %v4060_v60  ;;  %v657_v25 = vsel %vm264_vm6, %v5353_v50, %v5354_v49 }
 0x332   :  { %v6325_v61 = vpop.permute.xlu1 %5361 }
 0x333   :  { %v5337_v62 = vpop.permute.xlu0 %5336  ;;  %v5363_v15 = vunpack.i.l.bf16 %v6325_v61  ;;  %v5364_v26 = vunpack.i.h.bf16 %v6325_v61 }
 0x334   :  { %v5339_v0 = vunpack.i.h.bf16 %v5337_v62  ;;  %v5338_v3 = vunpack.i.l.bf16 %v5337_v62 }
 0x335   :  { %v658_v28 = vsel %vm264_vm6, %v5363_v15, %v5353_v50  ;;  %v656_v42 = vsel %vm264_vm6, %v5354_v49, %v5364_v26 }
 0x336   :  { %v619_v53 = vsel %vm188_vm1, %v5339_v0, %v5344_v35  ;;  %v621_v5 = vsel %vm188_vm1, %v5343_v63, %v5338_v3  ;;  %v6334_v17 = vpop.permute.xlu1 %5371  ;;  %v620_v18 = vsel %vm188_vm1, %v5338_v3, %v5339_v0 }
 0x337   :  { %v4062_v20 = vpack.c.bf16 %v619_v53, %v6267_v8  ;;  %v4046_v24 = vpack.c.bf16 %v621_v5, %v6216_v51  ;;  %v5347_v2 = vpop.permute.xlu0 %5346  ;;  %v4044_v13 = vpack.c.bf16 %v620_v18, %v6251_v31  ;;  %v5374_v4 = vunpack.i.h.bf16 %v6334_v17 }
 0x338   :  { %v5349_v7 = vunpack.i.h.bf16 %v5347_v2  ;;  %v5348_v9 = vunpack.i.l.bf16 %v5347_v2  ;;  %v5373_v1 = vunpack.i.l.bf16 %v6334_v17  ;;  %v5329_v18 = vunpack.i.h.bf16 %v6316_v56 }
 0x339   :  { %4063 = vmatpush1.bf16.msra.mxu0 %v4062_v20  ;;  %4045 = vmatprep.subr.bf16.mxu1 %v4044_v13 }
 0x33a   :  { %v6343_v16 = vpop.permute.xlu1 %5386  ;;  %v639_v23 = vsel %vm635_vm9, %v5348_v9, %v5349_v7  ;;  %4047 = vmatpush1.bf16.msra.mxu1 %v4046_v24  ;;  %v694_v12 = vsel %vm690_vm10, %v5373_v1, %v5374_v4  ;;  %v695_v62 = vsel %vm690_vm10, %v6303_v22, %v5373_v1 }
 0x33b   :  { %v6349_v51 = vpop.permute.xlu0 %5356  ;;  %v4048_v27 = vpack.c.bf16 %v657_v25, %v639_v23  ;;  %v5388_v60 = vunpack.i.l.bf16 %v6343_v16  ;;  %v5389_v0 = vunpack.i.h.bf16 %v6343_v16 }
 0x33c   :  { %v5359_v30 = vunpack.i.h.bf16 %v6349_v51  ;;  %v5358_v29 = vunpack.i.l.bf16 %v6349_v51 }
 0x33d   :  { %4049 = vmatprep.subr.bf16.mxu1 %v4048_v27  ;;  %v733_v20 = vsel %vm728_vm11, %v6305_v47, %v5388_v60  ;;  %v732_v23 = vsel %vm728_vm11, %v5388_v60, %v5389_v0 }
 0x33e   :  { %v640_v31 = vsel %vm635_vm9, %v5358_v29, %v5348_v9  ;;  %v6364_v32 = vpop.permute.xlu1 %5391  ;;  %v638_v38 = vsel %vm635_vm9, %v5349_v7, %v5359_v30  ;;  %v637_v58 = vsel %vm635_vm9, %v5359_v30, %v5333_v33 }
 0x33f   :  { %v4050_v44 = vpack.c.bf16 %v658_v28, %v640_v31  ;;  %v5393_v34 = vunpack.i.l.bf16 %v6364_v32  ;;  %v5367_v43 = vpop.permute.xlu0 %5366  ;;  %v4066_v14 = vpack.c.bf16 %v656_v42, %v638_v38 }
 0x340   :  { %v5369_v40 = vunpack.i.h.bf16 %v5367_v43  ;;  %v5368_v41 = vunpack.i.l.bf16 %v5367_v43  ;;  %v5394_v43 = vunpack.i.h.bf16 %v6364_v32 }
 0x341   :  { %4051 = vmatpush1.bf16.msra.mxu1 %v4050_v44  ;;  %v655_v57 = vsel %vm264_vm6, %v5364_v26, %v5393_v34 }
 0x342   :  { %v6381_v8 = vpop.permute.xlu1 %5401  ;;  %v4064_v21 = vpack.c.bf16 %v655_v57, %v637_v58  ;;  %v675_v46 = vsel %vm302_vm7, %v5368_v41, %v5369_v40 }
 0x343   :  { %v6387_v35 = vpop.permute.xlu0 %5376  ;;  %v4052_v37 = vpack.c.bf16 %v694_v12, %v675_v46  ;;  %v5403_v24 = vunpack.i.l.bf16 %v6381_v8  ;;  %v5404_v7 = vunpack.i.h.bf16 %v6381_v8  ;;  %v617_v46 = vsel %vm188_vm1, %v5328_v59, %v5329_v18 }
 0x344   :  { %v5378_v36 = vunpack.i.l.bf16 %v6387_v35  ;;  %4065 = vmatprep.subr.bf16.mxu0 %v4064_v21  ;;  %v5379_v2 = vunpack.i.h.bf16 %v6387_v35  ;;  %v622_v21 = vsel %vm188_vm1, %v5329_v18, %v5343_v63  ;;  %v659_v59 = vsel %vm264_vm6, %v5394_v43, %v5363_v15 }
 0x345   :  { %4053 = vmatprep.subr.bf16.mxu1 %v4052_v37  ;;  %4067 = vmatpush1.bf16.msra.mxu0 %v4066_v14  ;;  %v693_v38 = vsel %vm690_vm10, %v5374_v4, %v5403_v24  ;;  %v692_v57 = vsel %vm690_vm10, %v5403_v24, %v5404_v7  ;;  %v752_v4 = vsel %vm747_vm13, %v6307_v48, %v6309_v52  ;;  %v754_v37 = vld [vmem:[#allocation7] sm:$0xff] }
 0x346   :  { %v676_v3 = vsel %vm302_vm7, %v5378_v36, %v5368_v41  ;;  %v6400_v49 = vpop.permute.xlu1 %5406  ;;  %v674_v41 = vsel %vm302_vm7, %v5369_v40, %v5379_v2  ;;  %v4078_v63 = vpack.c.bf16 %v617_v46, %v6263_v19 }
 0x347   :  { %v4054_v50 = vpack.c.bf16 %v695_v62, %v676_v3  ;;  %v5382_v53 = vpop.permute.xlu0 %5381  ;;  %v5409_v1 = vunpack.i.h.bf16 %v6400_v49  ;;  %v5408_v31 = vunpack.i.l.bf16 %v6400_v49  ;;  %v4070_v12 = vpack.c.bf16 %v693_v38, %v674_v41  ;;  %v1132_v38 = vld [vmem:[#allocation9 + $0x248] sm:$0xff]  ;;  %v1134_v41 = vld [vmem:[#allocation9 + $0x258] sm:$0xff] }
 0x348   :  { %v5384_v5 = vunpack.i.h.bf16 %v5382_v53  ;;  %v5383_v17 = vunpack.i.l.bf16 %v5382_v53  ;;  %v5334_v62 = vunpack.i.h.bf16 %v6323_v39 }
 0x349   :  { %4055 = vmatpush1.bf16.msra.mxu1 %v4054_v50  ;;  %v711_v60 = vsel %vm709_vm12, %v5408_v31, %v5409_v1 }
 0x34a   :  { %v714_v9 = vsel %vm709_vm12, %v6311_v54, %v5383_v17  ;;  %v6413_v13 = vpop.permute.xlu1 %5411  ;;  %v713_v16 = vsel %vm709_vm12, %v5383_v17, %v5384_v5  ;;  %v712_v3 = vsel %vm709_vm12, %v5384_v5, %v5408_v31  ;;  %v641_v61 = vsel %vm635_vm9, %v5334_v62, %v5358_v29 }
 0x34b   :  { %v4058_v25 = vpack.c.bf16 %v733_v20, %v714_v9  ;;  %v5414_v27 = vunpack.i.h.bf16 %v6413_v13  ;;  %v5413_v30 = vunpack.i.l.bf16 %v6413_v13  ;;  %v5397_v26 = vpop.permute.xlu0 %5396  ;;  %v4056_v28 = vpack.c.bf16 %v732_v23, %v713_v16  ;;  %v1124_v23 = vld [vmem:[#allocation9 + $0x208] sm:$0xff] }
 0x34c   :  { %v5398_v44 = vunpack.i.l.bf16 %v5397_v26  ;;  %v5399_v49 = vunpack.i.h.bf16 %v5397_v26  ;;  %v4080_v19 = vpack.c.bf16 %v659_v59, %v641_v61  ;;  %v636_v51 = vsel %vm635_vm9, %v5333_v33, %v5334_v62  ;;  %v1125_v26 = vld [vmem:[#allocation9 + $0x210] sm:$0xff] }
 0x34d   :  { %4057 = vmatprep.subr.bf16.mxu1 %v4056_v28  ;;  %v730_v42 = vsel %vm728_vm11, %v5413_v30, %v5414_v27  ;;  %v731_v55 = vsel %vm728_vm11, %v5389_v0, %v5413_v30  ;;  %v1128_v28 = vld [vmem:[#allocation9 + $0x228] sm:$0xff]  ;;  %v1141_v59 = vld [vmem:[#allocation9 + $0x290] sm:$0xff] }
 0x34e   :  { %4059 = vmatpush1.bf16.msra.mxu1 %v4058_v25  ;;  %v673_v58 = vsel %vm302_vm7, %v5379_v2, %v5398_v44  ;;  %v4072_v56 = vpack.c.bf16 %v730_v42, %v711_v60  ;;  %v4074_v15 = vpack.c.bf16 %v731_v55, %v712_v3  ;;  %v677_v32 = vsel %vm302_vm7, %v5399_v49, %v5378_v36  ;;  %v742_v53 = vpop.permute.xlu1 %741  ;;  %v1126_v25 = vld [vmem:[#allocation9 + $0x218] sm:$0xff]  ;;  %v1131_v42 = vld [vmem:[#allocation9 + $0x240] sm:$0xff]  ;;  %v1145_v61 = vld [vmem:[#allocation9 + $0x2b0] sm:$0xff] }
 0x34f   :  { %v740_v8 = vpop.permute.xlu0 %739  ;;  %v4068_v40 = vpack.c.bf16 %v692_v57, %v673_v58  ;;  %v672_v39 = vsel %vm302_vm7, %v5398_v44, %v5399_v49  ;;  %v4092_v30 = vpack.c.bf16 %v1126_v25, %v1124_v23  ;;  %v4100_v57 = vpack.c.bf16 %v1134_v41, %v1132_v38  ;;  %v1142_v60 = vld [vmem:[#allocation9 + $0x298] sm:$0xff]  ;;  %v1159_v23 = vld [vmem:[#allocation9 + $0x320] sm:$0xff]  ;;  %v1161_v25 = vld [vmem:[#allocation9 + $0x330] sm:$0xff] }
 0x350   :  { %v751_v14 = vsel %vm747_vm13, %v6309_v52, %v740_v8  ;;  %v4076_v52 = vpack.c.bf16 %v622_v21, %v6265_v45  ;;  %v654_v45 = vsel %vm264_vm6, %v5393_v34, %v5394_v43  ;;  %v1129_v43 = vld [vmem:[#allocation9 + $0x230] sm:$0xff]  ;;  %v1146_v3 = vld [vmem:[#allocation9 + $0x2b8] sm:$0xff]  ;;  %v1167_v41 = vld [vmem:[#allocation9 + $0x360] sm:$0xff] }
 0x351   :  { %774 = vmatprep.subr.mxu1 %v751_v14  ;;  %4069 = vmatprep.subr.bf16.mxu0 %v4068_v40  ;;  %v4082_v29 = vpack.c.bf16 %v654_v45, %v636_v51  ;;  %v1138_v40 = vld [vmem:[#allocation9 + $0x278] sm:$0xff]  ;;  %v1137_v14 = vld [vmem:[#allocation9 + $0x270] sm:$0xff] }
 0x352   :  { %775 = vmatpush1.msra.mxu1 %v752_v4  ;;  %4071 = vmatpush1.bf16.msra.mxu0 %v4070_v12  ;;  %v1133_v4 = vld [vmem:[#allocation9 + $0x250] sm:$0xff]  ;;  %v1135_v12 = vld [vmem:[#allocation9 + $0x260] sm:$0xff] }
 0x353   :  { %v689_v50 = vpop.permute.xlu0 %688  ;;  %3851 = vmatmul.mubr.msk.f32.vlgmr.msra.gmra.mrb[4].mxu1 %vm310_vm8, %v754_v37  ;;  %4073 = vmatprep.subr.bf16.mxu0 %v4072_v56  ;;  %v4102_v21 = vpack.c.bf16 %v1133_v4, %v1131_v42  ;;  %v4106_v62 = vpack.c.bf16 %v1137_v14, %v1135_v12  ;;  %v1139_v56 = vld [vmem:[#allocation9 + $0x280] sm:$0xff] }
 0x354   :  { %4077 = vmatprep.subr.bf16.mxu1 %v4076_v52  ;;  %964 = vmatprep.mubr.f32.mxu1 %v5671_v6  ;;  %v696_v0 = vsel %vm690_vm10, %v689_v50, %v6303_v22  ;;  %v691_v5 = vsel %vm690_vm10, %v5404_v7, %v689_v50  ;;  %v746_v7 = vpop.permute.xlu1 %745  ;;  %v4110_v52 = vpack.c.bf16 %v1141_v59, %v1139_v56  ;;  %v1143_v50 = vld [vmem:[#allocation9 + $0x2a0] sm:$0xff]  ;;  %v1176_v56 = vld [vmem:[#allocation9 + $0x3a8] sm:$0xff]  ;;  %v1178_v59 = vld [vmem:[#allocation9 + $0x3b8] sm:$0xff] }
 0x355   :  { %4079 = vmatpush1.bf16.msra.mxu1 %v4078_v63  ;;  %v4084_v22 = vpack.c.bf16 %v696_v0, %v677_v32  ;;  %v4086_v33 = vpack.c.bf16 %v691_v5, %v672_v39  ;;  %v753_v13 = vsel %vm747_vm13, %v746_v7, %v6307_v48  ;;  %v1127_v48 = vld [vmem:[#allocation9 + $0x220] sm:$0xff]  ;;  %v1144_v63 = vld [vmem:[#allocation9 + $0x2a8] sm:$0xff]  ;;  %v4114_v45 = vpack.c.bf16 %v1145_v61, %v1143_v50  ;;  %v1153_v39 = vld [vmem:[#allocation9 + $0x2f0] sm:$0xff] }
 0x356   :  { %4081 = vmatprep.subr.bf16.mxu1 %v4080_v19  ;;  %4075 = vmatpush1.bf16.msra.mxu0 %v4074_v15  ;;  %v4098_v58 = vpack.c.bf16 %v1129_v43, %v1127_v48  ;;  %v4112_v49 = vpack.c.bf16 %v1146_v3, %v1144_v63  ;;  %v1148_v15 = vld [vmem:[#allocation9 + $0x2c8] sm:$0xff]  ;;  %v1150_v19 = vld [vmem:[#allocation9 + $0x2d8] sm:$0xff]  ;;  %v1147_v0 = vld [vmem:[#allocation9 + $0x2c0] sm:$0xff] }
 0x357   :  { %v708_v34 = vpop.permute.xlu0 %707  ;;  %v4116_v51 = vpack.c.bf16 %v1150_v19, %v1148_v15  ;;  %v1152_v32 = vld [vmem:[#allocation9 + $0x2e8] sm:$0xff]  ;;  %v1170_v43 = vld [vmem:[#allocation9 + $0x378] sm:$0xff]  ;;  %v1175_v63 = vld [vmem:[#allocation9 + $0x3a0] sm:$0xff] }
 0x358   :  { %v710_v18 = vsel %vm709_vm12, %v5409_v1, %v708_v34  ;;  %v715_v35 = vsel %vm709_vm12, %v708_v34, %v6311_v54  ;;  %v750_v54 = vsel %vm747_vm13, %v740_v8, %v742_v53  ;;  %v1130_v1 = vld [vmem:[#allocation9 + $0x238] sm:$0xff]  ;;  %v1136_v8 = vld [vmem:[#allocation9 + $0x268] sm:$0xff]  ;;  %v1177_v3 = vld [vmem:[#allocation9 + $0x3b0] sm:$0xff] }
 0x359   :  { %4083 = vmatpush1.bf16.msra.mxu1 %v4082_v29  ;;  %v4096_v44 = vpack.c.bf16 %v1130_v1, %v1128_v28  ;;  %v4104_v46 = vpack.c.bf16 %v1138_v40, %v1136_v8  ;;  %v1149_v29 = vld [vmem:[#allocation9 + $0x2d0] sm:$0xff]  ;;  %v1154_v34 = vld [vmem:[#allocation9 + $0x2f8] sm:$0xff]  ;;  %v1163_v1 = vld [vmem:[#allocation9 + $0x340] sm:$0xff] }
 0x35a   :  { %4085 = vmatprep.subr.bf16.mxu1 %v4084_v22  ;;  %v4120_v5 = vpack.c.bf16 %v1154_v34, %v1152_v32  ;;  %v1151_v22 = vld [vmem:[#allocation9 + $0x2e0] sm:$0xff]  ;;  %v1168_v48 = vld [vmem:[#allocation9 + $0x368] sm:$0xff]  ;;  %v1182_v61 = vld [vmem:[#allocation9 + $0x3d8] sm:$0xff] }
 0x35b   :  { %v727_v17 = vpop.permute.xlu0 %726  ;;  %v4136_v38 = vpack.c.bf16 %v1170_v43, %v1168_v48  ;;  %v1180_v50 = vld [vmem:[#allocation9 + $0x3c8] sm:$0xff]  ;;  %v1179_v15 = vld [vmem:[#allocation9 + $0x3c0] sm:$0xff]  ;;  %v1181_v19 = vld [vmem:[#allocation9 + $0x3d0] sm:$0xff] }
 0x35c   :  { %v729_v36 = vsel %vm728_vm11, %v5414_v27, %v727_v17  ;;  %v734_v20 = vsel %vm728_vm11, %v727_v17, %v6305_v47  ;;  %v1123_v27 = vld [vmem:[#allocation9 + $0x200] sm:$0xff]  ;;  %v1158_v17 = vld [vmem:[#allocation9 + $0x318] sm:$0xff] }
 0x35d   :  { %v4088_v24 = vpack.c.bf16 %v734_v20, %v715_v35  ;;  %v4090_v2 = vpack.c.bf16 %v729_v36, %v710_v18  ;;  %4087 = vmatpush1.bf16.msra.mxu1 %v4086_v33  ;;  %v4094_v31 = vpack.c.bf16 %v1125_v26, %v1123_v27  ;;  %v1156_v33 = vld [vmem:[#allocation9 + $0x308] sm:$0xff]  ;;  %v4122_v18 = vpack.c.bf16 %v1153_v39, %v1151_v22  ;;  %v1155_v36 = vld [vmem:[#allocation9 + $0x300] sm:$0xff]  ;;  %v1157_v20 = vld [vmem:[#allocation9 + $0x310] sm:$0xff] }
 0x35e   :  { %v4124_v35 = vpack.c.bf16 %v1158_v17, %v1156_v33  ;;  %v4130_v27 = vpack.c.bf16 %v1161_v25, %v1159_v23  ;;  %v1166_v26 = vld [vmem:[#allocation9 + $0x358] sm:$0xff]  ;;  %v1183_v34 = vld [vmem:[#allocation9 + $0x3e0] sm:$0xff]  ;;  %v1057_v22 = vld [vmem:[#allocation9 + $0x8] sm:$0xff] }
 0x35f   :  { %v744_v9 = vpop.permute.xlu0 %743  ;;  %4089 = vmatprep.subr.bf16.mxu1 %v4088_v24  ;;  %v1059_v39 = vld [vmem:[#allocation9 + $0x18] sm:$0xff] }
 0x360   :  { %v749_v16 = vsel %vm747_vm13, %v742_v53, %v744_v9  ;;  %v748_v47 = vsel %vm747_vm13, %v744_v9, %v746_v7  ;;  %v4118_v53 = vpack.c.bf16 %v1149_v29, %v1147_v0  ;;  %v4150_v0 = vpack.c.bf16 %v1181_v19, %v1179_v15  ;;  %v1186_v29 = vld [vmem:[#allocation9 + $0x3f8] sm:$0xff] }
 0x361   :  { %4091 = vmatpush1.bf16.msra.mxu1 %v4090_v2  ;;  %845 = vmatprep.subr.mxu0 %v749_v16  ;;  %v4126_v16 = vpack.c.bf16 %v1157_v20, %v1155_v36  ;;  %v4156_v17 = vpack.c.bf16 %v1059_v39, %v1057_v22  ;;  %v1065_v39 = vld [vmem:[#allocation9 + $0x48] sm:$0xff] }
 0x362   :  { %916 = vmatprep.subr.mxu1 %v753_v13  ;;  %846 = vmatpush1.msra.mxu0 %v750_v54  ;;  %v1160_v54 = vld [vmem:[#allocation9 + $0x328] sm:$0xff]  ;;  %v1162_v13 = vld [vmem:[#allocation9 + $0x338] sm:$0xff] }
 0x363   :  { %3852 = vmatmul.mubr.msk.f32.vlgmr.msra.gmra.mrb[2].mxu0 %vm310_vm8, %v754_v37  ;;  %4093 = vmatprep.subr.bf16.mxu0 %v4092_v30 }
 0x364   :  { %4095 = vmatpush1.bf16.msra.mxu0 %v4094_v31 }
 0x365   :  { %917 = vmatpush1.msra.mxu1 %v748_v47  ;;  %4097 = vmatprep.subr.bf16.mxu0 %v4096_v44  ;;  %v4128_v47 = vpack.c.bf16 %v1162_v13, %v1160_v54 }
 0x366   :  { %3853 = vmatmul.mubr.msk.f32.vlgmr.msra.gmra.mrb[6].mxu1 %vm310_vm8, %v754_v37  ;;  %4605 = vmatprep.subr.bf16.mxu1 %v4092_v30  ;;  %v1140_v37 = vld [vmem:[#allocation9 + $0x288] sm:$0xff] }
 0x367   :  { %4607 = vmatpush1.bf16.msra.mxu1 %v4094_v31  ;;  %v4108_v55 = vpack.c.bf16 %v1142_v60, %v1140_v37  ;;  %v1164_v30 = vld [vmem:[#allocation9 + $0x348] sm:$0xff]  ;;  %v1165_v31 = vld [vmem:[#allocation9 + $0x350] sm:$0xff]  ;;  %v1171_v37 = vld [vmem:[#allocation9 + $0x380] sm:$0xff] }
 0x368   :  { %4609 = vmatprep.subr.bf16.mxu1 %v4096_v44  ;;  %4099 = vmatpush1.bf16.msra.mxu0 %v4098_v58  ;;  %v4132_v28 = vpack.c.bf16 %v1166_v26, %v1164_v30  ;;  %v4134_v44 = vpack.c.bf16 %v1165_v31, %v1163_v1  ;;  %v1173_v60 = vld [vmem:[#allocation9 + $0x390] sm:$0xff] }
 0x369   :  { %4101 = vmatprep.subr.bf16.mxu0 %v4100_v57 }
 0x36b   :  { %4611 = vmatpush1.bf16.msra.mxu1 %v4098_v58  ;;  %v1169_v58 = vld [vmem:[#allocation9 + $0x370] sm:$0xff] }
 0x36c   :  { %4613 = vmatprep.subr.bf16.mxu1 %v4100_v57  ;;  %4103 = vmatpush1.bf16.msra.mxu0 %v4102_v21  ;;  %v4138_v42 = vpack.c.bf16 %v1169_v58, %v1167_v41 }
 0x36d   :  { %4105 = vmatprep.subr.bf16.mxu0 %v4104_v46 }
 0x36f   :  { %4615 = vmatpush1.bf16.msra.mxu1 %v4102_v21  ;;  %v1172_v21 = vld [vmem:[#allocation9 + $0x388] sm:$0xff] }
 0x370   :  { %4617 = vmatprep.subr.bf16.mxu1 %v4104_v46  ;;  %4107 = vmatpush1.bf16.msra.mxu0 %v4106_v62  ;;  %v1174_v46 = vld [vmem:[#allocation9 + $0x398] sm:$0xff] }
 0x371   :  { %4109 = vmatprep.subr.bf16.mxu0 %v4108_v55  ;;  %v4140_v14 = vpack.c.bf16 %v1174_v46, %v1172_v21 }
 0x373   :  { %4619 = vmatpush1.bf16.msra.mxu1 %v4106_v62 }
 0x374   :  { %4621 = vmatprep.subr.bf16.mxu1 %v4108_v55  ;;  %4111 = vmatpush1.bf16.msra.mxu0 %v4110_v52  ;;  %v4142_v55 = vpack.c.bf16 %v1173_v60, %v1171_v37  ;;  %v1056_v60 = vld [vmem:[#allocation9] sm:$0xff] }
 0x375   :  { %4113 = vmatprep.subr.bf16.mxu0 %v4112_v49 }
 0x377   :  { %4623 = vmatpush1.bf16.msra.mxu1 %v4110_v52  ;;  %v4144_v52 = vpack.c.bf16 %v1178_v59, %v1176_v56  ;;  %v1061_v59 = vld [vmem:[#allocation9 + $0x28] sm:$0xff] }
 0x378   :  { %4625 = vmatprep.subr.bf16.mxu1 %v4112_v49  ;;  %4115 = vmatpush1.bf16.msra.mxu0 %v4114_v45  ;;  %v4146_v49 = vpack.c.bf16 %v1177_v3, %v1175_v63 }
 0x379   :  { %4117 = vmatprep.subr.bf16.mxu0 %v4116_v51 }
 0x37b   :  { %4627 = vmatpush1.bf16.msra.mxu1 %v4114_v45  ;;  %v4148_v45 = vpack.c.bf16 %v1182_v61, %v1180_v50 }
 0x37c   :  { %4629 = vmatprep.subr.bf16.mxu1 %v4116_v51  ;;  %4119 = vmatpush1.bf16.msra.mxu0 %v4118_v53  ;;  %v1184_v51 = vld [vmem:[#allocation9 + $0x3e8] sm:$0xff] }
 0x37d   :  { %4121 = vmatprep.subr.bf16.mxu0 %v4120_v5  ;;  %v4152_v32 = vpack.c.bf16 %v1186_v29, %v1184_v51 }
 0x37f   :  { %4631 = vmatpush1.bf16.msra.mxu1 %v4118_v53  ;;  %v1185_v53 = vld [vmem:[#allocation9 + $0x3f0] sm:$0xff] }
 0x380   :  { %4633 = vmatprep.subr.bf16.mxu1 %v4120_v5  ;;  %4123 = vmatpush1.bf16.msra.mxu0 %v4122_v18  ;;  %v4154_v5 = vpack.c.bf16 %v1185_v53, %v1183_v34  ;;  %v1062_v34 = vld [vmem:[#allocation9 + $0x30] sm:$0xff] }
 0x381   :  { %4125 = vmatprep.subr.bf16.mxu0 %v4124_v35 }
 0x383   :  { %4635 = vmatpush1.bf16.msra.mxu1 %v4122_v18 }
 0x384   :  { %4637 = vmatprep.subr.bf16.mxu1 %v4124_v35  ;;  %4127 = vmatpush1.bf16.msra.mxu0 %v4126_v16 }
 0x385   :  { %4129 = vmatprep.subr.bf16.mxu0 %v4128_v47 }
 0x387   :  { %4639 = vmatpush1.bf16.msra.mxu1 %v4126_v16 }
 0x388   :  { %4641 = vmatprep.subr.bf16.mxu1 %v4128_v47  ;;  %4131 = vmatpush1.bf16.msra.mxu0 %v4130_v27 }
 0x389   :  { %4133 = vmatprep.subr.bf16.mxu0 %v4132_v28 }
 0x38b   :  { %4643 = vmatpush1.bf16.msra.mxu1 %v4130_v27 }
 0x38c   :  { %4645 = vmatprep.subr.bf16.mxu1 %v4132_v28  ;;  %4135 = vmatpush1.bf16.msra.mxu0 %v4134_v44 }
 0x38d   :  { %4137 = vmatprep.subr.bf16.mxu0 %v4136_v38 }
 0x38f   :  { %4647 = vmatpush1.bf16.msra.mxu1 %v4134_v44 }
 0x390   :  { %4649 = vmatprep.subr.bf16.mxu1 %v4136_v38  ;;  %4139 = vmatpush1.bf16.msra.mxu0 %v4138_v42 }
 0x391   :  { %4141 = vmatprep.subr.bf16.mxu0 %v4140_v14 }
 0x393   :  { %4651 = vmatpush1.bf16.msra.mxu1 %v4138_v42 }
 0x394   :  { %4653 = vmatprep.subr.bf16.mxu1 %v4140_v14  ;;  %4143 = vmatpush1.bf16.msra.mxu0 %v4142_v55 }
 0x395   :  { %4145 = vmatprep.subr.bf16.mxu0 %v4144_v52 }
 0x397   :  { %4655 = vmatpush1.bf16.msra.mxu1 %v4142_v55 }
 0x398   :  { %4657 = vmatprep.subr.bf16.mxu1 %v4144_v52  ;;  %4147 = vmatpush1.bf16.msra.mxu0 %v4146_v49  ;;  %v1063_v52 = vld [vmem:[#allocation9 + $0x38] sm:$0xff] }
 0x399   :  { %4149 = vmatprep.subr.bf16.mxu0 %v4148_v45  ;;  %v4160_v29 = vpack.c.bf16 %v1063_v52, %v1061_v59  ;;  %v1084_v59 = vld [vmem:[#allocation9 + $0xe0] sm:$0xff]  ;;  %v1086_v52 = vld [vmem:[#allocation9 + $0xf0] sm:$0xff] }
 0x39b   :  { %4659 = vmatpush1.bf16.msra.mxu1 %v4146_v49 }
 0x39c   :  { %4661 = vmatprep.subr.bf16.mxu1 %v4148_v45  ;;  %4151 = vmatpush1.bf16.msra.mxu0 %v4150_v0 }
 0x39d   :  { %4153 = vmatprep.subr.bf16.mxu0 %v4152_v32 }
 0x39f   :  { %4663 = vmatpush1.bf16.msra.mxu1 %v4150_v0 }
 0x3a0   :  { %4665 = vmatprep.subr.bf16.mxu1 %v4152_v32  ;;  %4155 = vmatpush1.bf16.msra.mxu0 %v4154_v5  ;;  %v1060_v32 = vld [vmem:[#allocation9 + $0x20] sm:$0xff] }
 0x3a1   :  { %4157 = vmatprep.subr.bf16.mxu0 %v4156_v17 }
 0x3a3   :  { %4667 = vmatpush1.bf16.msra.mxu1 %v4154_v5 }
 0x3a4   :  { %4669 = vmatprep.subr.bf16.mxu1 %v4156_v17 }
 0x426   :  { %v824_v24 = vpop.f32.mrb[4].mxu1 }
 0x427   :  { %v6513_v2 = vmax.f32 %v824_v24, 0.0  ;;  %v826_v7 = vpop.f32.mrb[5].mxu1 }
 0x428   :  { %v6515_v9 = vmax.f32 %v826_v7, 0.0 }
 0x429   :  { %977 = vrot.lane.b32.xlu0 %v6513_v2, %s5664_s26 }
 0x42a   :  { %979 = vrot.lane.b32.xlu1 %v6515_v9, %s5664_s26 }
 0x436   :  { %v895_v57 = vpop.f32.mrb[2].mxu0 }
 0x437   :  { %v973_v4 = vmax.f32 %v895_v57, 0.0  ;;  %v897_v8 = vpop.f32.mrb[3].mxu0  ;;  %v6566_v57 = vshrl.u32 %v167_v10, 7  ;;  %v3638_v10 = vld [vmem:[#allocation15 + $0x60] sm:$0xff] }
 0x438   :  { %v6521_v40 = vmax.f32 %v897_v8, 0.0 }
 0x439   :  { %981 = vrot.lane.b32.xlu0 %v973_v4, %s5664_s26  ;;  %v966_v12 = vpop.f32.mrb[6].mxu1  ;;  %v6571_v8 = vsub.s32 0, %v6566_v57  ;;  %v6574_v21 = vsub.s32 1, %v6566_v57 }
 0x43a   :  { %983 = vrot.lane.b32.xlu1 %v6521_v40, %s5664_s26  ;;  %v968_v62 = vpop.f32.mrb[7].mxu1  ;;  %v6538_v33 = vmax.f32 %v966_v12, 0.0 }
 0x43b   :  { %v976_v18 = vmax.f32 %v968_v62, 0.0  ;;  %v1058_v62 = vld [vmem:[#allocation9 + $0x10] sm:$0xff] }
 0x43c   :  { %v4158_v19 = vpack.c.bf16 %v1058_v62, %v1056_v60  ;;  %v1085_v60 = vld [vmem:[#allocation9 + $0xe8] sm:$0xff]  ;;  %v1087_v62 = vld [vmem:[#allocation9 + $0xf8] sm:$0xff] }
 0x43d   :  { %1001 = vrot.lane.b32.xlu0 %v6513_v2, %s5670_s5 }
 0x43e   :  { %1003 = vrot.lane.b32.xlu1 %v6515_v9, %s5670_s5 }
 0x441   :  { %1005 = vrot.lane.b32.xlu0 %v973_v4, %s5670_s5 }
 0x442   :  { %1007 = vrot.lane.b32.xlu1 %v6521_v40, %s5670_s5 }
 0x445   :  { %1025 = vrot.lane.b32.xlu0 %v6513_v2, %s5672_s13 }
 0x446   :  { %1027 = vrot.lane.b32.xlu1 %v6515_v9, %s5672_s13 }
 0x449   :  { %1029 = vrot.lane.b32.xlu0 %v973_v4, %s5672_s13 }
 0x44a   :  { %1031 = vrot.lane.b32.xlu1 %v6521_v40, %s5672_s13 }
 0x44d   :  { %985 = vrot.lane.b32.xlu0 %v6538_v33, %s5664_s26 }
 0x44e   :  { %987 = vrot.lane.b32.xlu1 %v976_v18, %s5664_s26 }
 0x451   :  { %1009 = vrot.lane.b32.xlu0 %v6538_v33, %s5670_s5 }
 0x452   :  { %1011 = vrot.lane.b32.xlu1 %v976_v18, %s5670_s5 }
 0x455   :  { %1033 = vrot.lane.b32.xlu0 %v6538_v33, %s5672_s13 }
 0x456   :  { %1035 = vrot.lane.b32.xlu1 %v976_v18, %s5672_s13  ;;  %v4162_v18 = vpack.c.bf16 %v1062_v34, %v1060_v32  ;;  %v1094_v32 = vld [vmem:[#allocation9 + $0x130] sm:$0xff]  ;;  %v1097_v34 = vld [vmem:[#allocation9 + $0x148] sm:$0xff] }
 0x49b   :  { %v978_v35 = vpop.permute.xlu0 %977 }
 0x49c   :  { %v980_v36 = vpop.permute.xlu1 %979 }
 0x49d   :  { %v993_v54 = vsel %vm188_vm1, %v978_v35, %v980_v36 }
 0x49e   :  { %v995_v25 = vmax.f32 %v6513_v2, %v993_v54  ;;  %v1068_v54 = vld [vmem:[#allocation9 + $0x60] sm:$0xff] }
 0x4ab   :  { %v982_v20 = vpop.permute.xlu0 %981 }
 0x4ac   :  { %v984_v24 = vpop.permute.xlu1 %983  ;;  %v992_v27 = vsel %vm188_vm1, %v980_v36, %v982_v20  ;;  %v1064_v36 = vld [vmem:[#allocation9 + $0x40] sm:$0xff]  ;;  %v1066_v20 = vld [vmem:[#allocation9 + $0x50] sm:$0xff] }
 0x4ad   :  { %v996_v31 = vmax.f32 %v6515_v9, %v992_v27 }
 0x4af   :  { %v1002_v7 = vpop.permute.xlu0 %1001 }
 0x4b0   :  { %v1004_v16 = vpop.permute.xlu1 %1003 }
 0x4b1   :  { %v1017_v23 = vsel %vm264_vm6, %v1002_v7, %v1004_v16  ;;  %v4166_v7 = vpack.c.bf16 %v1066_v20, %v1064_v36  ;;  %v1100_v20 = vld [vmem:[#allocation9 + $0x160] sm:$0xff] }
 0x4b2   :  { %v1019_v26 = vmax.f32 %v995_v25, %v1017_v23  ;;  %v1075_v23 = vld [vmem:[#allocation9 + $0x98] sm:$0xff] }
 0x4b3   :  { %v1006_v13 = vpop.permute.xlu0 %1005 }
 0x4b4   :  { %v1008_v47 = vpop.permute.xlu1 %1007  ;;  %v1016_v28 = vsel %vm264_vm6, %v1004_v16, %v1006_v13  ;;  %v1070_v13 = vld [vmem:[#allocation9 + $0x70] sm:$0xff] }
 0x4b5   :  { %v1020_v43 = vmax.f32 %v996_v31, %v1016_v28  ;;  %v4170_v25 = vpack.c.bf16 %v1070_v13, %v1068_v54  ;;  %v1074_v31 = vld [vmem:[#allocation9 + $0x90] sm:$0xff]  ;;  %v1104_v13 = vld [vmem:[#allocation9 + $0x180] sm:$0xff] }
 0x4b7   :  { %v1026_v30 = vpop.permute.xlu0 %1025 }
 0x4b8   :  { %v1028_v1 = vpop.permute.xlu1 %1027 }
 0x4b9   :  { %v1041_v44 = vsel %vm302_vm7, %v1026_v30, %v1028_v1 }
 0x4ba   :  { %v1043_v48 = vmax.f32 %v1019_v26, %v1041_v44 }
 0x4bb   :  { %v1030_v38 = vpop.permute.xlu0 %1029 }
 0x4bc   :  { %1049 = vst [vmem:[#allocation2] sm:$0xff] %v1043_v48  ;;  %v1040_v2 = vsel %vm302_vm7, %v1028_v1, %v1030_v38  ;;  %v1032_v41 = vpop.permute.xlu1 %1031  ;;  %v1072_v1 = vld [vmem:[#allocation9 + $0x80] sm:$0xff]  ;;  %v1077_v48 = vld [vmem:[#allocation9 + $0xa8] sm:$0xff] }
 0x4bd   :  { %v1044_v58 = vmax.f32 %v1020_v43, %v1040_v2  ;;  %v1079_v43 = vld [vmem:[#allocation9 + $0xb8] sm:$0xff]  ;;  %v4174_v2 = vpack.c.bf16 %v1074_v31, %v1072_v1  ;;  %v1110_v1 = vld [vmem:[#allocation9 + $0x1b0] sm:$0xff]  ;;  %v1113_v31 = vld [vmem:[#allocation9 + $0x1c8] sm:$0xff] }
 0x4bf   :  { %1050 = vst [vmem:[#allocation2 + $0x8] sm:$0xff] %v1044_v58  ;;  %v986_v42 = vpop.permute.xlu0 %985  ;;  %v1076_v58 = vld [vmem:[#allocation9 + $0xa0] sm:$0xff] }
 0x4c0   :  { %v988_v4 = vpop.permute.xlu1 %987  ;;  %v990_v9 = vsel %vm188_vm1, %v984_v24, %v986_v42  ;;  %v1069_v24 = vld [vmem:[#allocation9 + $0x68] sm:$0xff] }
 0x4c1   :  { %v989_v46 = vsel %vm188_vm1, %v986_v42, %v988_v4  ;;  %v998_v55 = vmax.f32 %v6521_v40, %v990_v9  ;;  %v4168_v16 = vpack.c.bf16 %v1071_v11, %v1069_v24  ;;  %v1078_v42 = vld [vmem:[#allocation9 + $0xb0] sm:$0xff]  ;;  %v1081_v4 = vld [vmem:[#allocation9 + $0xc8] sm:$0xff]  ;;  %v1083_v9 = vld [vmem:[#allocation9 + $0xd8] sm:$0xff] }
 0x4c2   :  { %v999_v63 = vmax.f32 %v6538_v33, %v989_v46  ;;  %v1067_v33 = vld [vmem:[#allocation9 + $0x58] sm:$0xff]  ;;  %v4178_v46 = vpack.c.bf16 %v1078_v42, %v1076_v58  ;;  %v1102_v24 = vld [vmem:[#allocation9 + $0x170] sm:$0xff]  ;;  %v1105_v11 = vld [vmem:[#allocation9 + $0x188] sm:$0xff] }
 0x4c3   :  { %v1010_v12 = vpop.permute.xlu0 %1009  ;;  %v4164_v35 = vpack.c.bf16 %v1067_v33, %v1065_v39  ;;  %v1096_v39 = vld [vmem:[#allocation9 + $0x140] sm:$0xff]  ;;  %v1098_v33 = vld [vmem:[#allocation9 + $0x150] sm:$0xff]  ;;  %v1119_v58 = vld [vmem:[#allocation9 + $0x1f8] sm:$0xff] }
 0x4c4   :  { %v1014_v14 = vsel %vm264_vm6, %v1008_v47, %v1010_v12  ;;  %v1012_v37 = vpop.permute.xlu1 %1011  ;;  %v1073_v47 = vld [vmem:[#allocation9 + $0x88] sm:$0xff] }
 0x4c5   :  { %v1013_v56 = vsel %vm264_vm6, %v1010_v12, %v1012_v37  ;;  %v1022_v50 = vmax.f32 %v998_v55, %v1014_v14  ;;  %v4172_v44 = vpack.c.bf16 %v1075_v23, %v1073_v47  ;;  %v4180_v12 = vpack.c.bf16 %v1083_v9, %v1081_v4  ;;  %v1080_v14 = vld [vmem:[#allocation9 + $0xc0] sm:$0xff]  ;;  %v1082_v37 = vld [vmem:[#allocation9 + $0xd0] sm:$0xff]  ;;  %v1109_v23 = vld [vmem:[#allocation9 + $0x1a8] sm:$0xff] }
 0x4c6   :  { %v1121_v3 = vld [vmem:[#allocation2 + $0x1] ss:$8 sm:$0x3]  ;;  %v6584_v49 = vld [vmem:[#allocation2] ss:$8 sm:$0x3]  ;;  %v1023_v0 = vmax.f32 %v999_v63, %v1013_v56  ;;  %v4182_v55 = vpack.c.bf16 %v1082_v37, %v1080_v14  ;;  %v4184_v56 = vpack.c.bf16 %v1087_v62, %v1085_v60 }
 0x4c7   :  { %v1034_v61 = vpop.permute.xlu0 %1033  ;;  %v1191_v45 = vrot.slane %v1121_v3, %v6571_v8  ;;  %v1195_v15 = vrot.slane %v1121_v3, %v6574_v21  ;;  %v1277_v22 = vrot.slane %v6584_v49, %v6574_v21  ;;  %v1089_v63 = vld [vmem:[#allocation9 + $0x108] sm:$0xff]  ;;  %v1091_v3 = vld [vmem:[#allocation9 + $0x118] sm:$0xff]  ;;  %v1106_v47 = vld [vmem:[#allocation9 + $0x190] sm:$0xff] }
 0x4c8   :  { %v1038_v40 = vsel %vm302_vm7, %v1032_v41, %v1034_v61  ;;  %v1036_v51 = vpop.permute.xlu1 %1035  ;;  %v4176_v41 = vpack.c.bf16 %v1079_v43, %v1077_v48  ;;  %v1116_v9 = vld [vmem:[#allocation9 + $0x1e0] sm:$0xff]  ;;  %v1357_v14 = vld [vmem:[#allocation9 + $0x418] sm:$0xff] }
 0x4c9   :  { %v1046_v53 = vmax.f32 %v1022_v50, %v1038_v40  ;;  %v1037_v5 = vsel %vm302_vm7, %v1034_v61, %v1036_v51  ;;  %1262 = vmatprep.mubr.f32.mxu0 %v1195_v15  ;;  %v4186_v50 = vpack.c.bf16 %v1086_v52, %v1084_v59  ;;  %v4188_v61 = vpack.c.bf16 %v1091_v3, %v1089_v63  ;;  %v1090_v15 = vld [vmem:[#allocation9 + $0x110] sm:$0xff]  ;;  %v1354_v62 = vld [vmem:[#allocation9 + $0x400] sm:$0xff]  ;;  %v1361_v59 = vld [vmem:[#allocation9 + $0x438] sm:$0xff] }
 0x4ca   :  { %v1047_v17 = vmax.f32 %v1023_v0, %v1037_v5  ;;  %1263 = vmatmul.mubr.f32.vlgmr.msra.gmra.mrb[4].mxu0 %v1191_v45  ;;  %v1088_v45 = vld [vmem:[#allocation9 + $0x100] sm:$0xff]  ;;  %v1095_v0 = vld [vmem:[#allocation9 + $0x138] sm:$0xff]  ;;  %v1273_v3 = vrot.slane %v6584_v49, %v6571_v8  ;;  %v1364_v49 = vld [vmem:[#allocation9 + $0x450] sm:$0xff] }
 0x4cb   :  { %1052 = vst [vmem:[#allocation2 + $0x18] sm:$0xff] %v1046_v53  ;;  %4159 = vmatpush1.bf16.msra.mxu0 %v4158_v19  ;;  %1344 = vmatprep.mubr.f32.mxu0 %v1277_v22  ;;  %v4190_v40 = vpack.c.bf16 %v1090_v15, %v1088_v45  ;;  %v1099_v53 = vld [vmem:[#allocation9 + $0x158] sm:$0xff]  ;;  %v1360_v45 = vld [vmem:[#allocation9 + $0x430] sm:$0xff] }
 0x4cc   :  { %1053 = vst [vmem:[#allocation2 + $0x20] sm:$0xff] %v1047_v17  ;;  %4161 = vmatprep.subr.bf16.mxu0 %v4160_v29  ;;  %v4196_v22 = vpack.c.bf16 %v1099_v53, %v1097_v34  ;;  %v1101_v17 = vld [vmem:[#allocation9 + $0x168] sm:$0xff]  ;;  %v6600_v52 = vld [vmem:[#allocation2 + $0x2] ss:$8 sm:$0x3] }
 0x4cd   :  { %v1426_v15 = vrot.slane %v6600_v52, %v6574_v21  ;;  %v1369_v34 = vld [vmem:[#allocation9 + $0x478] sm:$0xff] }
 0x4cf   :  { %4163 = vmatpush1.bf16.msra.mxu0 %v4162_v18 }
 0x4d0   :  { %4165 = vmatprep.subr.bf16.mxu0 %v4164_v35 }
 0x4d3   :  { %4167 = vmatpush1.bf16.msra.mxu0 %v4166_v7  ;;  %v2348_v27 = vld [vmem:[#allocation2 + $0x19] ss:$8 sm:$0x3]  ;;  %v6594_v30 = vld [vmem:[#allocation2 + $0x18] ss:$8 sm:$0x3] }
 0x4d4   :  { %4169 = vmatprep.subr.bf16.mxu0 %v4168_v16  ;;  %v2417_v26 = vrot.slane %v2348_v27, %v6571_v8  ;;  %v2421_v28 = vrot.slane %v2348_v27, %v6574_v21  ;;  %v2503_v38 = vrot.slane %v6594_v30, %v6574_v21  ;;  %v4206_v27 = vpack.c.bf16 %v1106_v47, %v1104_v13 }
 0x4d6   :  { %2488 = vmatprep.mubr.f32.mxu1 %v2421_v28  ;;  %v1108_v28 = vld [vmem:[#allocation9 + $0x1a0] sm:$0xff] }
 0x4d7   :  { %4171 = vmatpush1.bf16.msra.mxu0 %v4170_v25  ;;  %2489 = vmatmul.mubr.f32.vlgmr.msra.gmra.mrb[8].mxu1 %v2417_v26  ;;  %v4210_v48 = vpack.c.bf16 %v1110_v1, %v1108_v28  ;;  %v1378_v1 = vld [vmem:[#allocation9 + $0x4c0] sm:$0xff] }
 0x4d8   :  { %4671 = vmatpush1.bf16.msra.mxu1 %v4158_v19  ;;  %2570 = vmatprep.mubr.f32.mxu1 %v2503_v38  ;;  %v1093_v19 = vld [vmem:[#allocation9 + $0x128] sm:$0xff]  ;;  %v1112_v38 = vld [vmem:[#allocation9 + $0x1c0] sm:$0xff] }
 0x4d9   :  { %4173 = vmatprep.subr.bf16.mxu0 %v4172_v44  ;;  %4673 = vmatprep.subr.bf16.mxu1 %v4160_v29  ;;  %v4192_v51 = vpack.c.bf16 %v1095_v0, %v1093_v19  ;;  %v1092_v29 = vld [vmem:[#allocation9 + $0x120] sm:$0xff]  ;;  %v1363_v19 = vld [vmem:[#allocation9 + $0x448] sm:$0xff]  ;;  %v1365_v0 = vld [vmem:[#allocation9 + $0x458] sm:$0xff] }
 0x4da   :  { %v4194_v5 = vpack.c.bf16 %v1094_v32, %v1092_v29  ;;  %v1362_v29 = vld [vmem:[#allocation9 + $0x440] sm:$0xff]  ;;  %v1367_v32 = vld [vmem:[#allocation9 + $0x468] sm:$0xff] }
 0x4db   :  { %4175 = vmatpush1.bf16.msra.mxu0 %v4174_v2  ;;  %v4230_v53 = vpack.c.bf16 %v1364_v49, %v1362_v29  ;;  %v1400_v29 = vld [vmem:[#allocation9 + $0x570] sm:$0xff]  ;;  %v1403_v49 = vld [vmem:[#allocation9 + $0x588] sm:$0xff] }
 0x4dc   :  { %4675 = vmatpush1.bf16.msra.mxu1 %v4162_v18  ;;  %4177 = vmatprep.subr.bf16.mxu0 %v4176_v41  ;;  %v1103_v18 = vld [vmem:[#allocation9 + $0x178] sm:$0xff] }
 0x4dd   :  { %4677 = vmatprep.subr.bf16.mxu1 %v4164_v35  ;;  %v4198_v35 = vpack.c.bf16 %v1098_v33, %v1096_v39  ;;  %v4200_v36 = vpack.c.bf16 %v1103_v18, %v1101_v17  ;;  %v1368_v39 = vld [vmem:[#allocation9 + $0x470] sm:$0xff]  ;;  %v1371_v33 = vld [vmem:[#allocation9 + $0x488] sm:$0xff]  ;;  %v1373_v17 = vld [vmem:[#allocation9 + $0x498] sm:$0xff] }
 0x4df   :  { %4179 = vmatpush1.bf16.msra.mxu0 %v4178_v46 }
 0x4e0   :  { %4679 = vmatpush1.bf16.msra.mxu1 %v4166_v7  ;;  %4181 = vmatprep.subr.bf16.mxu0 %v4180_v12  ;;  %v1107_v7 = vld [vmem:[#allocation9 + $0x198] sm:$0xff] }
 0x4e1   :  { %4681 = vmatprep.subr.bf16.mxu1 %v4168_v16  ;;  %v4202_v16 = vpack.c.bf16 %v1102_v24, %v1100_v20  ;;  %v4204_v54 = vpack.c.bf16 %v1107_v7, %v1105_v11  ;;  %v1372_v20 = vld [vmem:[#allocation9 + $0x490] sm:$0xff]  ;;  %v2499_v24 = vrot.slane %v6594_v30, %v6571_v8  ;;  %v4236_v11 = vpack.c.bf16 %v1373_v17, %v1371_v33  ;;  %v1375_v7 = vld [vmem:[#allocation9 + $0x4a8] sm:$0xff]  ;;  %v1409_v33 = vld [vmem:[#allocation9 + $0x5b8] sm:$0xff] }
 0x4e3   :  { %4183 = vmatpush1.bf16.msra.mxu0 %v4182_v55 }
 0x4e4   :  { %4683 = vmatpush1.bf16.msra.mxu1 %v4170_v25  ;;  %4185 = vmatprep.subr.bf16.mxu0 %v4184_v56  ;;  %v1111_v25 = vld [vmem:[#allocation9 + $0x1b8] sm:$0xff] }
 0x4e5   :  { %4685 = vmatprep.subr.bf16.mxu1 %v4172_v44  ;;  %v4208_v26 = vpack.c.bf16 %v1111_v25, %v1109_v23  ;;  %v1115_v44 = vld [vmem:[#allocation9 + $0x1d8] sm:$0xff]  ;;  %v1374_v23 = vld [vmem:[#allocation9 + $0x4a0] sm:$0xff]  ;;  %v1376_v25 = vld [vmem:[#allocation9 + $0x4b0] sm:$0xff] }
 0x4e6   :  { %v4212_v43 = vpack.c.bf16 %v1115_v44, %v1113_v31  ;;  %v4242_v30 = vpack.c.bf16 %v1376_v25, %v1374_v23  ;;  %v1380_v31 = vld [vmem:[#allocation9 + $0x4d0] sm:$0xff]  ;;  %v1383_v44 = vld [vmem:[#allocation9 + $0x4e8] sm:$0xff]  ;;  %v1417_v23 = vld [vmem:[#allocation9 + $0x5f8] sm:$0xff] }
 0x4e7   :  { %4187 = vmatpush1.bf16.msra.mxu0 %v4186_v50 }
 0x4e8   :  { %4687 = vmatpush1.bf16.msra.mxu1 %v4174_v2  ;;  %4189 = vmatprep.subr.bf16.mxu0 %v4188_v61  ;;  %v1114_v2 = vld [vmem:[#allocation9 + $0x1d0] sm:$0xff] }
 0x4e9   :  { %4689 = vmatprep.subr.bf16.mxu1 %v4176_v41  ;;  %v1117_v41 = vld [vmem:[#allocation9 + $0x1e8] sm:$0xff]  ;;  %v4214_v42 = vpack.c.bf16 %v1114_v2, %v1112_v38  ;;  %v1382_v2 = vld [vmem:[#allocation9 + $0x4e0] sm:$0xff] }
 0x4ea   :  { %v4216_v4 = vpack.c.bf16 %v1119_v58, %v1117_v41  ;;  %v1384_v41 = vld [vmem:[#allocation9 + $0x4f0] sm:$0xff]  ;;  %v1387_v58 = vld [vmem:[#allocation9 + $0x508] sm:$0xff] }
 0x4eb   :  { %4191 = vmatpush1.bf16.msra.mxu0 %v4190_v40 }
 0x4ec   :  { %4691 = vmatpush1.bf16.msra.mxu1 %v4178_v46  ;;  %4193 = vmatprep.subr.bf16.mxu0 %v4192_v51  ;;  %v1118_v46 = vld [vmem:[#allocation9 + $0x1f0] sm:$0xff] }
 0x4ed   :  { %4693 = vmatprep.subr.bf16.mxu1 %v4180_v12  ;;  %v1355_v12 = vld [vmem:[#allocation9 + $0x408] sm:$0xff]  ;;  %v4218_v37 = vpack.c.bf16 %v1118_v46, %v1116_v9  ;;  %v1386_v46 = vld [vmem:[#allocation9 + $0x500] sm:$0xff] }
 0x4ee   :  { %v4220_v60 = vpack.c.bf16 %v1357_v14, %v1355_v12  ;;  %v1388_v12 = vld [vmem:[#allocation9 + $0x510] sm:$0xff]  ;;  %v1391_v14 = vld [vmem:[#allocation9 + $0x528] sm:$0xff] }
 0x4ef   :  { %4195 = vmatpush1.bf16.msra.mxu0 %v4194_v5 }
 0x4f0   :  { %4695 = vmatpush1.bf16.msra.mxu1 %v4182_v55  ;;  %4197 = vmatprep.subr.bf16.mxu0 %v4196_v22  ;;  %v1356_v55 = vld [vmem:[#allocation9 + $0x410] sm:$0xff] }
 0x4f1   :  { %4697 = vmatprep.subr.bf16.mxu1 %v4184_v56  ;;  %v1359_v56 = vld [vmem:[#allocation9 + $0x428] sm:$0xff]  ;;  %v4222_v63 = vpack.c.bf16 %v1356_v55, %v1354_v62  ;;  %v1390_v55 = vld [vmem:[#allocation9 + $0x520] sm:$0xff] }
 0x4f3   :  { %4199 = vmatpush1.bf16.msra.mxu0 %v4198_v35 }
 0x4f4   :  { %4699 = vmatpush1.bf16.msra.mxu1 %v4186_v50  ;;  %4201 = vmatprep.subr.bf16.mxu0 %v4200_v36  ;;  %v4224_v50 = vpack.c.bf16 %v1361_v59, %v1359_v56  ;;  %v1392_v56 = vld [vmem:[#allocation9 + $0x530] sm:$0xff]  ;;  %v1395_v59 = vld [vmem:[#allocation9 + $0x548] sm:$0xff] }
 0x4f5   :  { %4701 = vmatprep.subr.bf16.mxu1 %v4188_v61  ;;  %v1358_v61 = vld [vmem:[#allocation9 + $0x420] sm:$0xff] }
 0x4f7   :  { %4203 = vmatpush1.bf16.msra.mxu0 %v4202_v16 }
 0x4f8   :  { %4703 = vmatpush1.bf16.msra.mxu1 %v4190_v40  ;;  %4205 = vmatprep.subr.bf16.mxu0 %v4204_v54  ;;  %v4226_v40 = vpack.c.bf16 %v1360_v45, %v1358_v61  ;;  %v1394_v61 = vld [vmem:[#allocation9 + $0x540] sm:$0xff]  ;;  %v1396_v45 = vld [vmem:[#allocation9 + $0x550] sm:$0xff] }
 0x4f9   :  { %4705 = vmatprep.subr.bf16.mxu1 %v4192_v51  ;;  %v4228_v51 = vpack.c.bf16 %v1365_v0, %v1363_v19  ;;  %v1401_v19 = vld [vmem:[#allocation9 + $0x578] sm:$0xff]  ;;  %v4262_v0 = vpack.c.bf16 %v1396_v45, %v1394_v61  ;;  %v1519_v61 = vld [vmem:[#allocation9 + $0x670] sm:$0xff]  ;;  %v1522_v45 = vld [vmem:[#allocation9 + $0x688] sm:$0xff] }
 0x4fb   :  { %4207 = vmatpush1.bf16.msra.mxu0 %v4206_v27 }
 0x4fc   :  { %4707 = vmatpush1.bf16.msra.mxu1 %v4194_v5  ;;  %4209 = vmatprep.subr.bf16.mxu0 %v4208_v26  ;;  %v4232_v5 = vpack.c.bf16 %v1369_v34, %v1367_v32  ;;  %v1405_v32 = vld [vmem:[#allocation9 + $0x598] sm:$0xff] }
 0x4fd   :  { %4709 = vmatprep.subr.bf16.mxu1 %v4196_v22  ;;  %v1366_v22 = vld [vmem:[#allocation9 + $0x460] sm:$0xff] }
 0x4fe   :  { %v4234_v18 = vpack.c.bf16 %v1368_v39, %v1366_v22  ;;  %v1404_v22 = vld [vmem:[#allocation9 + $0x590] sm:$0xff]  ;;  %v1407_v39 = vld [vmem:[#allocation9 + $0x5a8] sm:$0xff] }
 0x4ff   :  { %4211 = vmatpush1.bf16.msra.mxu0 %v4210_v48 }
 0x500   :  { %4711 = vmatpush1.bf16.msra.mxu1 %v4198_v35  ;;  %4213 = vmatprep.subr.bf16.mxu0 %v4212_v43  ;;  %v6606_v35 = vld [vmem:[#allocation2 + $0x1a] ss:$8 sm:$0x3] }
 0x501   :  { %4713 = vmatprep.subr.bf16.mxu1 %v4200_v36  ;;  %v1370_v36 = vld [vmem:[#allocation9 + $0x480] sm:$0xff] }
 0x502   :  { %v4238_v13 = vpack.c.bf16 %v1372_v20, %v1370_v36  ;;  %v1406_v36 = vld [vmem:[#allocation9 + $0x5a0] sm:$0xff]  ;;  %v1408_v20 = vld [vmem:[#allocation9 + $0x5b0] sm:$0xff] }
 0x503   :  { %4215 = vmatpush1.bf16.msra.mxu0 %v4214_v42 }
 0x504   :  { %4715 = vmatpush1.bf16.msra.mxu1 %v4202_v16  ;;  %4217 = vmatprep.subr.bf16.mxu0 %v4216_v4  ;;  %v1377_v16 = vld [vmem:[#allocation9 + $0x4b8] sm:$0xff] }
 0x505   :  { %4717 = vmatprep.subr.bf16.mxu1 %v4204_v54  ;;  %v2651_v54 = vrot.slane %v6606_v35, %v6574_v21  ;;  %v4240_v47 = vpack.c.bf16 %v1377_v16, %v1375_v7  ;;  %v4274_v7 = vpack.c.bf16 %v1408_v20, %v1406_v36  ;;  %v1529_v20 = vld [vmem:[#allocation9 + $0x6c0] sm:$0xff] }
 0x507   :  { %4219 = vmatpush1.bf16.msra.mxu0 %v4218_v37 }
 0x508   :  { %4719 = vmatpush1.bf16.msra.mxu1 %v4206_v27  ;;  %4221 = vmatprep.subr.bf16.mxu0 %v4220_v60  ;;  %v1379_v27 = vld [vmem:[#allocation9 + $0x4c8] sm:$0xff] }
 0x509   :  { %4721 = vmatprep.subr.bf16.mxu1 %v4208_v26  ;;  %v1381_v26 = vld [vmem:[#allocation9 + $0x4d8] sm:$0xff] }
 0x50a   :  { %1345 = vmatmul.mubr.f32.vlgmr.msra.gmra.mrb[4].mxu0 %v1273_v3  ;;  %v4244_v28 = vpack.c.bf16 %v1381_v26, %v1379_v27  ;;  %v4258_v3 = vpack.c.bf16 %v1392_v56, %v1390_v55  ;;  %v1414_v26 = vld [vmem:[#allocation9 + $0x5e0] sm:$0xff]  ;;  %v1518_v56 = vld [vmem:[#allocation9 + $0x668] sm:$0xff] }
 0x50b   :  { %4223 = vmatpush1.bf16.msra.mxu0 %v4222_v63  ;;  %1493 = vmatprep.mubr.f32.mxu0 %v1426_v15  ;;  %v1399_v15 = vld [vmem:[#allocation9 + $0x568] sm:$0xff]  ;;  %v1513_v55 = vld [vmem:[#allocation9 + $0x640] sm:$0xff] }
 0x50c   :  { %4723 = vmatpush1.bf16.msra.mxu1 %v4210_v48  ;;  %4225 = vmatprep.subr.bf16.mxu0 %v4224_v50  ;;  %v1385_v48 = vld [vmem:[#allocation9 + $0x4f8] sm:$0xff] }
 0x50d   :  { %4725 = vmatprep.subr.bf16.mxu1 %v4212_v43  ;;  %v4246_v43 = vpack.c.bf16 %v1380_v31, %v1378_v1  ;;  %v4248_v38 = vpack.c.bf16 %v1385_v48, %v1383_v44  ;;  %v1508_v1 = vld [vmem:[#allocation9 + $0x618] sm:$0xff]  ;;  %v1505_v48 = vld [vmem:[#allocation9 + $0x600] sm:$0xff] }
 0x50f   :  { %4227 = vmatpush1.bf16.msra.mxu0 %v4226_v40 }
 0x510   :  { %4727 = vmatpush1.bf16.msra.mxu1 %v4214_v42  ;;  %4229 = vmatprep.subr.bf16.mxu0 %v4228_v51  ;;  %v1389_v42 = vld [vmem:[#allocation9 + $0x518] sm:$0xff] }
 0x511   :  { %4729 = vmatprep.subr.bf16.mxu1 %v4216_v4  ;;  %v4250_v4 = vpack.c.bf16 %v1384_v41, %v1382_v2  ;;  %v4252_v9 = vpack.c.bf16 %v1389_v42, %v1387_v58  ;;  %v1512_v2 = vld [vmem:[#allocation9 + $0x638] sm:$0xff]  ;;  %v1422_v42 = vrot.slane %v6600_v52, %v6571_v8  ;;  %v1515_v52 = vld [vmem:[#allocation9 + $0x650] sm:$0xff] }
 0x512   :  { %v6612_v41 = vld [vmem:[#allocation2 + $0x3] ss:$8 sm:$0x3] }
 0x513   :  { %4231 = vmatpush1.bf16.msra.mxu0 %v4230_v53 }
 0x514   :  { %4731 = vmatpush1.bf16.msra.mxu1 %v4218_v37  ;;  %4233 = vmatprep.subr.bf16.mxu0 %v4232_v5  ;;  %v1393_v37 = vld [vmem:[#allocation9 + $0x538] sm:$0xff] }
 0x515   :  { %4733 = vmatprep.subr.bf16.mxu1 %v4220_v60  ;;  %v4254_v60 = vpack.c.bf16 %v1388_v12, %v1386_v46  ;;  %v4256_v62 = vpack.c.bf16 %v1393_v37, %v1391_v14  ;;  %v1511_v46 = vld [vmem:[#allocation9 + $0x630] sm:$0xff]  ;;  %v1577_v12 = vrot.slane %v6612_v41, %v6574_v21  ;;  %v1514_v14 = vld [vmem:[#allocation9 + $0x648] sm:$0xff]  ;;  %v1516_v37 = vld [vmem:[#allocation9 + $0x658] sm:$0xff] }
 0x517   :  { %4235 = vmatpush1.bf16.msra.mxu0 %v4234_v18  ;;  %2571 = vmatmul.mubr.f32.vlgmr.msra.gmra.mrb[8].mxu1 %v2499_v24  ;;  %v1411_v24 = vld [vmem:[#allocation9 + $0x5c8] sm:$0xff] }
 0x518   :  { %4735 = vmatpush1.bf16.msra.mxu1 %v4222_v63  ;;  %2718 = vmatprep.mubr.f32.mxu1 %v2651_v54  ;;  %v1397_v63 = vld [vmem:[#allocation9 + $0x558] sm:$0xff]  ;;  %v1410_v54 = vld [vmem:[#allocation9 + $0x5c0] sm:$0xff] }
 0x519   :  { %4237 = vmatprep.subr.bf16.mxu0 %v4236_v11  ;;  %4737 = vmatprep.subr.bf16.mxu1 %v4224_v50  ;;  %v4260_v50 = vpack.c.bf16 %v1397_v63, %v1395_v59  ;;  %v1520_v59 = vld [vmem:[#allocation9 + $0x678] sm:$0xff]  ;;  %v4294_v63 = vpack.c.bf16 %v1515_v52, %v1513_v55  ;;  %v1551_v55 = vld [vmem:[#allocation9 + $0x770] sm:$0xff]  ;;  %v1554_v52 = vld [vmem:[#allocation9 + $0x788] sm:$0xff] }
 0x51b   :  { %4239 = vmatpush1.bf16.msra.mxu0 %v4238_v13 }
 0x51c   :  { %4739 = vmatpush1.bf16.msra.mxu1 %v4226_v40  ;;  %4241 = vmatprep.subr.bf16.mxu0 %v4240_v47  ;;  %v4264_v40 = vpack.c.bf16 %v1401_v19, %v1399_v15  ;;  %v1524_v15 = vld [vmem:[#allocation9 + $0x698] sm:$0xff] }
 0x51d   :  { %4741 = vmatprep.subr.bf16.mxu1 %v4228_v51  ;;  %v1398_v51 = vld [vmem:[#allocation9 + $0x560] sm:$0xff] }
 0x51e   :  { %v4266_v34 = vpack.c.bf16 %v1400_v29, %v1398_v51  ;;  %v1523_v51 = vld [vmem:[#allocation9 + $0x690] sm:$0xff]  ;;  %v2647_v29 = vrot.slane %v6606_v35, %v6571_v8 }
 0x51f   :  { %4243 = vmatpush1.bf16.msra.mxu0 %v4242_v30 }
 0x520   :  { %4743 = vmatpush1.bf16.msra.mxu1 %v4230_v53  ;;  %4245 = vmatprep.subr.bf16.mxu0 %v4244_v28  ;;  %v4268_v53 = vpack.c.bf16 %v1405_v32, %v1403_v49  ;;  %v4300_v49 = vpack.c.bf16 %v1524_v15, %v1522_v45  ;;  %v1526_v32 = vld [vmem:[#allocation9 + $0x6a8] sm:$0xff]  ;;  %v1560_v45 = vld [vmem:[#allocation9 + $0x7b8] sm:$0xff] }
 0x521   :  { %4745 = vmatprep.subr.bf16.mxu1 %v4232_v5  ;;  %v1402_v5 = vld [vmem:[#allocation9 + $0x580] sm:$0xff] }
 0x522   :  { %v4270_v17 = vpack.c.bf16 %v1404_v22, %v1402_v5 }
 0x523   :  { %4247 = vmatpush1.bf16.msra.mxu0 %v4246_v43 }
 0x524   :  { %4747 = vmatpush1.bf16.msra.mxu1 %v4234_v18  ;;  %4249 = vmatprep.subr.bf16.mxu0 %v4248_v38  ;;  %v4272_v18 = vpack.c.bf16 %v1409_v33, %v1407_v39  ;;  %v1525_v39 = vld [vmem:[#allocation9 + $0x6a0] sm:$0xff]  ;;  %v1527_v33 = vld [vmem:[#allocation9 + $0x6b0] sm:$0xff] }
 0x525   :  { %4749 = vmatprep.subr.bf16.mxu1 %v4236_v11  ;;  %v1413_v11 = vld [vmem:[#allocation9 + $0x5d8] sm:$0xff]  ;;  %v4306_v35 = vpack.c.bf16 %v1527_v33, %v1525_v39 }
 0x526   :  { %v4276_v16 = vpack.c.bf16 %v1413_v11, %v1411_v24  ;;  %v1531_v24 = vld [vmem:[#allocation9 + $0x6d0] sm:$0xff]  ;;  %v1534_v11 = vld [vmem:[#allocation9 + $0x6e8] sm:$0xff]  ;;  %v1568_v39 = vld [vmem:[#allocation9 + $0x7f8] sm:$0xff] }
 0x527   :  { %4251 = vmatpush1.bf16.msra.mxu0 %v4250_v4 }
 0x528   :  { %4751 = vmatpush1.bf16.msra.mxu1 %v4238_v13  ;;  %4253 = vmatprep.subr.bf16.mxu0 %v4252_v9  ;;  %v1412_v13 = vld [vmem:[#allocation9 + $0x5d0] sm:$0xff] }
 0x529   :  { %4753 = vmatprep.subr.bf16.mxu1 %v4240_v47  ;;  %v1415_v47 = vld [vmem:[#allocation9 + $0x5e8] sm:$0xff]  ;;  %v4278_v25 = vpack.c.bf16 %v1412_v13, %v1410_v54  ;;  %v1533_v13 = vld [vmem:[#allocation9 + $0x6e0] sm:$0xff] }
 0x52a   :  { %v4280_v27 = vpack.c.bf16 %v1417_v23, %v1415_v47  ;;  %v1535_v47 = vld [vmem:[#allocation9 + $0x6f0] sm:$0xff]  ;;  %v1538_v23 = vld [vmem:[#allocation9 + $0x708] sm:$0xff] }
 0x52b   :  { %4255 = vmatpush1.bf16.msra.mxu0 %v4254_v60 }
 0x52c   :  { %4755 = vmatpush1.bf16.msra.mxu1 %v4242_v30  ;;  %4257 = vmatprep.subr.bf16.mxu0 %v4256_v62  ;;  %v1416_v30 = vld [vmem:[#allocation9 + $0x5f0] sm:$0xff] }
 0x52d   :  { %4757 = vmatprep.subr.bf16.mxu1 %v4244_v28  ;;  %v1506_v28 = vld [vmem:[#allocation9 + $0x608] sm:$0xff]  ;;  %v4282_v31 = vpack.c.bf16 %v1416_v30, %v1414_v26  ;;  %v1537_v30 = vld [vmem:[#allocation9 + $0x700] sm:$0xff] }
 0x52e   :  { %v4284_v44 = vpack.c.bf16 %v1508_v1, %v1506_v28  ;;  %v1539_v28 = vld [vmem:[#allocation9 + $0x710] sm:$0xff]  ;;  %v1542_v1 = vld [vmem:[#allocation9 + $0x728] sm:$0xff] }
 0x52f   :  { %4259 = vmatpush1.bf16.msra.mxu0 %v4258_v3 }
 0x530   :  { %4759 = vmatpush1.bf16.msra.mxu1 %v4246_v43  ;;  %4261 = vmatprep.subr.bf16.mxu0 %v4260_v50  ;;  %v1507_v43 = vld [vmem:[#allocation9 + $0x610] sm:$0xff] }
 0x531   :  { %4761 = vmatprep.subr.bf16.mxu1 %v4248_v38  ;;  %v1510_v38 = vld [vmem:[#allocation9 + $0x628] sm:$0xff]  ;;  %v4286_v58 = vpack.c.bf16 %v1507_v43, %v1505_v48  ;;  %v1541_v43 = vld [vmem:[#allocation9 + $0x720] sm:$0xff] }
 0x533   :  { %4263 = vmatpush1.bf16.msra.mxu0 %v4262_v0 }
 0x534   :  { %4763 = vmatpush1.bf16.msra.mxu1 %v4250_v4  ;;  %4265 = vmatprep.subr.bf16.mxu0 %v4264_v40  ;;  %v4288_v4 = vpack.c.bf16 %v1512_v2, %v1510_v38  ;;  %v1543_v38 = vld [vmem:[#allocation9 + $0x730] sm:$0xff]  ;;  %v1546_v2 = vld [vmem:[#allocation9 + $0x748] sm:$0xff] }
 0x535   :  { %4765 = vmatprep.subr.bf16.mxu1 %v4252_v9  ;;  %v1509_v9 = vld [vmem:[#allocation9 + $0x620] sm:$0xff] }
 0x537   :  { %4267 = vmatpush1.bf16.msra.mxu0 %v4266_v34 }
 0x538   :  { %4767 = vmatpush1.bf16.msra.mxu1 %v4254_v60  ;;  %4269 = vmatprep.subr.bf16.mxu0 %v4268_v53  ;;  %v4290_v60 = vpack.c.bf16 %v1511_v46, %v1509_v9  ;;  %v1545_v9 = vld [vmem:[#allocation9 + $0x740] sm:$0xff]  ;;  %v1547_v46 = vld [vmem:[#allocation9 + $0x750] sm:$0xff] }
 0x539   :  { %4769 = vmatprep.subr.bf16.mxu1 %v4256_v62  ;;  %v4292_v62 = vpack.c.bf16 %v1516_v37, %v1514_v14  ;;  %v1552_v14 = vld [vmem:[#allocation9 + $0x778] sm:$0xff]  ;;  %v4326_v37 = vpack.c.bf16 %v1547_v46, %v1545_v9  ;;  %v1670_v9 = vld [vmem:[#allocation9 + $0x870] sm:$0xff]  ;;  %v1673_v46 = vld [vmem:[#allocation9 + $0x888] sm:$0xff] }
 0x53b   :  { %4271 = vmatpush1.bf16.msra.mxu0 %v4270_v17 }
 0x53c   :  { %4771 = vmatpush1.bf16.msra.mxu1 %v4258_v3  ;;  %4273 = vmatprep.subr.bf16.mxu0 %v4272_v18  ;;  %v4296_v3 = vpack.c.bf16 %v1520_v59, %v1518_v56  ;;  %v1556_v56 = vld [vmem:[#allocation9 + $0x798] sm:$0xff] }
 0x53d   :  { %4773 = vmatprep.subr.bf16.mxu1 %v4260_v50  ;;  %v1517_v50 = vld [vmem:[#allocation9 + $0x660] sm:$0xff] }
 0x53e   :  { %v4298_v19 = vpack.c.bf16 %v1519_v61, %v1517_v50  ;;  %v1555_v50 = vld [vmem:[#allocation9 + $0x790] sm:$0xff]  ;;  %v1558_v61 = vld [vmem:[#allocation9 + $0x7a8] sm:$0xff] }
 0x53f   :  { %4275 = vmatpush1.bf16.msra.mxu0 %v4274_v7 }
 0x540   :  { %4775 = vmatpush1.bf16.msra.mxu1 %v4262_v0  ;;  %4277 = vmatprep.subr.bf16.mxu0 %v4276_v16  ;;  %v6618_v0 = vld [vmem:[#allocation2 + $0x1b] ss:$8 sm:$0x3] }
 0x541   :  { %4777 = vmatprep.subr.bf16.mxu1 %v4264_v40  ;;  %v1521_v40 = vld [vmem:[#allocation9 + $0x680] sm:$0xff] }
 0x542   :  { %v4302_v5 = vpack.c.bf16 %v1523_v51, %v1521_v40  ;;  %v1557_v40 = vld [vmem:[#allocation9 + $0x7a0] sm:$0xff]  ;;  %v1559_v51 = vld [vmem:[#allocation9 + $0x7b0] sm:$0xff] }
 0x543   :  { %4279 = vmatpush1.bf16.msra.mxu0 %v4278_v25 }
 0x544   :  { %4779 = vmatpush1.bf16.msra.mxu1 %v4266_v34  ;;  %4281 = vmatprep.subr.bf16.mxu0 %v4280_v27  ;;  %v1528_v34 = vld [vmem:[#allocation9 + $0x6b8] sm:$0xff] }
 0x545   :  { %4781 = vmatprep.subr.bf16.mxu1 %v4268_v53  ;;  %v2801_v53 = vrot.slane %v6618_v0, %v6574_v21  ;;  %v4304_v22 = vpack.c.bf16 %v1528_v34, %v1526_v32  ;;  %v4338_v32 = vpack.c.bf16 %v1559_v51, %v1557_v40  ;;  %v1680_v51 = vld [vmem:[#allocation9 + $0x8c0] sm:$0xff] }
 0x547   :  { %4283 = vmatpush1.bf16.msra.mxu0 %v4282_v31 }
 0x548   :  { %4783 = vmatpush1.bf16.msra.mxu1 %v4270_v17  ;;  %4285 = vmatprep.subr.bf16.mxu0 %v4284_v44  ;;  %v1530_v17 = vld [vmem:[#allocation9 + $0x6c8] sm:$0xff] }
 0x549   :  { %4785 = vmatprep.subr.bf16.mxu1 %v4272_v18  ;;  %v1532_v18 = vld [vmem:[#allocation9 + $0x6d8] sm:$0xff] }
 0x54a   :  { %1494 = vmatmul.mubr.f32.vlgmr.msra.gmra.mrb[4].mxu0 %v1422_v42  ;;  %v4308_v36 = vpack.c.bf16 %v1532_v18, %v1530_v17  ;;  %v4322_v42 = vpack.c.bf16 %v1543_v38, %v1541_v43  ;;  %v1565_v18 = vld [vmem:[#allocation9 + $0x7e0] sm:$0xff]  ;;  %v1669_v38 = vld [vmem:[#allocation9 + $0x868] sm:$0xff] }
 0x54b   :  { %4287 = vmatpush1.bf16.msra.mxu0 %v4286_v58  ;;  %1644 = vmatprep.mubr.f32.mxu0 %v1577_v12  ;;  %v1550_v12 = vld [vmem:[#allocation9 + $0x768] sm:$0xff]  ;;  %v1664_v43 = vld [vmem:[#allocation9 + $0x840] sm:$0xff] }
 0x54c   :  { %4787 = vmatpush1.bf16.msra.mxu1 %v4274_v7  ;;  %4289 = vmatprep.subr.bf16.mxu0 %v4288_v4  ;;  %v1536_v7 = vld [vmem:[#allocation9 + $0x6f8] sm:$0xff] }
 0x54d   :  { %4789 = vmatprep.subr.bf16.mxu1 %v4276_v16  ;;  %v4310_v16 = vpack.c.bf16 %v1531_v24, %v1529_v20  ;;  %v4312_v54 = vpack.c.bf16 %v1536_v7, %v1534_v11  ;;  %v1659_v20 = vld [vmem:[#allocation9 + $0x818] sm:$0xff]  ;;  %v1656_v7 = vld [vmem:[#allocation9 + $0x800] sm:$0xff] }
 0x54f   :  { %4291 = vmatpush1.bf16.msra.mxu0 %v4290_v60 }
 0x550   :  { %4791 = vmatpush1.bf16.msra.mxu1 %v4278_v25  ;;  %4293 = vmatprep.subr.bf16.mxu0 %v4292_v62  ;;  %v1540_v25 = vld [vmem:[#allocation9 + $0x718] sm:$0xff] }
 0x551   :  { %4793 = vmatprep.subr.bf16.mxu1 %v4280_v27  ;;  %v4314_v27 = vpack.c.bf16 %v1535_v47, %v1533_v13  ;;  %v4316_v26 = vpack.c.bf16 %v1540_v25, %v1538_v23  ;;  %v1663_v13 = vld [vmem:[#allocation9 + $0x838] sm:$0xff]  ;;  %v1573_v25 = vrot.slane %v6612_v41, %v6571_v8  ;;  %v1666_v41 = vld [vmem:[#allocation9 + $0x850] sm:$0xff] }
 0x552   :  { %v6624_v47 = vld [vmem:[#allocation2 + $0x4] ss:$8 sm:$0x3] }
 0x553   :  { %4295 = vmatpush1.bf16.msra.mxu0 %v4294_v63 }
 0x554   :  { %4795 = vmatpush1.bf16.msra.mxu1 %v4282_v31  ;;  %4297 = vmatprep.subr.bf16.mxu0 %v4296_v3  ;;  %v1544_v31 = vld [vmem:[#allocation9 + $0x738] sm:$0xff] }
 0x555   :  { %4797 = vmatprep.subr.bf16.mxu1 %v4284_v44  ;;  %v4318_v44 = vpack.c.bf16 %v1539_v28, %v1537_v30  ;;  %v4320_v48 = vpack.c.bf16 %v1544_v31, %v1542_v1  ;;  %v1662_v30 = vld [vmem:[#allocation9 + $0x830] sm:$0xff]  ;;  %v1728_v28 = vrot.slane %v6624_v47, %v6574_v21  ;;  %v1665_v1 = vld [vmem:[#allocation9 + $0x848] sm:$0xff]  ;;  %v1667_v31 = vld [vmem:[#allocation9 + $0x858] sm:$0xff] }
 0x557   :  { %4299 = vmatpush1.bf16.msra.mxu0 %v4298_v19  ;;  %2719 = vmatmul.mubr.f32.vlgmr.msra.gmra.mrb[8].mxu1 %v2647_v29  ;;  %v1562_v29 = vld [vmem:[#allocation9 + $0x7c8] sm:$0xff] }
 0x558   :  { %4799 = vmatpush1.bf16.msra.mxu1 %v4286_v58  ;;  %2868 = vmatprep.mubr.f32.mxu1 %v2801_v53  ;;  %v1548_v58 = vld [vmem:[#allocation9 + $0x758] sm:$0xff]  ;;  %v1561_v53 = vld [vmem:[#allocation9 + $0x7c0] sm:$0xff] }
 0x559   :  { %4301 = vmatprep.subr.bf16.mxu0 %v4300_v49  ;;  %4801 = vmatprep.subr.bf16.mxu1 %v4288_v4  ;;  %v4324_v4 = vpack.c.bf16 %v1548_v58, %v1546_v2  ;;  %v1671_v2 = vld [vmem:[#allocation9 + $0x878] sm:$0xff]  ;;  %v4358_v58 = vpack.c.bf16 %v1666_v41, %v1664_v43  ;;  %v1702_v43 = vld [vmem:[#allocation9 + $0x970] sm:$0xff]  ;;  %v1705_v41 = vld [vmem:[#allocation9 + $0x988] sm:$0xff] }
 0x55b   :  { %4303 = vmatpush1.bf16.msra.mxu0 %v4302_v5 }
 0x55c   :  { %4803 = vmatpush1.bf16.msra.mxu1 %v4290_v60  ;;  %4305 = vmatprep.subr.bf16.mxu0 %v4304_v22  ;;  %v4328_v60 = vpack.c.bf16 %v1552_v14, %v1550_v12  ;;  %v1675_v12 = vld [vmem:[#allocation9 + $0x898] sm:$0xff] }
 0x55d   :  { %4805 = vmatprep.subr.bf16.mxu1 %v4292_v62  ;;  %v1549_v62 = vld [vmem:[#allocation9 + $0x760] sm:$0xff] }
 0x55e   :  { %v4330_v59 = vpack.c.bf16 %v1551_v55, %v1549_v62  ;;  %v1674_v62 = vld [vmem:[#allocation9 + $0x890] sm:$0xff]  ;;  %v2797_v55 = vrot.slane %v6618_v0, %v6571_v8 }
 0x55f   :  { %4307 = vmatpush1.bf16.msra.mxu0 %v4306_v35 }
 0x560   :  { %4807 = vmatpush1.bf16.msra.mxu1 %v4294_v63  ;;  %4309 = vmatprep.subr.bf16.mxu0 %v4308_v36  ;;  %v4332_v63 = vpack.c.bf16 %v1556_v56, %v1554_v52  ;;  %v4364_v52 = vpack.c.bf16 %v1675_v12, %v1673_v46  ;;  %v1677_v56 = vld [vmem:[#allocation9 + $0x8a8] sm:$0xff]  ;;  %v1711_v46 = vld [vmem:[#allocation9 + $0x9b8] sm:$0xff] }
 0x561   :  { %4809 = vmatprep.subr.bf16.mxu1 %v4296_v3  ;;  %v1553_v3 = vld [vmem:[#allocation9 + $0x780] sm:$0xff] }
 0x562   :  { %v4334_v15 = vpack.c.bf16 %v1555_v50, %v1553_v3 }
 0x563   :  { %4311 = vmatpush1.bf16.msra.mxu0 %v4310_v16 }
 0x564   :  { %4811 = vmatpush1.bf16.msra.mxu1 %v4298_v19  ;;  %4313 = vmatprep.subr.bf16.mxu0 %v4312_v54  ;;  %v4336_v19 = vpack.c.bf16 %v1560_v45, %v1558_v61  ;;  %v1676_v61 = vld [vmem:[#allocation9 + $0x8a0] sm:$0xff]  ;;  %v1678_v45 = vld [vmem:[#allocation9 + $0x8b0] sm:$0xff] }
 0x565   :  { %4813 = vmatprep.subr.bf16.mxu1 %v4300_v49  ;;  %v1564_v49 = vld [vmem:[#allocation9 + $0x7d8] sm:$0xff]  ;;  %v4370_v0 = vpack.c.bf16 %v1678_v45, %v1676_v61 }
 0x566   :  { %v4340_v34 = vpack.c.bf16 %v1564_v49, %v1562_v29  ;;  %v1682_v29 = vld [vmem:[#allocation9 + $0x8d0] sm:$0xff]  ;;  %v1685_v49 = vld [vmem:[#allocation9 + $0x8e8] sm:$0xff]  ;;  %v1719_v61 = vld [vmem:[#allocation9 + $0x9f8] sm:$0xff] }
 0x567   :  { %4315 = vmatpush1.bf16.msra.mxu0 %v4314_v27 }
 0x568   :  { %4815 = vmatpush1.bf16.msra.mxu1 %v4302_v5  ;;  %4317 = vmatprep.subr.bf16.mxu0 %v4316_v26  ;;  %v1563_v5 = vld [vmem:[#allocation9 + $0x7d0] sm:$0xff] }
 0x569   :  { %4817 = vmatprep.subr.bf16.mxu1 %v4304_v22  ;;  %v1566_v22 = vld [vmem:[#allocation9 + $0x7e8] sm:$0xff]  ;;  %v4342_v33 = vpack.c.bf16 %v1563_v5, %v1561_v53  ;;  %v1684_v5 = vld [vmem:[#allocation9 + $0x8e0] sm:$0xff] }
 0x56a   :  { %v4344_v17 = vpack.c.bf16 %v1568_v39, %v1566_v22  ;;  %v1686_v22 = vld [vmem:[#allocation9 + $0x8f0] sm:$0xff]  ;;  %v1689_v39 = vld [vmem:[#allocation9 + $0x908] sm:$0xff] }
 0x56b   :  { %4319 = vmatpush1.bf16.msra.mxu0 %v4318_v44 }
 0x56c   :  { %4819 = vmatpush1.bf16.msra.mxu1 %v4306_v35  ;;  %4321 = vmatprep.subr.bf16.mxu0 %v4320_v48  ;;  %v1567_v35 = vld [vmem:[#allocation9 + $0x7f0] sm:$0xff] }
 0x56d   :  { %4821 = vmatprep.subr.bf16.mxu1 %v4308_v36  ;;  %v1657_v36 = vld [vmem:[#allocation9 + $0x808] sm:$0xff]  ;;  %v4346_v24 = vpack.c.bf16 %v1567_v35, %v1565_v18  ;;  %v1688_v35 = vld [vmem:[#allocation9 + $0x900] sm:$0xff] }
 0x56e   :  { %v4348_v11 = vpack.c.bf16 %v1659_v20, %v1657_v36  ;;  %v1690_v36 = vld [vmem:[#allocation9 + $0x910] sm:$0xff]  ;;  %v1693_v20 = vld [vmem:[#allocation9 + $0x928] sm:$0xff] }
 0x56f   :  { %4323 = vmatpush1.bf16.msra.mxu0 %v4322_v42 }
 0x570   :  { %4823 = vmatpush1.bf16.msra.mxu1 %v4310_v16  ;;  %4325 = vmatprep.subr.bf16.mxu0 %v4324_v4  ;;  %v1658_v16 = vld [vmem:[#allocation9 + $0x810] sm:$0xff] }
 0x571   :  { %4825 = vmatprep.subr.bf16.mxu1 %v4312_v54  ;;  %v1661_v54 = vld [vmem:[#allocation9 + $0x828] sm:$0xff]  ;;  %v4350_v23 = vpack.c.bf16 %v1658_v16, %v1656_v7  ;;  %v1692_v16 = vld [vmem:[#allocation9 + $0x920] sm:$0xff] }
 0x573   :  { %4327 = vmatpush1.bf16.msra.mxu0 %v4326_v37 }
 0x574   :  { %4827 = vmatpush1.bf16.msra.mxu1 %v4314_v27  ;;  %4329 = vmatprep.subr.bf16.mxu0 %v4328_v60  ;;  %v4352_v27 = vpack.c.bf16 %v1663_v13, %v1661_v54  ;;  %v1694_v54 = vld [vmem:[#allocation9 + $0x930] sm:$0xff]  ;;  %v1697_v13 = vld [vmem:[#allocation9 + $0x948] sm:$0xff] }
 0x575   :  { %4829 = vmatprep.subr.bf16.mxu1 %v4316_v26  ;;  %v1660_v26 = vld [vmem:[#allocation9 + $0x820] sm:$0xff] }
 0x577   :  { %4331 = vmatpush1.bf16.msra.mxu0 %v4330_v59 }
 0x578   :  { %4831 = vmatpush1.bf16.msra.mxu1 %v4318_v44  ;;  %4333 = vmatprep.subr.bf16.mxu0 %v4332_v63  ;;  %v4354_v44 = vpack.c.bf16 %v1662_v30, %v1660_v26  ;;  %v1696_v26 = vld [vmem:[#allocation9 + $0x940] sm:$0xff]  ;;  %v1698_v30 = vld [vmem:[#allocation9 + $0x950] sm:$0xff] }
 0x579   :  { %4833 = vmatprep.subr.bf16.mxu1 %v4320_v48  ;;  %v4356_v48 = vpack.c.bf16 %v1667_v31, %v1665_v1  ;;  %v1703_v1 = vld [vmem:[#allocation9 + $0x978] sm:$0xff]  ;;  %v4390_v31 = vpack.c.bf16 %v1698_v30, %v1696_v26  ;;  %v1821_v26 = vld [vmem:[#allocation9 + $0xa70] sm:$0xff]  ;;  %v1824_v30 = vld [vmem:[#allocation9 + $0xa88] sm:$0xff] }
 0x57b   :  { %4335 = vmatpush1.bf16.msra.mxu0 %v4334_v15 }
 0x57c   :  { %4835 = vmatpush1.bf16.msra.mxu1 %v4322_v42  ;;  %4337 = vmatprep.subr.bf16.mxu0 %v4336_v19  ;;  %v4360_v42 = vpack.c.bf16 %v1671_v2, %v1669_v38  ;;  %v1707_v38 = vld [vmem:[#allocation9 + $0x998] sm:$0xff] }
 0x57d   :  { %4837 = vmatprep.subr.bf16.mxu1 %v4324_v4  ;;  %v1668_v4 = vld [vmem:[#allocation9 + $0x860] sm:$0xff] }
 0x57e   :  { %v4362_v14 = vpack.c.bf16 %v1670_v9, %v1668_v4  ;;  %v1706_v4 = vld [vmem:[#allocation9 + $0x990] sm:$0xff]  ;;  %v1709_v9 = vld [vmem:[#allocation9 + $0x9a8] sm:$0xff] }
 0x57f   :  { %4339 = vmatpush1.bf16.msra.mxu0 %v4338_v32 }
 0x580   :  { %4839 = vmatpush1.bf16.msra.mxu1 %v4326_v37  ;;  %4341 = vmatprep.subr.bf16.mxu0 %v4340_v34  ;;  %v6630_v37 = vld [vmem:[#allocation2 + $0x1c] ss:$8 sm:$0x3] }
 0x581   :  { %4841 = vmatprep.subr.bf16.mxu1 %v4328_v60  ;;  %v1672_v60 = vld [vmem:[#allocation9 + $0x880] sm:$0xff] }
 0x582   :  { %v4366_v3 = vpack.c.bf16 %v1674_v62, %v1672_v60  ;;  %v1708_v60 = vld [vmem:[#allocation9 + $0x9a0] sm:$0xff]  ;;  %v1710_v62 = vld [vmem:[#allocation9 + $0x9b0] sm:$0xff] }
 0x583   :  { %4343 = vmatpush1.bf16.msra.mxu0 %v4342_v33 }
 0x584   :  { %4843 = vmatpush1.bf16.msra.mxu1 %v4330_v59  ;;  %4345 = vmatprep.subr.bf16.mxu0 %v4344_v17  ;;  %v1679_v59 = vld [vmem:[#allocation9 + $0x8b8] sm:$0xff] }
 0x585   :  { %4845 = vmatprep.subr.bf16.mxu1 %v4332_v63  ;;  %v2951_v63 = vrot.slane %v6630_v37, %v6574_v21  ;;  %v4368_v50 = vpack.c.bf16 %v1679_v59, %v1677_v56  ;;  %v4402_v56 = vpack.c.bf16 %v1710_v62, %v1708_v60  ;;  %v1831_v62 = vld [vmem:[#allocation9 + $0xac0] sm:$0xff] }
 0x587   :  { %4347 = vmatpush1.bf16.msra.mxu0 %v4346_v24 }
 0x588   :  { %4847 = vmatpush1.bf16.msra.mxu1 %v4334_v15  ;;  %4349 = vmatprep.subr.bf16.mxu0 %v4348_v11  ;;  %v1681_v15 = vld [vmem:[#allocation9 + $0x8c8] sm:$0xff] }
 0x589   :  { %4849 = vmatprep.subr.bf16.mxu1 %v4336_v19  ;;  %v1683_v19 = vld [vmem:[#allocation9 + $0x8d8] sm:$0xff] }
 0x58a   :  { %1645 = vmatmul.mubr.f32.vlgmr.msra.gmra.mrb[4].mxu0 %v1573_v25  ;;  %v4372_v40 = vpack.c.bf16 %v1683_v19, %v1681_v15  ;;  %v4386_v25 = vpack.c.bf16 %v1694_v54, %v1692_v16  ;;  %v1716_v19 = vld [vmem:[#allocation9 + $0x9e0] sm:$0xff]  ;;  %v1820_v54 = vld [vmem:[#allocation9 + $0xa68] sm:$0xff] }
 0x58b   :  { %4351 = vmatpush1.bf16.msra.mxu0 %v4350_v23  ;;  %1795 = vmatprep.mubr.f32.mxu0 %v1728_v28  ;;  %v1701_v28 = vld [vmem:[#allocation9 + $0x968] sm:$0xff]  ;;  %v1815_v16 = vld [vmem:[#allocation9 + $0xa40] sm:$0xff] }
 0x58c   :  { %4851 = vmatpush1.bf16.msra.mxu1 %v4338_v32  ;;  %4353 = vmatprep.subr.bf16.mxu0 %v4352_v27  ;;  %v1687_v32 = vld [vmem:[#allocation9 + $0x8f8] sm:$0xff] }
 0x58d   :  { %4853 = vmatprep.subr.bf16.mxu1 %v4340_v34  ;;  %v4374_v34 = vpack.c.bf16 %v1682_v29, %v1680_v51  ;;  %v4376_v53 = vpack.c.bf16 %v1687_v32, %v1685_v49  ;;  %v1810_v51 = vld [vmem:[#allocation9 + $0xa18] sm:$0xff]  ;;  %v1807_v32 = vld [vmem:[#allocation9 + $0xa00] sm:$0xff] }
 0x58f   :  { %4355 = vmatpush1.bf16.msra.mxu0 %v4354_v44 }
 0x590   :  { %4855 = vmatpush1.bf16.msra.mxu1 %v4342_v33  ;;  %4357 = vmatprep.subr.bf16.mxu0 %v4356_v48  ;;  %v1691_v33 = vld [vmem:[#allocation9 + $0x918] sm:$0xff] }
 0x591   :  { %4857 = vmatprep.subr.bf16.mxu1 %v4344_v17  ;;  %v4378_v17 = vpack.c.bf16 %v1686_v22, %v1684_v5  ;;  %v4380_v18 = vpack.c.bf16 %v1691_v33, %v1689_v39  ;;  %v1814_v5 = vld [vmem:[#allocation9 + $0xa38] sm:$0xff]  ;;  %v1724_v33 = vrot.slane %v6624_v47, %v6571_v8  ;;  %v1817_v47 = vld [vmem:[#allocation9 + $0xa50] sm:$0xff] }
 0x592   :  { %v6636_v22 = vld [vmem:[#allocation2 + $0x5] ss:$8 sm:$0x3] }
 0x593   :  { %4359 = vmatpush1.bf16.msra.mxu0 %v4358_v58 }
 0x594   :  { %4859 = vmatpush1.bf16.msra.mxu1 %v4346_v24  ;;  %4361 = vmatprep.subr.bf16.mxu0 %v4360_v42  ;;  %v1695_v24 = vld [vmem:[#allocation9 + $0x938] sm:$0xff] }
 0x595   :  { %4861 = vmatprep.subr.bf16.mxu1 %v4348_v11  ;;  %v4382_v11 = vpack.c.bf16 %v1690_v36, %v1688_v35  ;;  %v4384_v7 = vpack.c.bf16 %v1695_v24, %v1693_v20  ;;  %v1813_v35 = vld [vmem:[#allocation9 + $0xa30] sm:$0xff]  ;;  %v1879_v36 = vrot.slane %v6636_v22, %v6574_v21  ;;  %v1816_v20 = vld [vmem:[#allocation9 + $0xa48] sm:$0xff]  ;;  %v1818_v24 = vld [vmem:[#allocation9 + $0xa58] sm:$0xff] }
 0x597   :  { %4363 = vmatpush1.bf16.msra.mxu0 %v4362_v14  ;;  %2869 = vmatmul.mubr.f32.vlgmr.msra.gmra.mrb[8].mxu1 %v2797_v55  ;;  %v1713_v55 = vld [vmem:[#allocation9 + $0x9c8] sm:$0xff] }
 0x598   :  { %4863 = vmatpush1.bf16.msra.mxu1 %v4350_v23  ;;  %3018 = vmatprep.mubr.f32.mxu1 %v2951_v63  ;;  %v1699_v23 = vld [vmem:[#allocation9 + $0x958] sm:$0xff]  ;;  %v1712_v63 = vld [vmem:[#allocation9 + $0x9c0] sm:$0xff] }
 0x599   :  { %4365 = vmatprep.subr.bf16.mxu0 %v4364_v52  ;;  %4865 = vmatprep.subr.bf16.mxu1 %v4352_v27  ;;  %v4388_v27 = vpack.c.bf16 %v1699_v23, %v1697_v13  ;;  %v1822_v13 = vld [vmem:[#allocation9 + $0xa78] sm:$0xff]  ;;  %v4422_v23 = vpack.c.bf16 %v1817_v47, %v1815_v16  ;;  %v1853_v16 = vld [vmem:[#allocation9 + $0xb70] sm:$0xff]  ;;  %v1856_v47 = vld [vmem:[#allocation9 + $0xb88] sm:$0xff] }
 0x59b   :  { %4367 = vmatpush1.bf16.msra.mxu0 %v4366_v3 }
 0x59c   :  { %4867 = vmatpush1.bf16.msra.mxu1 %v4354_v44  ;;  %4369 = vmatprep.subr.bf16.mxu0 %v4368_v50  ;;  %v4392_v44 = vpack.c.bf16 %v1703_v1, %v1701_v28  ;;  %v1826_v28 = vld [vmem:[#allocation9 + $0xa98] sm:$0xff] }
 0x59d   :  { %4869 = vmatprep.subr.bf16.mxu1 %v4356_v48  ;;  %v1700_v48 = vld [vmem:[#allocation9 + $0x960] sm:$0xff] }
 0x59e   :  { %v4394_v2 = vpack.c.bf16 %v1702_v43, %v1700_v48  ;;  %v1825_v48 = vld [vmem:[#allocation9 + $0xa90] sm:$0xff]  ;;  %v2947_v43 = vrot.slane %v6630_v37, %v6571_v8 }
 0x59f   :  { %4371 = vmatpush1.bf16.msra.mxu0 %v4370_v0 }
 0x5a0   :  { %4871 = vmatpush1.bf16.msra.mxu1 %v4358_v58  ;;  %4373 = vmatprep.subr.bf16.mxu0 %v4372_v40  ;;  %v4396_v58 = vpack.c.bf16 %v1707_v38, %v1705_v41  ;;  %v4428_v41 = vpack.c.bf16 %v1826_v28, %v1824_v30  ;;  %v1828_v38 = vld [vmem:[#allocation9 + $0xaa8] sm:$0xff]  ;;  %v1862_v30 = vld [vmem:[#allocation9 + $0xbb8] sm:$0xff] }
 0x5a1   :  { %4873 = vmatprep.subr.bf16.mxu1 %v4360_v42  ;;  %v1704_v42 = vld [vmem:[#allocation9 + $0x980] sm:$0xff] }
 0x5a2   :  { %v4398_v12 = vpack.c.bf16 %v1706_v4, %v1704_v42 }
 0x5a3   :  { %4375 = vmatpush1.bf16.msra.mxu0 %v4374_v34 }
 0x5a4   :  { %4875 = vmatpush1.bf16.msra.mxu1 %v4362_v14  ;;  %4377 = vmatprep.subr.bf16.mxu0 %v4376_v53  ;;  %v4400_v14 = vpack.c.bf16 %v1711_v46, %v1709_v9  ;;  %v1827_v9 = vld [vmem:[#allocation9 + $0xaa0] sm:$0xff]  ;;  %v1829_v46 = vld [vmem:[#allocation9 + $0xab0] sm:$0xff] }
 0x5a5   :  { %4877 = vmatprep.subr.bf16.mxu1 %v4364_v52  ;;  %v1715_v52 = vld [vmem:[#allocation9 + $0x9d8] sm:$0xff]  ;;  %v4434_v37 = vpack.c.bf16 %v1829_v46, %v1827_v9 }
 0x5a6   :  { %v4404_v59 = vpack.c.bf16 %v1715_v52, %v1713_v55  ;;  %v1833_v55 = vld [vmem:[#allocation9 + $0xad0] sm:$0xff]  ;;  %v1836_v52 = vld [vmem:[#allocation9 + $0xae8] sm:$0xff]  ;;  %v1870_v9 = vld [vmem:[#allocation9 + $0xbf8] sm:$0xff] }
 0x5a7   :  { %4379 = vmatpush1.bf16.msra.mxu0 %v4378_v17 }
 0x5a8   :  { %4879 = vmatpush1.bf16.msra.mxu1 %v4366_v3  ;;  %4381 = vmatprep.subr.bf16.mxu0 %v4380_v18  ;;  %v1714_v3 = vld [vmem:[#allocation9 + $0x9d0] sm:$0xff] }
 0x5a9   :  { %4881 = vmatprep.subr.bf16.mxu1 %v4368_v50  ;;  %v1717_v50 = vld [vmem:[#allocation9 + $0x9e8] sm:$0xff]  ;;  %v4406_v45 = vpack.c.bf16 %v1714_v3, %v1712_v63  ;;  %v1835_v3 = vld [vmem:[#allocation9 + $0xae0] sm:$0xff] }
 0x5aa   :  { %v4408_v15 = vpack.c.bf16 %v1719_v61, %v1717_v50  ;;  %v1837_v50 = vld [vmem:[#allocation9 + $0xaf0] sm:$0xff]  ;;  %v1840_v61 = vld [vmem:[#allocation9 + $0xb08] sm:$0xff] }
 0x5ab   :  { %4383 = vmatpush1.bf16.msra.mxu0 %v4382_v11 }
 0x5ac   :  { %4883 = vmatpush1.bf16.msra.mxu1 %v4370_v0  ;;  %4385 = vmatprep.subr.bf16.mxu0 %v4384_v7  ;;  %v1718_v0 = vld [vmem:[#allocation9 + $0x9f0] sm:$0xff] }
 0x5ad   :  { %4885 = vmatprep.subr.bf16.mxu1 %v4372_v40  ;;  %v1808_v40 = vld [vmem:[#allocation9 + $0xa08] sm:$0xff]  ;;  %v4410_v29 = vpack.c.bf16 %v1718_v0, %v1716_v19  ;;  %v1839_v0 = vld [vmem:[#allocation9 + $0xb00] sm:$0xff] }
 0x5ae   :  { %v4412_v49 = vpack.c.bf16 %v1810_v51, %v1808_v40  ;;  %v1841_v40 = vld [vmem:[#allocation9 + $0xb10] sm:$0xff]  ;;  %v1844_v51 = vld [vmem:[#allocation9 + $0xb28] sm:$0xff] }
 0x5af   :  { %4387 = vmatpush1.bf16.msra.mxu0 %v4386_v25 }
 0x5b0   :  { %4887 = vmatpush1.bf16.msra.mxu1 %v4374_v34  ;;  %4389 = vmatprep.subr.bf16.mxu0 %v4388_v27  ;;  %v1809_v34 = vld [vmem:[#allocation9 + $0xa10] sm:$0xff] }
 0x5b1   :  { %4889 = vmatprep.subr.bf16.mxu1 %v4376_v53  ;;  %v1812_v53 = vld [vmem:[#allocation9 + $0xa28] sm:$0xff]  ;;  %v4414_v39 = vpack.c.bf16 %v1809_v34, %v1807_v32  ;;  %v1843_v34 = vld [vmem:[#allocation9 + $0xb20] sm:$0xff] }
 0x5b3   :  { %4391 = vmatpush1.bf16.msra.mxu0 %v4390_v31 }
 0x5b4   :  { %4891 = vmatpush1.bf16.msra.mxu1 %v4378_v17  ;;  %4393 = vmatprep.subr.bf16.mxu0 %v4392_v44  ;;  %v4416_v17 = vpack.c.bf16 %v1814_v5, %v1812_v53  ;;  %v1845_v53 = vld [vmem:[#allocation9 + $0xb30] sm:$0xff]  ;;  %v1848_v5 = vld [vmem:[#allocation9 + $0xb48] sm:$0xff] }
 0x5b5   :  { %4893 = vmatprep.subr.bf16.mxu1 %v4380_v18  ;;  %v1811_v18 = vld [vmem:[#allocation9 + $0xa20] sm:$0xff] }
 0x5b7   :  { %4395 = vmatpush1.bf16.msra.mxu0 %v4394_v2 }
 0x5b8   :  { %4895 = vmatpush1.bf16.msra.mxu1 %v4382_v11  ;;  %4397 = vmatprep.subr.bf16.mxu0 %v4396_v58  ;;  %v4418_v11 = vpack.c.bf16 %v1813_v35, %v1811_v18  ;;  %v1847_v18 = vld [vmem:[#allocation9 + $0xb40] sm:$0xff]  ;;  %v1849_v35 = vld [vmem:[#allocation9 + $0xb50] sm:$0xff] }
 0x5b9   :  { %4897 = vmatprep.subr.bf16.mxu1 %v4384_v7  ;;  %v4420_v7 = vpack.c.bf16 %v1818_v24, %v1816_v20  ;;  %v1854_v20 = vld [vmem:[#allocation9 + $0xb78] sm:$0xff]  ;;  %v4454_v24 = vpack.c.bf16 %v1849_v35, %v1847_v18  ;;  %v1972_v18 = vld [vmem:[#allocation9 + $0xc70] sm:$0xff]  ;;  %v1975_v35 = vld [vmem:[#allocation9 + $0xc88] sm:$0xff] }
 0x5bb   :  { %4399 = vmatpush1.bf16.msra.mxu0 %v4398_v12 }
 0x5bc   :  { %4899 = vmatpush1.bf16.msra.mxu1 %v4386_v25  ;;  %4401 = vmatprep.subr.bf16.mxu0 %v4400_v14  ;;  %v4424_v25 = vpack.c.bf16 %v1822_v13, %v1820_v54  ;;  %v1858_v54 = vld [vmem:[#allocation9 + $0xb98] sm:$0xff] }
 0x5bd   :  { %4901 = vmatprep.subr.bf16.mxu1 %v4388_v27  ;;  %v1819_v27 = vld [vmem:[#allocation9 + $0xa60] sm:$0xff] }
 0x5be   :  { %v4426_v1 = vpack.c.bf16 %v1821_v26, %v1819_v27  ;;  %v1857_v27 = vld [vmem:[#allocation9 + $0xb90] sm:$0xff]  ;;  %v1860_v26 = vld [vmem:[#allocation9 + $0xba8] sm:$0xff] }
 0x5bf   :  { %4403 = vmatpush1.bf16.msra.mxu0 %v4402_v56 }
 0x5c0   :  { %4903 = vmatpush1.bf16.msra.mxu1 %v4390_v31  ;;  %4405 = vmatprep.subr.bf16.mxu0 %v4404_v59  ;;  %v6642_v31 = vld [vmem:[#allocation2 + $0x1d] ss:$8 sm:$0x3] }
 0x5c1   :  { %4905 = vmatprep.subr.bf16.mxu1 %v4392_v44  ;;  %v1823_v44 = vld [vmem:[#allocation9 + $0xa80] sm:$0xff] }
 0x5c2   :  { %v4430_v42 = vpack.c.bf16 %v1825_v48, %v1823_v44  ;;  %v1859_v44 = vld [vmem:[#allocation9 + $0xba0] sm:$0xff]  ;;  %v1861_v48 = vld [vmem:[#allocation9 + $0xbb0] sm:$0xff] }
 0x5c3   :  { %4407 = vmatpush1.bf16.msra.mxu0 %v4406_v45 }
 0x5c4   :  { %4907 = vmatpush1.bf16.msra.mxu1 %v4394_v2  ;;  %4409 = vmatprep.subr.bf16.mxu0 %v4408_v15  ;;  %v1830_v2 = vld [vmem:[#allocation9 + $0xab8] sm:$0xff] }
 0x5c5   :  { %4909 = vmatprep.subr.bf16.mxu1 %v4396_v58  ;;  %v3101_v58 = vrot.slane %v6642_v31, %v6574_v21  ;;  %v4432_v4 = vpack.c.bf16 %v1830_v2, %v1828_v38  ;;  %v4466_v38 = vpack.c.bf16 %v1861_v48, %v1859_v44  ;;  %v1982_v48 = vld [vmem:[#allocation9 + $0xcc0] sm:$0xff] }
 0x5c7   :  { %4411 = vmatpush1.bf16.msra.mxu0 %v4410_v29 }
 0x5c8   :  { %4911 = vmatpush1.bf16.msra.mxu1 %v4398_v12  ;;  %4413 = vmatprep.subr.bf16.mxu0 %v4412_v49  ;;  %v1832_v12 = vld [vmem:[#allocation9 + $0xac8] sm:$0xff] }
 0x5c9   :  { %4913 = vmatprep.subr.bf16.mxu1 %v4400_v14  ;;  %v1834_v14 = vld [vmem:[#allocation9 + $0xad8] sm:$0xff] }
 0x5ca   :  { %1796 = vmatmul.mubr.f32.vlgmr.msra.gmra.mrb[4].mxu0 %v1724_v33  ;;  %v4436_v60 = vpack.c.bf16 %v1834_v14, %v1832_v12  ;;  %v4450_v33 = vpack.c.bf16 %v1845_v53, %v1843_v34  ;;  %v1867_v14 = vld [vmem:[#allocation9 + $0xbe0] sm:$0xff]  ;;  %v1971_v53 = vld [vmem:[#allocation9 + $0xc68] sm:$0xff] }
 0x5cb   :  { %4415 = vmatpush1.bf16.msra.mxu0 %v4414_v39  ;;  %1946 = vmatprep.mubr.f32.mxu0 %v1879_v36  ;;  %v1852_v36 = vld [vmem:[#allocation9 + $0xb68] sm:$0xff]  ;;  %v1966_v34 = vld [vmem:[#allocation9 + $0xc40] sm:$0xff] }
 0x5cc   :  { %4915 = vmatpush1.bf16.msra.mxu1 %v4402_v56  ;;  %4417 = vmatprep.subr.bf16.mxu0 %v4416_v17  ;;  %v1838_v56 = vld [vmem:[#allocation9 + $0xaf8] sm:$0xff] }
 0x5cd   :  { %4917 = vmatprep.subr.bf16.mxu1 %v4404_v59  ;;  %v4438_v59 = vpack.c.bf16 %v1833_v55, %v1831_v62  ;;  %v4440_v63 = vpack.c.bf16 %v1838_v56, %v1836_v52  ;;  %v1961_v62 = vld [vmem:[#allocation9 + $0xc18] sm:$0xff]  ;;  %v1958_v56 = vld [vmem:[#allocation9 + $0xc00] sm:$0xff] }
 0x5cf   :  { %4419 = vmatpush1.bf16.msra.mxu0 %v4418_v11 }
 0x5d0   :  { %4919 = vmatpush1.bf16.msra.mxu1 %v4406_v45  ;;  %4421 = vmatprep.subr.bf16.mxu0 %v4420_v7  ;;  %v1842_v45 = vld [vmem:[#allocation9 + $0xb18] sm:$0xff] }
 0x5d1   :  { %4921 = vmatprep.subr.bf16.mxu1 %v4408_v15  ;;  %v4442_v15 = vpack.c.bf16 %v1837_v50, %v1835_v3  ;;  %v4444_v19 = vpack.c.bf16 %v1842_v45, %v1840_v61  ;;  %v1965_v3 = vld [vmem:[#allocation9 + $0xc38] sm:$0xff]  ;;  %v1875_v45 = vrot.slane %v6636_v22, %v6571_v8  ;;  %v1968_v22 = vld [vmem:[#allocation9 + $0xc50] sm:$0xff] }
 0x5d2   :  { %v6648_v50 = vld [vmem:[#allocation2 + $0x6] ss:$8 sm:$0x3] }
 0x5d3   :  { %4423 = vmatpush1.bf16.msra.mxu0 %v4422_v23 }
 0x5d4   :  { %4923 = vmatpush1.bf16.msra.mxu1 %v4410_v29  ;;  %4425 = vmatprep.subr.bf16.mxu0 %v4424_v25  ;;  %v1846_v29 = vld [vmem:[#allocation9 + $0xb38] sm:$0xff] }
 0x5d5   :  { %4925 = vmatprep.subr.bf16.mxu1 %v4412_v49  ;;  %v4446_v49 = vpack.c.bf16 %v1841_v40, %v1839_v0  ;;  %v4448_v32 = vpack.c.bf16 %v1846_v29, %v1844_v51  ;;  %v1964_v0 = vld [vmem:[#allocation9 + $0xc30] sm:$0xff]  ;;  %v2030_v40 = vrot.slane %v6648_v50, %v6574_v21  ;;  %v1967_v51 = vld [vmem:[#allocation9 + $0xc48] sm:$0xff]  ;;  %v1969_v29 = vld [vmem:[#allocation9 + $0xc58] sm:$0xff] }
 0x5d7   :  { %4427 = vmatpush1.bf16.msra.mxu0 %v4426_v1  ;;  %3019 = vmatmul.mubr.f32.vlgmr.msra.gmra.mrb[8].mxu1 %v2947_v43  ;;  %v1864_v43 = vld [vmem:[#allocation9 + $0xbc8] sm:$0xff] }
 0x5d8   :  { %4927 = vmatpush1.bf16.msra.mxu1 %v4414_v39  ;;  %3168 = vmatprep.mubr.f32.mxu1 %v3101_v58  ;;  %v1850_v39 = vld [vmem:[#allocation9 + $0xb58] sm:$0xff]  ;;  %v1863_v58 = vld [vmem:[#allocation9 + $0xbc0] sm:$0xff] }
 0x5d9   :  { %4429 = vmatprep.subr.bf16.mxu0 %v4428_v41  ;;  %4929 = vmatprep.subr.bf16.mxu1 %v4416_v17  ;;  %v4452_v17 = vpack.c.bf16 %v1850_v39, %v1848_v5  ;;  %v1973_v5 = vld [vmem:[#allocation9 + $0xc78] sm:$0xff]  ;;  %v4486_v39 = vpack.c.bf16 %v1968_v22, %v1966_v34  ;;  %v2004_v34 = vld [vmem:[#allocation9 + $0xd70] sm:$0xff]  ;;  %v2007_v22 = vld [vmem:[#allocation9 + $0xd88] sm:$0xff] }
 0x5db   :  { %4431 = vmatpush1.bf16.msra.mxu0 %v4430_v42 }
 0x5dc   :  { %4931 = vmatpush1.bf16.msra.mxu1 %v4418_v11  ;;  %4433 = vmatprep.subr.bf16.mxu0 %v4432_v4  ;;  %v4456_v11 = vpack.c.bf16 %v1854_v20, %v1852_v36  ;;  %v1977_v36 = vld [vmem:[#allocation9 + $0xc98] sm:$0xff] }
 0x5dd   :  { %4933 = vmatprep.subr.bf16.mxu1 %v4420_v7  ;;  %v1851_v7 = vld [vmem:[#allocation9 + $0xb60] sm:$0xff] }
 0x5de   :  { %v4458_v13 = vpack.c.bf16 %v1853_v16, %v1851_v7  ;;  %v1976_v7 = vld [vmem:[#allocation9 + $0xc90] sm:$0xff]  ;;  %v3097_v16 = vrot.slane %v6642_v31, %v6571_v8 }
 0x5df   :  { %4435 = vmatpush1.bf16.msra.mxu0 %v4434_v37 }
 0x5e0   :  { %4935 = vmatpush1.bf16.msra.mxu1 %v4422_v23  ;;  %4437 = vmatprep.subr.bf16.mxu0 %v4436_v60  ;;  %v4460_v23 = vpack.c.bf16 %v1858_v54, %v1856_v47  ;;  %v4492_v47 = vpack.c.bf16 %v1977_v36, %v1975_v35  ;;  %v1979_v54 = vld [vmem:[#allocation9 + $0xca8] sm:$0xff]  ;;  %v2013_v35 = vld [vmem:[#allocation9 + $0xdb8] sm:$0xff] }
 0x5e1   :  { %4937 = vmatprep.subr.bf16.mxu1 %v4424_v25  ;;  %v1855_v25 = vld [vmem:[#allocation9 + $0xb80] sm:$0xff] }
 0x5e2   :  { %v4462_v28 = vpack.c.bf16 %v1857_v27, %v1855_v25 }
 0x5e3   :  { %4439 = vmatpush1.bf16.msra.mxu0 %v4438_v59 }
 0x5e4   :  { %4939 = vmatpush1.bf16.msra.mxu1 %v4426_v1  ;;  %4441 = vmatprep.subr.bf16.mxu0 %v4440_v63  ;;  %v4464_v1 = vpack.c.bf16 %v1862_v30, %v1860_v26  ;;  %v1978_v26 = vld [vmem:[#allocation9 + $0xca0] sm:$0xff]  ;;  %v1980_v30 = vld [vmem:[#allocation9 + $0xcb0] sm:$0xff] }
 0x5e5   :  { %4941 = vmatprep.subr.bf16.mxu1 %v4428_v41  ;;  %v1866_v41 = vld [vmem:[#allocation9 + $0xbd8] sm:$0xff]  ;;  %v4498_v31 = vpack.c.bf16 %v1980_v30, %v1978_v26 }
 0x5e6   :  { %v4468_v2 = vpack.c.bf16 %v1866_v41, %v1864_v43  ;;  %v1984_v43 = vld [vmem:[#allocation9 + $0xcd0] sm:$0xff]  ;;  %v1987_v41 = vld [vmem:[#allocation9 + $0xce8] sm:$0xff]  ;;  %v2021_v26 = vld [vmem:[#allocation9 + $0xdf8] sm:$0xff] }
 0x5e7   :  { %4443 = vmatpush1.bf16.msra.mxu0 %v4442_v15 }
 0x5e8   :  { %4943 = vmatpush1.bf16.msra.mxu1 %v4430_v42  ;;  %4445 = vmatprep.subr.bf16.mxu0 %v4444_v19  ;;  %v1865_v42 = vld [vmem:[#allocation9 + $0xbd0] sm:$0xff] }
 0x5e9   :  { %4945 = vmatprep.subr.bf16.mxu1 %v4432_v4  ;;  %v1868_v4 = vld [vmem:[#allocation9 + $0xbe8] sm:$0xff]  ;;  %v4470_v46 = vpack.c.bf16 %v1865_v42, %v1863_v58  ;;  %v1986_v42 = vld [vmem:[#allocation9 + $0xce0] sm:$0xff] }
 0x5ea   :  { %v4472_v12 = vpack.c.bf16 %v1870_v9, %v1868_v4  ;;  %v1988_v4 = vld [vmem:[#allocation9 + $0xcf0] sm:$0xff]  ;;  %v1991_v9 = vld [vmem:[#allocation9 + $0xd08] sm:$0xff] }
 0x5eb   :  { %4447 = vmatpush1.bf16.msra.mxu0 %v4446_v49 }
 0x5ec   :  { %4947 = vmatpush1.bf16.msra.mxu1 %v4434_v37  ;;  %4449 = vmatprep.subr.bf16.mxu0 %v4448_v32  ;;  %v1869_v37 = vld [vmem:[#allocation9 + $0xbf0] sm:$0xff] }
 0x5ed   :  { %4949 = vmatprep.subr.bf16.mxu1 %v4436_v60  ;;  %v1959_v60 = vld [vmem:[#allocation9 + $0xc08] sm:$0xff]  ;;  %v4474_v55 = vpack.c.bf16 %v1869_v37, %v1867_v14  ;;  %v1990_v37 = vld [vmem:[#allocation9 + $0xd00] sm:$0xff] }
 0x5ee   :  { %v4476_v52 = vpack.c.bf16 %v1961_v62, %v1959_v60  ;;  %v1992_v60 = vld [vmem:[#allocation9 + $0xd10] sm:$0xff]  ;;  %v1995_v62 = vld [vmem:[#allocation9 + $0xd28] sm:$0xff] }
 0x5ef   :  { %4451 = vmatpush1.bf16.msra.mxu0 %v4450_v33 }
 0x5f0   :  { %4951 = vmatpush1.bf16.msra.mxu1 %v4438_v59  ;;  %4453 = vmatprep.subr.bf16.mxu0 %v4452_v17  ;;  %v1960_v59 = vld [vmem:[#allocation9 + $0xc10] sm:$0xff] }
 0x5f1   :  { %4953 = vmatprep.subr.bf16.mxu1 %v4440_v63  ;;  %v1963_v63 = vld [vmem:[#allocation9 + $0xc28] sm:$0xff]  ;;  %v4478_v61 = vpack.c.bf16 %v1960_v59, %v1958_v56  ;;  %v1994_v59 = vld [vmem:[#allocation9 + $0xd20] sm:$0xff] }
 0x5f3   :  { %4455 = vmatpush1.bf16.msra.mxu0 %v4454_v24 }
 0x5f4   :  { %4955 = vmatpush1.bf16.msra.mxu1 %v4442_v15  ;;  %4457 = vmatprep.subr.bf16.mxu0 %v4456_v11  ;;  %v4480_v15 = vpack.c.bf16 %v1965_v3, %v1963_v63  ;;  %v1996_v63 = vld [vmem:[#allocation9 + $0xd30] sm:$0xff]  ;;  %v1999_v3 = vld [vmem:[#allocation9 + $0xd48] sm:$0xff] }
 0x5f5   :  { %4957 = vmatprep.subr.bf16.mxu1 %v4444_v19  ;;  %v1962_v19 = vld [vmem:[#allocation9 + $0xc20] sm:$0xff] }
 0x5f7   :  { %4459 = vmatpush1.bf16.msra.mxu0 %v4458_v13 }
 0x5f8   :  { %4959 = vmatpush1.bf16.msra.mxu1 %v4446_v49  ;;  %4461 = vmatprep.subr.bf16.mxu0 %v4460_v23  ;;  %v4482_v49 = vpack.c.bf16 %v1964_v0, %v1962_v19  ;;  %v1998_v19 = vld [vmem:[#allocation9 + $0xd40] sm:$0xff]  ;;  %v2000_v0 = vld [vmem:[#allocation9 + $0xd50] sm:$0xff] }
 0x5f9   :  { %4961 = vmatprep.subr.bf16.mxu1 %v4448_v32  ;;  %v4484_v32 = vpack.c.bf16 %v1969_v29, %v1967_v51  ;;  %v2005_v51 = vld [vmem:[#allocation9 + $0xd78] sm:$0xff]  ;;  %v4518_v29 = vpack.c.bf16 %v2000_v0, %v1998_v19  ;;  %v2123_v19 = vld [vmem:[#allocation9 + $0xe70] sm:$0xff]  ;;  %v2126_v0 = vld [vmem:[#allocation9 + $0xe88] sm:$0xff] }
 0x5fb   :  { %4463 = vmatpush1.bf16.msra.mxu0 %v4462_v28 }
 0x5fc   :  { %4963 = vmatpush1.bf16.msra.mxu1 %v4450_v33  ;;  %4465 = vmatprep.subr.bf16.mxu0 %v4464_v1  ;;  %v4488_v33 = vpack.c.bf16 %v1973_v5, %v1971_v53  ;;  %v2009_v53 = vld [vmem:[#allocation9 + $0xd98] sm:$0xff] }
 0x5fd   :  { %4965 = vmatprep.subr.bf16.mxu1 %v4452_v17  ;;  %v1970_v17 = vld [vmem:[#allocation9 + $0xc60] sm:$0xff] }
 0x5fe   :  { %v4490_v20 = vpack.c.bf16 %v1972_v18, %v1970_v17  ;;  %v2008_v17 = vld [vmem:[#allocation9 + $0xd90] sm:$0xff]  ;;  %v2011_v18 = vld [vmem:[#allocation9 + $0xda8] sm:$0xff] }
 0x5ff   :  { %4467 = vmatpush1.bf16.msra.mxu0 %v4466_v38 }
 0x600   :  { %4967 = vmatpush1.bf16.msra.mxu1 %v4454_v24  ;;  %4469 = vmatprep.subr.bf16.mxu0 %v4468_v2  ;;  %v6654_v24 = vld [vmem:[#allocation2 + $0x1e] ss:$8 sm:$0x3] }
 0x601   :  { %4969 = vmatprep.subr.bf16.mxu1 %v4456_v11  ;;  %v1974_v11 = vld [vmem:[#allocation9 + $0xc80] sm:$0xff] }
 0x602   :  { %v4494_v25 = vpack.c.bf16 %v1976_v7, %v1974_v11  ;;  %v2010_v11 = vld [vmem:[#allocation9 + $0xda0] sm:$0xff]  ;;  %v2012_v7 = vld [vmem:[#allocation9 + $0xdb0] sm:$0xff] }
 0x603   :  { %4471 = vmatpush1.bf16.msra.mxu0 %v4470_v46 }
 0x604   :  { %4971 = vmatpush1.bf16.msra.mxu1 %v4458_v13  ;;  %4473 = vmatprep.subr.bf16.mxu0 %v4472_v12  ;;  %v1981_v13 = vld [vmem:[#allocation9 + $0xcb8] sm:$0xff] }
 0x605   :  { %4973 = vmatprep.subr.bf16.mxu1 %v4460_v23  ;;  %v3251_v23 = vrot.slane %v6654_v24, %v6574_v21  ;;  %v4496_v27 = vpack.c.bf16 %v1981_v13, %v1979_v54  ;;  %v4530_v54 = vpack.c.bf16 %v2012_v7, %v2010_v11  ;;  %v2133_v7 = vld [vmem:[#allocation9 + $0xec0] sm:$0xff] }
 0x607   :  { %4475 = vmatpush1.bf16.msra.mxu0 %v4474_v55 }
 0x608   :  { %4975 = vmatpush1.bf16.msra.mxu1 %v4462_v28  ;;  %4477 = vmatprep.subr.bf16.mxu0 %v4476_v52  ;;  %v1983_v28 = vld [vmem:[#allocation9 + $0xcc8] sm:$0xff] }
 0x609   :  { %4977 = vmatprep.subr.bf16.mxu1 %v4464_v1  ;;  %v1985_v1 = vld [vmem:[#allocation9 + $0xcd8] sm:$0xff] }
 0x60a   :  { %1947 = vmatmul.mubr.f32.vlgmr.msra.gmra.mrb[4].mxu0 %v1875_v45  ;;  %v4500_v44 = vpack.c.bf16 %v1985_v1, %v1983_v28  ;;  %v4514_v45 = vpack.c.bf16 %v1996_v63, %v1994_v59  ;;  %v2018_v1 = vld [vmem:[#allocation9 + $0xde0] sm:$0xff]  ;;  %v2122_v63 = vld [vmem:[#allocation9 + $0xe68] sm:$0xff] }
 0x60b   :  { %4479 = vmatpush1.bf16.msra.mxu0 %v4478_v61  ;;  %2097 = vmatprep.mubr.f32.mxu0 %v2030_v40  ;;  %v2003_v40 = vld [vmem:[#allocation9 + $0xd68] sm:$0xff]  ;;  %v2117_v59 = vld [vmem:[#allocation9 + $0xe40] sm:$0xff] }
 0x60c   :  { %4979 = vmatpush1.bf16.msra.mxu1 %v4466_v38  ;;  %4481 = vmatprep.subr.bf16.mxu0 %v4480_v15  ;;  %v1989_v38 = vld [vmem:[#allocation9 + $0xcf8] sm:$0xff] }
 0x60d   :  { %4981 = vmatprep.subr.bf16.mxu1 %v4468_v2  ;;  %v4502_v2 = vpack.c.bf16 %v1984_v43, %v1982_v48  ;;  %v4504_v58 = vpack.c.bf16 %v1989_v38, %v1987_v41  ;;  %v2112_v48 = vld [vmem:[#allocation9 + $0xe18] sm:$0xff]  ;;  %v2109_v38 = vld [vmem:[#allocation9 + $0xe00] sm:$0xff] }
 0x60f   :  { %4483 = vmatpush1.bf16.msra.mxu0 %v4482_v49 }
 0x610   :  { %4983 = vmatpush1.bf16.msra.mxu1 %v4470_v46  ;;  %4485 = vmatprep.subr.bf16.mxu0 %v4484_v32  ;;  %v1993_v46 = vld [vmem:[#allocation9 + $0xd18] sm:$0xff] }
 0x611   :  { %4985 = vmatprep.subr.bf16.mxu1 %v4472_v12  ;;  %v4506_v12 = vpack.c.bf16 %v1988_v4, %v1986_v42  ;;  %v4508_v14 = vpack.c.bf16 %v1993_v46, %v1991_v9  ;;  %v2116_v42 = vld [vmem:[#allocation9 + $0xe38] sm:$0xff]  ;;  %v2026_v46 = vrot.slane %v6648_v50, %v6571_v8  ;;  %v2119_v50 = vld [vmem:[#allocation9 + $0xe50] sm:$0xff] }
 0x612   :  { %v6660_v4 = vld [vmem:[#allocation2 + $0x7] ss:$8 sm:$0x3] }
 0x613   :  { %4487 = vmatpush1.bf16.msra.mxu0 %v4486_v39 }
 0x614   :  { %4987 = vmatpush1.bf16.msra.mxu1 %v4474_v55  ;;  %4489 = vmatprep.subr.bf16.mxu0 %v4488_v33  ;;  %v1997_v55 = vld [vmem:[#allocation9 + $0xd38] sm:$0xff] }
 0x615   :  { %4989 = vmatprep.subr.bf16.mxu1 %v4476_v52  ;;  %v4510_v52 = vpack.c.bf16 %v1992_v60, %v1990_v37  ;;  %v4512_v56 = vpack.c.bf16 %v1997_v55, %v1995_v62  ;;  %v2115_v37 = vld [vmem:[#allocation9 + $0xe30] sm:$0xff]  ;;  %v2181_v60 = vrot.slane %v6660_v4, %v6574_v21  ;;  %v2118_v62 = vld [vmem:[#allocation9 + $0xe48] sm:$0xff]  ;;  %v2120_v55 = vld [vmem:[#allocation9 + $0xe58] sm:$0xff] }
 0x617   :  { %4491 = vmatpush1.bf16.msra.mxu0 %v4490_v20  ;;  %3169 = vmatmul.mubr.f32.vlgmr.msra.gmra.mrb[8].mxu1 %v3097_v16  ;;  %v2015_v16 = vld [vmem:[#allocation9 + $0xdc8] sm:$0xff] }
 0x618   :  { %4991 = vmatpush1.bf16.msra.mxu1 %v4478_v61  ;;  %3318 = vmatprep.mubr.f32.mxu1 %v3251_v23  ;;  %v2001_v61 = vld [vmem:[#allocation9 + $0xd58] sm:$0xff]  ;;  %v2014_v23 = vld [vmem:[#allocation9 + $0xdc0] sm:$0xff] }
 0x619   :  { %4493 = vmatprep.subr.bf16.mxu0 %v4492_v47  ;;  %4993 = vmatprep.subr.bf16.mxu1 %v4480_v15  ;;  %v4516_v15 = vpack.c.bf16 %v2001_v61, %v1999_v3  ;;  %v2124_v3 = vld [vmem:[#allocation9 + $0xe78] sm:$0xff]  ;;  %v4550_v61 = vpack.c.bf16 %v2119_v50, %v2117_v59  ;;  %v2155_v59 = vld [vmem:[#allocation9 + $0xf70] sm:$0xff]  ;;  %v2158_v50 = vld [vmem:[#allocation9 + $0xf88] sm:$0xff] }
 0x61b   :  { %4495 = vmatpush1.bf16.msra.mxu0 %v4494_v25 }
 0x61c   :  { %4995 = vmatpush1.bf16.msra.mxu1 %v4482_v49  ;;  %4497 = vmatprep.subr.bf16.mxu0 %v4496_v27  ;;  %v4520_v49 = vpack.c.bf16 %v2005_v51, %v2003_v40  ;;  %v2128_v40 = vld [vmem:[#allocation9 + $0xe98] sm:$0xff] }
 0x61d   :  { %4997 = vmatprep.subr.bf16.mxu1 %v4484_v32  ;;  %v2002_v32 = vld [vmem:[#allocation9 + $0xd60] sm:$0xff] }
 0x61e   :  { %v4522_v5 = vpack.c.bf16 %v2004_v34, %v2002_v32  ;;  %v2127_v32 = vld [vmem:[#allocation9 + $0xe90] sm:$0xff]  ;;  %v3247_v34 = vrot.slane %v6654_v24, %v6571_v8 }
 0x61f   :  { %4499 = vmatpush1.bf16.msra.mxu0 %v4498_v31 }
 0x620   :  { %4999 = vmatpush1.bf16.msra.mxu1 %v4486_v39  ;;  %4501 = vmatprep.subr.bf16.mxu0 %v4500_v44  ;;  %v4524_v39 = vpack.c.bf16 %v2009_v53, %v2007_v22  ;;  %v4556_v22 = vpack.c.bf16 %v2128_v40, %v2126_v0  ;;  %v2130_v53 = vld [vmem:[#allocation9 + $0xea8] sm:$0xff]  ;;  %v2164_v0 = vld [vmem:[#allocation9 + $0xfb8] sm:$0xff] }
 0x621   :  { %5001 = vmatprep.subr.bf16.mxu1 %v4488_v33  ;;  %v2006_v33 = vld [vmem:[#allocation9 + $0xd80] sm:$0xff] }
 0x622   :  { %v4526_v36 = vpack.c.bf16 %v2008_v17, %v2006_v33 }
 0x623   :  { %4503 = vmatpush1.bf16.msra.mxu0 %v4502_v2 }
 0x624   :  { %5003 = vmatpush1.bf16.msra.mxu1 %v4490_v20  ;;  %4505 = vmatprep.subr.bf16.mxu0 %v4504_v58  ;;  %v4528_v20 = vpack.c.bf16 %v2013_v35, %v2011_v18  ;;  %v2129_v18 = vld [vmem:[#allocation9 + $0xea0] sm:$0xff]  ;;  %v2131_v35 = vld [vmem:[#allocation9 + $0xeb0] sm:$0xff] }
 0x625   :  { %5005 = vmatprep.subr.bf16.mxu1 %v4492_v47  ;;  %v2017_v47 = vld [vmem:[#allocation9 + $0xdd8] sm:$0xff]  ;;  %v4562_v24 = vpack.c.bf16 %v2131_v35, %v2129_v18 }
 0x626   :  { %v4532_v13 = vpack.c.bf16 %v2017_v47, %v2015_v16  ;;  %v2135_v16 = vld [vmem:[#allocation9 + $0xed0] sm:$0xff]  ;;  %v2138_v47 = vld [vmem:[#allocation9 + $0xee8] sm:$0xff]  ;;  %v2172_v18 = vld [vmem:[#allocation9 + $0xff8] sm:$0xff] }
 0x627   :  { %4507 = vmatpush1.bf16.msra.mxu0 %v4506_v12 }
 0x628   :  { %5007 = vmatpush1.bf16.msra.mxu1 %v4494_v25  ;;  %4509 = vmatprep.subr.bf16.mxu0 %v4508_v14  ;;  %v2016_v25 = vld [vmem:[#allocation9 + $0xdd0] sm:$0xff] }
 0x629   :  { %5009 = vmatprep.subr.bf16.mxu1 %v4496_v27  ;;  %v2019_v27 = vld [vmem:[#allocation9 + $0xde8] sm:$0xff]  ;;  %v4534_v30 = vpack.c.bf16 %v2016_v25, %v2014_v23  ;;  %v2137_v25 = vld [vmem:[#allocation9 + $0xee0] sm:$0xff] }
 0x62a   :  { %v4536_v28 = vpack.c.bf16 %v2021_v26, %v2019_v27  ;;  %v2139_v27 = vld [vmem:[#allocation9 + $0xef0] sm:$0xff]  ;;  %v2142_v26 = vld [vmem:[#allocation9 + $0xf08] sm:$0xff] }
 0x62b   :  { %4511 = vmatpush1.bf16.msra.mxu0 %v4510_v52 }
 0x62c   :  { %5011 = vmatpush1.bf16.msra.mxu1 %v4498_v31  ;;  %4513 = vmatprep.subr.bf16.mxu0 %v4512_v56  ;;  %v2020_v31 = vld [vmem:[#allocation9 + $0xdf0] sm:$0xff] }
 0x62d   :  { %5013 = vmatprep.subr.bf16.mxu1 %v4500_v44  ;;  %v2110_v44 = vld [vmem:[#allocation9 + $0xe08] sm:$0xff]  ;;  %v4538_v43 = vpack.c.bf16 %v2020_v31, %v2018_v1  ;;  %v2141_v31 = vld [vmem:[#allocation9 + $0xf00] sm:$0xff] }
 0x62e   :  { %v4540_v41 = vpack.c.bf16 %v2112_v48, %v2110_v44  ;;  %v2143_v44 = vld [vmem:[#allocation9 + $0xf10] sm:$0xff]  ;;  %v2146_v48 = vld [vmem:[#allocation9 + $0xf28] sm:$0xff] }
 0x62f   :  { %4515 = vmatpush1.bf16.msra.mxu0 %v4514_v45 }
 0x630   :  { %5015 = vmatpush1.bf16.msra.mxu1 %v4502_v2  ;;  %4517 = vmatprep.subr.bf16.mxu0 %v4516_v15  ;;  %v2111_v2 = vld [vmem:[#allocation9 + $0xe10] sm:$0xff] }
 0x631   :  { %5017 = vmatprep.subr.bf16.mxu1 %v4504_v58  ;;  %v2114_v58 = vld [vmem:[#allocation9 + $0xe28] sm:$0xff]  ;;  %v4542_v9 = vpack.c.bf16 %v2111_v2, %v2109_v38  ;;  %v2145_v2 = vld [vmem:[#allocation9 + $0xf20] sm:$0xff] }
 0x633   :  { %4519 = vmatpush1.bf16.msra.mxu0 %v4518_v29 }
 0x634   :  { %5019 = vmatpush1.bf16.msra.mxu1 %v4506_v12  ;;  %4521 = vmatprep.subr.bf16.mxu0 %v4520_v49  ;;  %v4544_v12 = vpack.c.bf16 %v2116_v42, %v2114_v58  ;;  %v2147_v58 = vld [vmem:[#allocation9 + $0xf30] sm:$0xff]  ;;  %v2150_v42 = vld [vmem:[#allocation9 + $0xf48] sm:$0xff] }
 0x635   :  { %5021 = vmatprep.subr.bf16.mxu1 %v4508_v14  ;;  %v2113_v14 = vld [vmem:[#allocation9 + $0xe20] sm:$0xff] }
 0x637   :  { %4523 = vmatpush1.bf16.msra.mxu0 %v4522_v5 }
 0x638   :  { %5023 = vmatpush1.bf16.msra.mxu1 %v4510_v52  ;;  %4525 = vmatprep.subr.bf16.mxu0 %v4524_v39  ;;  %v4546_v52 = vpack.c.bf16 %v2115_v37, %v2113_v14  ;;  %v2149_v14 = vld [vmem:[#allocation9 + $0xf40] sm:$0xff]  ;;  %v2151_v37 = vld [vmem:[#allocation9 + $0xf50] sm:$0xff] }
 0x639   :  { %5025 = vmatprep.subr.bf16.mxu1 %v4512_v56  ;;  %v4548_v56 = vpack.c.bf16 %v2120_v55, %v2118_v62  ;;  %v2156_v62 = vld [vmem:[#allocation9 + $0xf78] sm:$0xff]  ;;  %v4582_v55 = vpack.c.bf16 %v2151_v37, %v2149_v14  ;;  %v3540_v14 = vld [vmem:[#allocation12 + $0xc0] sm:$0xff]  ;;  %v3541_v37 = vld [vmem:[#allocation12 + $0xc8] sm:$0xff] }
 0x63b   :  { %4527 = vmatpush1.bf16.msra.mxu0 %v4526_v36 }
 0x63c   :  { %5027 = vmatpush1.bf16.msra.mxu1 %v4514_v45  ;;  %4529 = vmatprep.subr.bf16.mxu0 %v4528_v20  ;;  %v4552_v45 = vpack.c.bf16 %v2124_v3, %v2122_v63  ;;  %v2160_v63 = vld [vmem:[#allocation9 + $0xf98] sm:$0xff] }
 0x63d   :  { %5029 = vmatprep.subr.bf16.mxu1 %v4516_v15  ;;  %v2121_v15 = vld [vmem:[#allocation9 + $0xe60] sm:$0xff] }
 0x63e   :  { %v4554_v51 = vpack.c.bf16 %v2123_v19, %v2121_v15  ;;  %v2159_v15 = vld [vmem:[#allocation9 + $0xf90] sm:$0xff]  ;;  %v2162_v19 = vld [vmem:[#allocation9 + $0xfa8] sm:$0xff] }
 0x63f   :  { %4531 = vmatpush1.bf16.msra.mxu0 %v4530_v54 }
 0x640   :  { %5031 = vmatpush1.bf16.msra.mxu1 %v4518_v29  ;;  %4533 = vmatprep.subr.bf16.mxu0 %v4532_v13  ;;  %v6666_v29 = vld [vmem:[#allocation2 + $0x1f] ss:$8 sm:$0x3] }
 0x641   :  { %5033 = vmatprep.subr.bf16.mxu1 %v4520_v49  ;;  %v2125_v49 = vld [vmem:[#allocation9 + $0xe80] sm:$0xff] }
 0x642   :  { %v4558_v33 = vpack.c.bf16 %v2127_v32, %v2125_v49  ;;  %v2161_v49 = vld [vmem:[#allocation9 + $0xfa0] sm:$0xff]  ;;  %v2163_v32 = vld [vmem:[#allocation9 + $0xfb0] sm:$0xff] }
 0x643   :  { %4535 = vmatpush1.bf16.msra.mxu0 %v4534_v30 }
 0x644   :  { %5035 = vmatpush1.bf16.msra.mxu1 %v4522_v5  ;;  %4537 = vmatprep.subr.bf16.mxu0 %v4536_v28  ;;  %v2132_v5 = vld [vmem:[#allocation9 + $0xeb8] sm:$0xff] }
 0x645   :  { %5037 = vmatprep.subr.bf16.mxu1 %v4524_v39  ;;  %v3401_v39 = vrot.slane %v6666_v29, %v6574_v21  ;;  %v4560_v17 = vpack.c.bf16 %v2132_v5, %v2130_v53  ;;  %v4594_v53 = vpack.c.bf16 %v2163_v32, %v2161_v49  ;;  %v3547_v49 = vld [vmem:[#allocation12 + $0xf8] sm:$0xff] }
 0x647   :  { %4539 = vmatpush1.bf16.msra.mxu0 %v4538_v43 }
 0x648   :  { %5039 = vmatpush1.bf16.msra.mxu1 %v4526_v36  ;;  %4541 = vmatprep.subr.bf16.mxu0 %v4540_v41  ;;  %v2134_v36 = vld [vmem:[#allocation9 + $0xec8] sm:$0xff] }
 0x649   :  { %5041 = vmatprep.subr.bf16.mxu1 %v4528_v20  ;;  %v2136_v20 = vld [vmem:[#allocation9 + $0xed8] sm:$0xff] }
 0x64a   :  { %2098 = vmatmul.mubr.f32.vlgmr.msra.gmra.mrb[4].mxu0 %v2026_v46  ;;  %v4564_v11 = vpack.c.bf16 %v2136_v20, %v2134_v36  ;;  %v4578_v46 = vpack.c.bf16 %v2147_v58, %v2145_v2  ;;  %v2169_v20 = vld [vmem:[#allocation9 + $0xfe0] sm:$0xff]  ;;  %v3538_v2 = vld [vmem:[#allocation12 + $0xb0] sm:$0xff] }
 0x64b   :  { %4543 = vmatpush1.bf16.msra.mxu0 %v4542_v9  ;;  %2248 = vmatprep.mubr.f32.mxu0 %v2181_v60  ;;  %v2154_v60 = vld [vmem:[#allocation9 + $0xf68] sm:$0xff]  ;;  %v3539_v58 = vld [vmem:[#allocation12 + $0xb8] sm:$0xff] }
 0x64c   :  { %5043 = vmatpush1.bf16.msra.mxu1 %v4530_v54  ;;  %4545 = vmatprep.subr.bf16.mxu0 %v4544_v12  ;;  %v2140_v54 = vld [vmem:[#allocation9 + $0xef8] sm:$0xff] }
 0x64d   :  { %5045 = vmatprep.subr.bf16.mxu1 %v4532_v13  ;;  %v4566_v13 = vpack.c.bf16 %v2135_v16, %v2133_v7  ;;  %v4568_v23 = vpack.c.bf16 %v2140_v54, %v2138_v47  ;;  %v2177_v7 = vrot.slane %v6660_v4, %v6571_v8  ;;  %v3397_v16 = vrot.slane %v6666_v29, %v6571_v8  ;;  %v3532_v47 = vld [vmem:[#allocation12 + $0x80] sm:$0xff]  ;;  %v3533_v54 = vld [vmem:[#allocation12 + $0x88] sm:$0xff]  ;;  %v3534_v4 = vld [vmem:[#allocation12 + $0x90] sm:$0xff] }
 0x64e   :  { %v3521_v29 = vld [vmem:[#allocation12 + $0x28] sm:$0xff] }
 0x64f   :  { %4547 = vmatpush1.bf16.msra.mxu0 %v4546_v52 }
 0x650   :  { %5047 = vmatpush1.bf16.msra.mxu1 %v4534_v30  ;;  %4549 = vmatprep.subr.bf16.mxu0 %v4548_v56  ;;  %v2144_v30 = vld [vmem:[#allocation9 + $0xf18] sm:$0xff] }
 0x651   :  { %5049 = vmatprep.subr.bf16.mxu1 %v4536_v28  ;;  %v4570_v28 = vpack.c.bf16 %v2139_v27, %v2137_v25  ;;  %v4572_v1 = vpack.c.bf16 %v2144_v30, %v2142_v26  ;;  %v3517_v25 = vld [vmem:[#allocation12 + $0x8] sm:$0xff]  ;;  %v3535_v26 = vld [vmem:[#allocation12 + $0x98] sm:$0xff]  ;;  %v3518_v30 = vld [vmem:[#allocation12 + $0x10] sm:$0xff] }
 0x653   :  { %4551 = vmatpush1.bf16.msra.mxu0 %v4550_v61 }
 0x654   :  { %5051 = vmatpush1.bf16.msra.mxu1 %v4538_v43  ;;  %4553 = vmatprep.subr.bf16.mxu0 %v4552_v45  ;;  %v2148_v43 = vld [vmem:[#allocation9 + $0xf38] sm:$0xff] }
 0x655   :  { %5053 = vmatprep.subr.bf16.mxu1 %v4540_v41  ;;  %v4574_v41 = vpack.c.bf16 %v2143_v44, %v2141_v31  ;;  %v4576_v38 = vpack.c.bf16 %v2148_v43, %v2146_v48  ;;  %v3536_v31 = vld [vmem:[#allocation12 + $0xa0] sm:$0xff]  ;;  %v3537_v44 = vld [vmem:[#allocation12 + $0xa8] sm:$0xff] }
 0x656   :  { %v5124_v43 = vpack.c.bf16 %v3537_v44, %v3536_v31 }
 0x657   :  { %4555 = vmatpush1.bf16.msra.mxu0 %v4554_v51  ;;  %3319 = vmatmul.mubr.f32.vlgmr.msra.gmra.mrb[8].mxu1 %v3247_v34  ;;  %v2166_v34 = vld [vmem:[#allocation9 + $0xfc8] sm:$0xff] }
 0x658   :  { %5055 = vmatpush1.bf16.msra.mxu1 %v4542_v9  ;;  %3468 = vmatprep.mubr.f32.mxu1 %v3401_v39  ;;  %v2152_v9 = vld [vmem:[#allocation9 + $0xf58] sm:$0xff]  ;;  %v2165_v39 = vld [vmem:[#allocation9 + $0xfc0] sm:$0xff] }
 0x659   :  { %4557 = vmatprep.subr.bf16.mxu0 %v4556_v22  ;;  %5057 = vmatprep.subr.bf16.mxu1 %v4544_v12  ;;  %v4580_v12 = vpack.c.bf16 %v2152_v9, %v2150_v42  ;;  %v5128_v42 = vpack.c.bf16 %v3539_v58, %v3538_v2  ;;  %v3522_v9 = vld [vmem:[#allocation12 + $0x30] sm:$0xff] }
 0x65b   :  { %4559 = vmatpush1.bf16.msra.mxu0 %v4558_v33 }
 0x65c   :  { %5059 = vmatpush1.bf16.msra.mxu1 %v4546_v52  ;;  %4561 = vmatprep.subr.bf16.mxu0 %v4560_v17  ;;  %v4584_v52 = vpack.c.bf16 %v2156_v62, %v2154_v60  ;;  %v5132_v60 = vpack.c.bf16 %v3541_v37, %v3540_v14  ;;  %v3524_v62 = vld [vmem:[#allocation12 + $0x40] sm:$0xff] }
 0x65d   :  { %5061 = vmatprep.subr.bf16.mxu1 %v4548_v56  ;;  %v2153_v56 = vld [vmem:[#allocation9 + $0xf60] sm:$0xff] }
 0x65e   :  { %v4586_v3 = vpack.c.bf16 %v2155_v59, %v2153_v56  ;;  %v3543_v59 = vld [vmem:[#allocation12 + $0xd8] sm:$0xff] }
 0x65f   :  { %4563 = vmatpush1.bf16.msra.mxu0 %v4562_v24 }
 0x660   :  { %5063 = vmatpush1.bf16.msra.mxu1 %v4550_v61  ;;  %4565 = vmatprep.subr.bf16.mxu0 %v4564_v11  ;;  %v4588_v61 = vpack.c.bf16 %v2160_v63, %v2158_v50  ;;  %v3526_v50 = vld [vmem:[#allocation12 + $0x50] sm:$0xff]  ;;  %v3527_v63 = vld [vmem:[#allocation12 + $0x58] sm:$0xff] }
 0x661   :  { %5065 = vmatprep.subr.bf16.mxu1 %v4552_v45  ;;  %v2157_v45 = vld [vmem:[#allocation9 + $0xf80] sm:$0xff] }
 0x662   :  { %v4590_v40 = vpack.c.bf16 %v2159_v15, %v2157_v45  ;;  %v3545_v45 = vld [vmem:[#allocation12 + $0xe8] sm:$0xff]  ;;  %v5138_v15 = vpack.c.bf16 %v3527_v63, %v3526_v50  ;;  %v3640_v50 = vld [vmem:[#allocation15 + $0x70] sm:$0xff]  ;;  %v3641_v63 = vld [vmem:[#allocation15 + $0x78] sm:$0xff] }
 0x663   :  { %4567 = vmatpush1.bf16.msra.mxu0 %v4566_v13 }
 0x664   :  { %5067 = vmatpush1.bf16.msra.mxu1 %v4554_v51  ;;  %4569 = vmatprep.subr.bf16.mxu0 %v4568_v23  ;;  %v4592_v51 = vpack.c.bf16 %v2164_v0, %v2162_v19  ;;  %v3528_v0 = vld [vmem:[#allocation12 + $0x60] sm:$0xff] }
 0x665   :  { %5069 = vmatprep.subr.bf16.mxu1 %v4556_v22  ;;  %v2168_v22 = vld [vmem:[#allocation9 + $0xfd8] sm:$0xff] }
 0x666   :  { %v4596_v5 = vpack.c.bf16 %v2168_v22, %v2166_v34  ;;  %v3530_v22 = vld [vmem:[#allocation12 + $0x70] sm:$0xff] }
 0x667   :  { %4571 = vmatpush1.bf16.msra.mxu0 %v4570_v28 }
 0x668   :  { %5071 = vmatpush1.bf16.msra.mxu1 %v4558_v33  ;;  %4573 = vmatprep.subr.bf16.mxu0 %v4572_v1  ;;  %v2167_v33 = vld [vmem:[#allocation9 + $0xfd0] sm:$0xff] }
 0x669   :  { %5073 = vmatprep.subr.bf16.mxu1 %v4560_v17  ;;  %v2170_v17 = vld [vmem:[#allocation9 + $0xfe8] sm:$0xff]  ;;  %v4598_v35 = vpack.c.bf16 %v2167_v33, %v2165_v39 }
 0x66a   :  { %v4600_v36 = vpack.c.bf16 %v2172_v18, %v2170_v17  ;;  %v3626_v39 = vld [vmem:[#allocation15] sm:$0xff]  ;;  %v3627_v33 = vld [vmem:[#allocation15 + $0x8] sm:$0xff]  ;;  %v3628_v17 = vld [vmem:[#allocation15 + $0x10] sm:$0xff]  ;;  %v5678_v18 = vmov 0.0|0.0  }
 0x66b   :  { %4575 = vmatpush1.bf16.msra.mxu0 %v4574_v41 }
 0x66c   :  { %5075 = vmatpush1.bf16.msra.mxu1 %v4562_v24  ;;  %4577 = vmatprep.subr.bf16.mxu0 %v4576_v38  ;;  %v2171_v24 = vld [vmem:[#allocation9 + $0xff0] sm:$0xff] }
 0x66d   :  { %5077 = vmatprep.subr.bf16.mxu1 %v4564_v11  ;;  %v4602_v11 = vpack.c.bf16 %v2171_v24, %v2169_v20  ;;  %v3630_v24 = vld [vmem:[#allocation15 + $0x20] sm:$0xff] }
 0x66f   :  { %4579 = vmatpush1.bf16.msra.mxu0 %v4578_v46 }
 0x670   :  { %5079 = vmatpush1.bf16.msra.mxu1 %v4566_v13  ;;  %4581 = vmatprep.subr.bf16.mxu0 %v4580_v12  ;;  %v5116_v13 = vpack.c.bf16 %v3533_v54, %v3532_v47  ;;  %v3633_v47 = vld [vmem:[#allocation15 + $0x38] sm:$0xff] }
 0x671   :  { %5081 = vmatprep.subr.bf16.mxu1 %v4568_v23  ;;  %v3516_v23 = vld [vmem:[#allocation12] sm:$0xff] }
 0x672   :  { %v5118_v27 = vpack.c.bf16 %v3517_v25, %v3516_v23  ;;  %v3635_v23 = vld [vmem:[#allocation15 + $0x48] sm:$0xff] }
 0x673   :  { %4583 = vmatpush1.bf16.msra.mxu0 %v4582_v55 }
 0x674   :  { %5083 = vmatpush1.bf16.msra.mxu1 %v4570_v28  ;;  %4585 = vmatprep.subr.bf16.mxu0 %v4584_v52  ;;  %v5120_v28 = vpack.c.bf16 %v3535_v26, %v3534_v4  ;;  %v3637_v4 = vld [vmem:[#allocation15 + $0x58] sm:$0xff] }
 0x675   :  { %5085 = vmatprep.subr.bf16.mxu1 %v4572_v1  ;;  %v3519_v1 = vld [vmem:[#allocation12 + $0x18] sm:$0xff] }
 0x676   :  { %v5122_v48 = vpack.c.bf16 %v3519_v1, %v3518_v30  ;;  %v5679_v30 = vmov 1966171168  }
 0x677   :  { %4587 = vmatpush1.bf16.msra.mxu0 %v4586_v3 }
 0x678   :  { %5087 = vmatpush1.bf16.msra.mxu1 %v4574_v41  ;;  %4589 = vmatprep.subr.bf16.mxu0 %v4588_v61  ;;  %v3520_v41 = vld [vmem:[#allocation12 + $0x20] sm:$0xff] }
 0x679   :  { %5089 = vmatprep.subr.bf16.mxu1 %v4576_v38  ;;  %v5126_v38 = vpack.c.bf16 %v3521_v29, %v3520_v41 }
 0x67b   :  { %4591 = vmatpush1.bf16.msra.mxu0 %v4590_v40 }
 0x67c   :  { %5091 = vmatpush1.bf16.msra.mxu1 %v4578_v46  ;;  %4593 = vmatprep.subr.bf16.mxu0 %v4592_v51  ;;  %v3523_v46 = vld [vmem:[#allocation12 + $0x38] sm:$0xff] }
 0x67d   :  { %5093 = vmatprep.subr.bf16.mxu1 %v4580_v12  ;;  %v5130_v12 = vpack.c.bf16 %v3523_v46, %v3522_v9  ;;  %v3500_v46 = vld [vmem:[#allocation10] sm:$0x3] }
 0x67e   :  { %v3509_v14 = vrot.slane %v3500_v46, %v6574_v21  ;;  %v3721_v21 = vld [vmem:[%s6770_s9 + $0x8] sm:$0xff] }
 0x67f   :  { %4595 = vmatpush1.bf16.msra.mxu0 %v4594_v53 }
 0x680   :  { %5095 = vmatpush1.bf16.msra.mxu1 %v4582_v55  ;;  %4597 = vmatprep.subr.bf16.mxu0 %v4596_v5  ;;  %v3525_v55 = vld [vmem:[#allocation12 + $0x48] sm:$0xff] }
 0x681   :  { %5097 = vmatprep.subr.bf16.mxu1 %v4584_v52  ;;  %v3542_v52 = vld [vmem:[#allocation12 + $0xd0] sm:$0xff]  ;;  %v5134_v56 = vpack.c.bf16 %v3525_v55, %v3524_v62 }
 0x683   :  { %4599 = vmatpush1.bf16.msra.mxu0 %v4598_v35 }
 0x684   :  { %5099 = vmatpush1.bf16.msra.mxu1 %v4586_v3  ;;  %4601 = vmatprep.subr.bf16.mxu0 %v4600_v36  ;;  %v5136_v3 = vpack.c.bf16 %v3543_v59, %v3542_v52 }
 0x685   :  { %5101 = vmatprep.subr.bf16.mxu1 %v4588_v61  ;;  %v3544_v61 = vld [vmem:[#allocation12 + $0xe0] sm:$0xff] }
 0x686   :  { %v5140_v19 = vpack.c.bf16 %v3545_v45, %v3544_v61  ;;  %v3722_v61 = vld [vmem:[%s6770_s9 + $0x10] sm:$0xff] }
 0x687   :  { %4603 = vmatpush1.bf16.msra.mxu0 %v4602_v11 }
 0x688   :  { %5103 = vmatpush1.bf16.msra.mxu1 %v4590_v40  ;;  %5117 = vmatprep.subr.bf16.mxu0 %v5116_v13  ;;  %v3529_v40 = vld [vmem:[#allocation12 + $0x68] sm:$0xff] }
 0x689   :  { %5105 = vmatprep.subr.bf16.mxu1 %v4592_v51  ;;  %v3546_v51 = vld [vmem:[#allocation12 + $0xf0] sm:$0xff]  ;;  %v5142_v32 = vpack.c.bf16 %v3529_v40, %v3528_v0  ;;  %v3634_v13 = vld [vmem:[#allocation15 + $0x40] sm:$0xff] }
 0x68a   :  { %2249 = vmatmul.mubr.f32.vlgmr.msra.gmra.mrb[4].mxu0 %v2177_v7  ;;  %v5144_v34 = vpack.c.bf16 %v3547_v49, %v3546_v51  ;;  %v5161_v25 = vpack.c.bf16 %v3635_v23, %v3634_v13  ;;  %v3724_v0 = vld [vmem:[%s6770_s9 + $0x20] sm:$0xff]  ;;  %v3725_v40 = vld [vmem:[%s6770_s9 + $0x28] sm:$0xff]  ;;  %v3726_v51 = vld [vmem:[%s6770_s9 + $0x30] sm:$0xff] }
 0x68b   :  { %5119 = vmatpush3.bf16.msra.mxu0 %v5118_v27  ;;  %v3636_v27 = vld [vmem:[#allocation15 + $0x50] sm:$0xff]  ;;  %v3727_v49 = vld [vmem:[%s6770_s9 + $0x38] sm:$0xff] }
 0x68c   :  { %5107 = vmatpush1.bf16.msra.mxu1 %v4594_v53  ;;  %5121 = vmatprep.subr.bf16.mxu0 %v5120_v28  ;;  %v3531_v53 = vld [vmem:[#allocation12 + $0x78] sm:$0xff]  ;;  %v5164_v26 = vpack.c.bf16 %v3637_v4, %v3636_v27  ;;  %v2261_v28 = vunpack.c.l.s4 %v5679_v30  ;;  %v3735_v13 = vld [vmem:[%s6770_s9 + $0x78] sm:$0xff]  ;;  %v3856_v30 = vld [vmem:[#allocation18] ss:$0 sm:$0xff] }
 0x68d   :  { %5109 = vmatprep.subr.bf16.mxu1 %v4596_v5  ;;  %v5146_v5 = vpack.c.bf16 %v3531_v53, %v3530_v22  ;;  %v3729_v22 = vld [vmem:[%s6770_s9 + $0x48] sm:$0xff] }
 0x68e   :  { %v2262_v1 = vunpack.c.0.s8 %v2261_v28 }
 0x68f   :  { %5123 = vmatpush3.bf16.msra.mxu0 %v5122_v48 }
 0x690   :  { %5111 = vmatpush1.bf16.msra.mxu1 %v4598_v35  ;;  %5125 = vmatprep.subr.bf16.mxu0 %v5124_v43  ;;  %v5149_v35 = vpack.c.bf16 %v3627_v33, %v3626_v39  ;;  %v2265_v44 = vsub.s32 %v2262_v1, %v6566_v57  ;;  %v3731_v39 = vld [vmem:[%s6770_s9 + $0x58] sm:$0xff] }
 0x691   :  { %5113 = vmatprep.subr.bf16.mxu1 %v4600_v36  ;;  %v3629_v36 = vld [vmem:[#allocation15 + $0x18] sm:$0xff] }
 0x692   :  { %v5152_v20 = vpack.c.bf16 %v3629_v36, %v3628_v17  ;;  %v3732_v17 = vld [vmem:[%s6770_s9 + $0x60] sm:$0xff] }
 0x693   :  { %5127 = vmatpush3.bf16.msra.mxu0 %v5126_v38 }
 0x694   :  { %5115 = vmatpush1.bf16.msra.mxu1 %v4602_v11  ;;  %5129 = vmatprep.subr.bf16.mxu0 %v5128_v42  ;;  %v3631_v11 = vld [vmem:[#allocation15 + $0x28] sm:$0xff] }
 0x695   :  { %5148 = vmatprep.subr.bf16.mxu1 %v5678_v18  ;;  %v5155_v7 = vpack.c.bf16 %v3631_v11, %v3630_v24  ;;  %v3854_v24 = vld [vmem:[#allocation13] ss:$0 sm:$0xff] }
 0x697   :  { %3469 = vmatmul.mubr.f32.vlgmr.msra.gmra.mrb[8].mxu1 %v3397_v16  ;;  %5131 = vmatpush3.bf16.msra.mxu0 %v5130_v12  ;;  %v3632_v16 = vld [vmem:[#allocation15 + $0x30] sm:$0xff]  ;;  %v3505_v12 = vrot.slane %v3500_v46, %v6571_v8 }
 0x698   :  { %5133 = vmatprep.subr.bf16.mxu0 %v5132_v60  ;;  %5150 = vmatpush3.bf16.msra.mxu1 %v5149_v35  ;;  %v5158_v54 = vpack.c.bf16 %v3633_v47, %v3632_v16  ;;  %v3720_v8 = vld [vmem:[%s6770_s9] sm:$0xff]  ;;  %v3733_v35 = vld [vmem:[%s6770_s9 + $0x68] sm:$0xff] }
 0x699   :  { %5151 = vmatprep.subr.bf16.mxu1 %v5678_v18  ;;  %3958 = vmatprep.mubr.msk.f32.mxu1 %vm5680_vm15, %v5671_v6  ;;  %v5173_v45 = vpack.c.bf16 %v3721_v21, %v3720_v8  ;;  %v5191_v36 = vpack.c.bf16 %v3733_v35, %v3732_v17 }
 0x69b   :  { %5135 = vmatpush3.bf16.msra.mxu0 %v5134_v56  ;;  %v3639_v56 = vld [vmem:[#allocation15 + $0x68] sm:$0xff] }
 0x69c   :  { %5137 = vmatprep.subr.bf16.mxu0 %v5136_v3  ;;  %5153 = vmatpush3.bf16.msra.mxu1 %v5152_v20  ;;  %v5167_v59 = vpack.c.bf16 %v3639_v56, %v3638_v10  ;;  %v5170_v3 = vpack.c.bf16 %v3641_v63, %v3640_v50 }
 0x69d   :  { %5154 = vmatprep.subr.bf16.mxu1 %v5678_v18 }
 0x69f   :  { %5139 = vmatpush3.bf16.msra.mxu0 %v5138_v15  ;;  %v3723_v15 = vld [vmem:[%s6770_s9 + $0x18] sm:$0xff] }
 0x6a0   :  { %5141 = vmatprep.subr.bf16.mxu0 %v5140_v19  ;;  %5156 = vmatpush3.bf16.msra.mxu1 %v5155_v7  ;;  %v5176_v19 = vpack.c.bf16 %v3723_v15, %v3722_v61 }
 0x6a1   :  { %5157 = vmatprep.subr.bf16.mxu1 %v5678_v18 }
 0x6a3   :  { %5143 = vmatpush3.bf16.msra.mxu0 %v5142_v32  ;;  %v5182_v32 = vpack.c.bf16 %v3727_v49, %v3726_v51 }
 0x6a4   :  { %5145 = vmatprep.subr.bf16.mxu0 %v5144_v34  ;;  %5159 = vmatpush3.bf16.msra.mxu1 %v5158_v54  ;;  %v3728_v34 = vld [vmem:[%s6770_s9 + $0x40] sm:$0xff]  ;;  %v3734_v54 = vld [vmem:[%s6770_s9 + $0x70] sm:$0xff] }
 0x6a5   :  { %5160 = vmatprep.subr.bf16.mxu1 %v5678_v18  ;;  %v5185_v53 = vpack.c.bf16 %v3729_v22, %v3728_v34  ;;  %v5194_v23 = vpack.c.bf16 %v3735_v13, %v3734_v54 }
 0x6a7   :  { %5147 = vmatpush3.bf16.msra.mxu0 %v5146_v5  ;;  %v3730_v5 = vld [vmem:[%s6770_s9 + $0x50] sm:$0xff]  ;;  %s5681_s9 = smov [#allocation19]  }
 0x6a8   :  { %5172 = vmatprep.subr.bf16.mxu0 %v5678_v18  ;;  %5162 = vmatpush3.bf16.msra.mxu1 %v5161_v25  ;;  %v5188_v33 = vpack.c.bf16 %v3731_v39, %v3730_v5  ;;  %v3855_v25 = vld [vmem:[#allocation16] ss:$0 sm:$0xff]  ;;  %s3835_s3 = sshll.u32 %s5681_s9, 4  ;;  %s3836_s3 = int_to_ptr.vmem [resolvable:$true] %s3835_s3 }
 0x6a9   :  { %5163 = vmatprep.subr.bf16.mxu1 %v5678_v18  ;;  %s5617_s30 = scalar_lea.vmem %s3836_s3, 32  ;;  %p5622_p3 = scmp.lt.s32.totalorder %s3836_s3, %s3836_s3 }
 0x6aa   :  { %p5618_p2 = scmp.ne.s32.totalorder %s3836_s3, %s5617_s30  ;;  %p5623_p4 = scmp.lt.s32.totalorder %s5617_s30, %s5617_s30 }
 0x6ac   :  { %5165 = vmatpush3.bf16.msra.mxu1 %v5164_v26  ;;  %p5624_p5 = por %p5623_p4, %p5622_p3 }
 0x6ad   :  { %5166 = vmatprep.subr.bf16.mxu1 %v5678_v18 }
 0x6ae   :  { %p5625_p6 = pnand %p5624_p5, %p5618_p2 }
 0x6b0   :  { %5168 = vmatpush3.bf16.msra.mxu1 %v5167_v59 }
 0x6b1   :  { %5169 = vmatprep.subr.bf16.mxu1 %v5678_v18 }
 0x6b4   :  { %5171 = vmatpush3.bf16.msra.mxu1 %v5170_v3 }
 0x75d   :  { %v2250_v31 = vpop.f32.mrb[4].mxu0 }
 0x75e   :  { %v2252_v48 = vpop.f32.mrb[5].mxu0 }
 0x75f   :  { %v2259_v43 = vcombine.low %v2250_v31, %v2252_v48 }
 0x761   :  { %v2266_v41 = vrot.slane %v2259_v43, %v2265_v44 }
 0x763   :  { %v2273_v29 = vrot.slane %v2266_v41, %v2265_v44 }
 0x765   :  { %2279 = vst.msk [vmem:[#allocation3] ss:$8 sm:$0x3] %vm2277_vm14, %v2273_v29 }
 0x76a   :  { %v3470_v38 = vpop.f32.mrb[8].mxu1 }
 0x76b   :  { %v3472_v2 = vpop.f32.mrb[9].mxu1 }
 0x76c   :  { %v3479_v58 = vcombine.low %v3470_v38, %v3472_v2 }
 0x76e   :  { %v3486_v42 = vrot.slane %v3479_v58, %v2265_v44 }
 0x770   :  { %v3493_v9 = vrot.slane %v3486_v42, %v2265_v44 }
 0x772   :  { %3496 = vst.msk [vmem:[#allocation3 + $0x1] ss:$8 sm:$0x3] %vm2277_vm14, %v3493_v9 }
 0x779   :  { %v3499_v37 = vld [vmem:[#allocation3 + $0x8] sm:$0x3]  ;;  %v3498_v57 = vld [vmem:[#allocation3] sm:$0x3] }
 0x77a   :  { %v3513_v60 = vadd.f32 %v3509_v14, %v3499_v37  ;;  %v3512_v62 = vadd.f32 %v3505_v12, %v3498_v57 }
 0x77c   :  { %v3515_v55 = vmax.f32 %v3513_v60, 0.0  ;;  %v3514_v52 = vmax.f32 %v3512_v62, 0.0 }
 0x77e   :  { %3619 = vmatprep.mubr.f32.mxu0 %v3515_v55 }
 0x77f   :  { %3620 = vmatmul.mubr.f32.vlgmr.msra.gmra.mrb[6].mxu0 %v3514_v52 }
 0x780   :  { %3993 = vmatprep.mubr.msk.f32.mxu0 %vm5680_vm15, %v5671_v6  ;;  %5174 = vmatpush3.bf16.msra.mxu0 %v5173_v45  ;;  %v5179_v6 = vpack.c.bf16 %v3725_v40, %v3724_v0 }
 0x781   :  { %5175 = vmatprep.subr.bf16.mxu0 %v5678_v18 }
 0x784   :  { %5177 = vmatpush3.bf16.msra.mxu0 %v5176_v19 }
 0x785   :  { %5178 = vmatprep.subr.bf16.mxu0 %v5678_v18 }
 0x788   :  { %5180 = vmatpush3.bf16.msra.mxu0 %v5179_v6 }
 0x789   :  { %5181 = vmatprep.subr.bf16.mxu0 %v5678_v18 }
 0x78c   :  { %5183 = vmatpush3.bf16.msra.mxu0 %v5182_v32 }
 0x78d   :  { %5184 = vmatprep.subr.bf16.mxu0 %v5678_v18 }
 0x790   :  { %5186 = vmatpush3.bf16.msra.mxu0 %v5185_v53 }
 0x791   :  { %5187 = vmatprep.subr.bf16.mxu0 %v5678_v18 }
 0x794   :  { %5189 = vmatpush3.bf16.msra.mxu0 %v5188_v33 }
 0x795   :  { %5190 = vmatprep.subr.bf16.mxu0 %v5678_v18 }
 0x798   :  { %5192 = vmatpush3.bf16.msra.mxu0 %v5191_v36 }
 0x799   :  { %5193 = vmatprep.subr.bf16.mxu0 %v5678_v18 }
 0x79c   :  { %5195 = vmatpush3.bf16.msra.mxu0 %v5194_v23 }
 0x852   :  { %v3889_v20 = vpop.f32.mrb[6].mxu0 }
 0x853   :  { %v3890_v11 = vpop.f32.mrb[7].mxu0 }
 0x854   :  { %v3891_v7 = vadd.f32 %v3890_v11, %v3889_v20 }
 0x856   :  { %v3622_v16 = vadd.f32 %v3891_v7, %v3854_v24 }
 0x858   :  { %v3625_v47 = vmax.f32 %v3622_v16, 0.0 }
 0x85a   :  { %3959 = vmatmul.mubr.f32.vlgmr.msra.gmra.mrb[10].mxu1 %v3625_v47 }
 0x92d   :  { %v3715_v27 = vpop.f32.mrb[10].mxu1 }
 0x92e   :  { %v3716_v18 = vadd.f32 %v3855_v25, %v3715_v27  ;;  %v3960_v4 = vpop.f32.mrb[11].mxu1 }
 0x930   :  { %v3719_v26 = vmax.f32 %v3716_v18, 0.0 }
 0x932   :  { %3994 = vmatmul.mubr.f32.vlgmr.msra.gmra.mrb[8].mxu0 %v3719_v26 }
 0xa05   :  { %v3809_v28 = vpop.f32.mrb[8].mxu0 }
 0xa06   :  { %v3810_v1 = vadd.f32 %v3856_v30, %v3809_v28  ;;  %v3995_v31 = vpop.f32.mrb[9].mxu0 }
 0xa08   :  { %v3813_v44 = vmax.f32 %v3810_v1, 0.0 }
 0xa0a   :  { %v3815_v48 = vsel %vm3814_vm0, %v3813_v44, -inf }
 0xa0b   :  { %3816 = vmax.xlane.f32.xlu0 %v3815_v48 }
 0xa98   :  { %v3817_v43 = vpop.xlane.xlu0 %3816 }
 0xa99   :  { %v3818_v41 = vsub.f32 %v3813_v44, %v3817_v43 }
 0xa9b   :  { %v3819_v29 = vmul.f32 1.442695, %v3818_v41 }
 0xa9d   :  { %5415 = vpow2.f32 %v3819_v29 }
 0xaa7   :  { %v5416_v38 = vpop.eup %5415 }
 0xaa8   :  { %v3821_v2 = vsel %vm3814_vm0, %v5416_v38, 0.0 }
 0xaa9   :  { %3822 = vadd.xlane.f32.xlu1 %v3821_v2 }
 0xb36   :  { %v3823_v58 = vpop.xlane.xlu1 %3822 }
 0xb37   :  { %5417 = vlog2.f32 %v3823_v58 }
 0xb41   :  { %v5418_v42 = vpop.eup %5417 }
 0xb42   :  { %v3825_v9 = vmul.f32 0.6931472, %v5418_v42 }
 0xb44   :  { %v3826_v46 = vadd.f32 %v3825_v9, %v3817_v43 }
 0xb46   :  { %v3827_v12 = vsub.f32 %v3813_v44, %v3826_v46 }
 0xb48   :  { %3828 = vst.msk [vmem:[#allocation19] sm:$0x3] %vm3814_vm0, %v3827_v12 }
 0xb49   :  { %5628 = shalt.err (!%p5625_p6)
}
 0xb4a   :  { %s5629_s2 = scalar_lea.hbm %s6772_s11, 32 }
 0xb4b   :  { %p5630_p7 = scmp.ne.s32.totalorder %s6772_s11, %s5629_s2  ;;  %p5633_p8 = scmp.lt.u32.totalorder %s5629_s2, %s6772_s11 }
 0xb4d   :  { %p5635_p9 = pnand %p5633_p8, %p5630_p7 }
 0xb4f   :  { %5638 = shalt.err (!%p5635_p9)
}
 0xb50   :  { %3838 = dma.vmem_to_hbm [thread:$0]  %s3836_s3, 32, %s6772_s11, [#allocation6]  }
 0xb51   :  { %5649 = dma.done.wait [#allocation6], 32  }
 0xb52   :  { %5650 = vsyncadd [#allocation6], 4294967264 }
 0xb53   :  { %3842 = vsyncpa [#allocation5], 1 }
 0xb54   :  { %3843 = vsyncpa [#allocation8], 1 }
 0xb55   :  { %3844 = vsyncpa [#allocation11], 1 }
 0xb56   :  { %3845 = vsyncpa [#allocation14], 1 }
 0xb57   :  { %3846 = vsyncpa [#allocation17], 1 }
 0xb58   :  { %3847 = vsyncpa [#allocation6], 1 }

</bundles_post_ra>
